<compile_context>
chip_gen: v7x
topology: tpu7x:2x2x1
jax: 0.10.0
libtpu: 0.0.40
codegen_flags: <defaults>
</compile_context>

<pallas_src>
import math
import functools

import jax
import jax.numpy as jnp
import numpy as np
from jax.experimental import pallas as pl


# ------------------------------ Pallas kernel -------------------------------

def chgan_fused_kernel(xt_ref, wqkv_ref, sa_ref, wout_ref, b_ref, o_ref, *,
                       num_heads):
    # xt_ref:   (T*N, ntype*d)   per-node-type masked copies of the input rows
    # wqkv_ref: (ntype*d, 4*d)   fused [Q | K | V | I] weights
    # sa_ref:   (2, 2*T*N, T*N)  [0]=mult. scale (fwd;rev), [1]=additive bias/mask
    # wout_ref: (2*d, d)         output projection
    # b_ref:    (1, d)           output bias
    # o_ref:    (T*N, d)
    tn = xt_ref.shape[0]
    d = wout_ref.shape[0] // 2
    dh = d // num_heads

    # --- fused QKV + residual-identity projection: ONE 128-lane MXU matmul --
    qkvx = jnp.dot(xt_ref[...], wqkv_ref[...],
                   preferred_element_type=jnp.float32)       # (TN, 4d)
    q = qkvx[:, 0 * d:1 * d]
    k = qkvx[:, 1 * d:2 * d]
    v = qkvx[:, 2 * d:3 * d]
    x = qkvx[:, 3 * d:4 * d]                                  # residual term

    scale2 = sa_ref[0]            # (2*TN, TN): decay/sqrt(dh); 0 off-time-block
    add2 = sa_ref[1]              # (2*TN, TN): bias*decay; -1e30 masked/off-block

    # Duplicate q once (sublane stack) so each head's score matmul + softmax
    # covers BOTH edge directions in a single pass.
    q2 = jnp.concatenate([q, q], axis=0)                      # (2*TN, d)
    lane = jax.lax.broadcasted_iota(jnp.int32, (1, d), 1)     # hoisted

    # [fwd; rev] attention outputs; heads write disjoint lanes -> plain sum.
    acc = jnp.zeros((2 * tn, d), jnp.float32)
    for h in range(num_heads):                                # static unroll
        lo = h * dh
        hm = ((lane >= lo) & (lane < lo + dh)).astype(jnp.float32)   # (1, d)
        # Scores for all (time, node) pairs at once; cross-time / masked
        # entries are killed by scale=0 / add=-1e30, so the per-time-step
        # softmax stays exact.
        s = jnp.einsum('id,jd->ij', q2 * hm, k,
                       preferred_element_type=jnp.float32)    # (2*TN, TN)
        a = s * scale2 + add2
        m = jnp.max(a, axis=-1, keepdims=True)
        e = jnp.exp(a - m)
        denom = jnp.sum(e, axis=-1, keepdims=True)
        r = pl.reciprocal(denom, approx=True)                 # EUP slot
        r = r * (2.0 - denom * r)                             # Newton step ~f32
        p = e * r
        # P·V against the head-masked full-width V: the result lands directly
        # in head-h lanes of acc (no concat, no lane relayout).
        acc = acc + jnp.dot(p, v * hm, preferred_element_type=jnp.float32)

    wout = wout_ref[...]
    y = jnp.dot(acc[:tn], wout[:d], preferred_element_type=jnp.float32)
    y = y + jnp.dot(acc[tn:], wout[d:], preferred_element_type=jnp.float32)
    o_ref[...] = (y + b_ref[...] + x).astype(o_ref.dtype)


# -------------------------------- Wrapper ------------------------------------

def _block_diag_heads(W):
    # (ntype, H, dh, dh) -> (ntype, d, d) block-diagonal over heads.
    ntype, H, dh, _ = W.shape
    d = H * dh
    out = jnp.zeros((ntype, d, d), jnp.float32)
    for h in range(H):
        out = out.at[:, h * dh:(h + 1) * dh, h * dh:(h + 1) * dh].set(W[:, h])
    return out


def edge_bias_from_path(edge_path_type, E_w, w_eb, b_eb):
    # TODO(synk): nn.Embedding gather + mean + 1-wide linear kept as tiny XLA
    # glue; a Pallas DMA-gather buys nothing at (N, N, L) = (8, 8, 4).
    ef = E_w[edge_path_type]                         # (N, N, L, d)
    eb = ef.mean(axis=-2)                            # (N, N, d)
    return (eb @ w_eb + b_eb).astype(jnp.float32)    # (N, N)


def chgan_forward(x, params, graph, lambda_decay=0.5):
    N, T, d = x.shape
    ntype, H, dh, _ = params['Q'].shape
    TN = T * N
    NEG = jnp.float32(-1e30)
    inv_sqrt_dh = jnp.float32(1.0 / math.sqrt(dh))

    # --- tiny XLA-side preprocessing (all O(KiB)) ---------------------------
    x_rows = jnp.transpose(x, (1, 0, 2)).reshape(TN, d)          # row = t*N + n
    sel = jnp.tile(jax.nn.one_hot(graph['node_type'], ntype,
                                  dtype=jnp.float32), (T, 1))    # (TN, ntype)
    # Per-type masked replicas: the single fused-matmul LHS.
    x_typed = (sel[:, :, None] * x_rows[:, None, :]).reshape(TN, ntype * d)

    # Fused weight: [Q | K | V | I] per node type, block-diagonal over heads.
    bdQ = _block_diag_heads(params['Q'])
    bdK = _block_diag_heads(params['K'])
    bdV = _block_diag_heads(params['V'])
    eye = jnp.tile(jnp.eye(d, dtype=jnp.float32)[None], (ntype, 1, 1))
    w_qkvx = jnp.concatenate([bdQ, bdK, bdV, eye], axis=2).reshape(ntype * d, 4 * d)

    eyeT = jnp.eye(T, dtype=jnp.float32)
    blk = jnp.kron(eyeT, jnp.ones((N, N), jnp.float32))          # time-block mask

    def fold_dir(ept, epl, msk):
        bias = edge_bias_from_path(ept, params['E_w'], params['w_eb'],
                                   params['b_eb'])
        decay = jnp.exp(lambda_decay * (epl - 1.0)).astype(jnp.float32)
        # Fold bias*decay and the mask into one additive term; finite -1e30
        # (instead of -inf) keeps fully-masked rows NaN-free.
        add = jnp.where(msk > 0.5, bias * decay, NEG)            # (N, N)
        # Block-diagonal-over-time (TN, TN) expansion; 1/sqrt(dh) folded in.
        scale_big = jnp.kron(eyeT, decay * inv_sqrt_dh)
        add_big = jnp.where(blk > 0.5, jnp.kron(eyeT, add), NEG)
        return scale_big, add_big

    sf, af = fold_dir(graph['edge_path_type'], graph['edge_path_len'],
                      graph['mask'])
    sr, ar = fold_dir(graph['edge_path_type_r'], graph['edge_path_len_r'],
                      graph['mask_r'])
    sa = jnp.stack([jnp.concatenate([sf, sr], axis=0),
                    jnp.concatenate([af, ar], axis=0)], axis=0)  # (2, 2TN, TN)

    kern = functools.partial(chgan_fused_kernel, num_heads=H)
    # Single fused invocation, no grid: whole working set (<200 KiB) is VMEM
    # resident, no intermediate ever round-trips through HBM.
    y = pl.pallas_call(
        kern,
        out_shape=jax.ShapeDtypeStruct((TN, d), jnp.float32),
    )(x_typed, w_qkvx, sa, params['W_out'], params['b_out'].reshape(1, d))

    return y.reshape(T, N, d).transpose(1, 0, 2)                 # (N, T, d)


# ----------------------- Plain-JAX reference (check) ------------------------

def reference_attention(x, node_type, ept, epl, msk, params, lambda_decay):
    N, T, d = x.shape
    ntype, H, dh, _ = params['Q'].shape
    Qm, Km, Vm = params['Q'][node_type], params['K'][node_type], params['V'][node_type]
    xr = x.reshape(N, T, H, dh).transpose(0, 2, 1, 3)
    q = jnp.einsum('nhtd,nhdc->nhtc', xr, Qm)
    k = jnp.einsum('nhtd,nhdc->nhtc', xr, Km)
    v = jnp.einsum('nhtd,nhdc->nhtc', xr, Vm)
    q, k, v = (a.transpose(1, 2, 0, 3) for a in (q, k, v))
    a = jnp.einsum('hnik,hnjk->hnij', q, k) / math.sqrt(dh)
    eb = edge_bias_from_path(ept, params['E_w'], params['w_eb'], params['b_eb'])
    a = a + eb[None]
    a = a * jnp.exp(lambda_decay * (epl - 1.0))[None]
    a = jnp.where(msk[None] == 0, -jnp.inf, a)
    a = jax.nn.softmax(a, axis=-1)
    out = jnp.einsum('hnij,hnjk->hnik', a, v)
    return out.transpose(2, 1, 0, 3).reshape(N, T, d)


def reference_forward(x, params, graph, lambda_decay=0.5):
    of = reference_attention(x, graph['node_type'], graph['edge_path_type'],
                             graph['edge_path_len'], graph['mask'],
                             params, lambda_decay)
    orr = reference_attention(x, graph['node_type'], graph['edge_path_type_r'],
                              graph['edge_path_len_r'], graph['mask_r'],
                              params, lambda_decay)
    cat = jnp.concatenate([of, orr], axis=-1)
    return cat @ params['W_out'] + params['b_out'] + x


# --------------------------------- Main -------------------------------------

if __name__ == "__main__":
    N, T, d = 8, 8, 32
    num_heads, ntype, etype, L = 4, 3, 5, 4
    dh = d // num_heads
    lambda_decay = 0.5

    key = jax.random.PRNGKey(0)
    ks = jax.random.split(key, 14)

    params = {
        'Q': jax.random.normal(ks[0], (ntype, num_heads, dh, dh), jnp.float32),
        'K': jax.random.normal(ks[1], (ntype, num_heads, dh, dh), jnp.float32),
        'V': jax.random.normal(ks[2], (ntype, num_heads, dh, dh), jnp.float32),
        # nn.Embedding(etype, d, padding_idx=0): row 0 zeroed
        'E_w': jax.random.normal(ks[3], (etype, d), jnp.float32).at[0].set(0.0),
        'w_eb': jax.random.normal(ks[4], (d,), jnp.float32) / math.sqrt(d),
        'b_eb': jnp.float32(0.01),
        'W_out': jax.random.normal(ks[5], (2 * d, d), jnp.float32) / math.sqrt(2 * d),
        'b_out': jax.random.normal(ks[6], (d,), jnp.float32) * 0.01,
    }

    mask = (jax.random.uniform(ks[10], (N, N)) < 0.7).astype(jnp.float32)
    mask = mask.at[jnp.arange(N), jnp.arange(N)].set(1.0)
    graph = {
        'node_type': jax.random.randint(ks[7], (N,), 0, ntype),
        'edge_path_type': jax.random.randint(ks[8], (N, N, L), 0, etype),
        'edge_path_type_r': jnp.transpose(
            jax.random.randint(ks[8], (N, N, L), 0, etype), (1, 0, 2)),
        'edge_path_len': jax.random.randint(ks[9], (N, N), 1, L + 1).astype(jnp.float32),
        'edge_path_len_r': jax.random.randint(ks[9], (N, N), 1, L + 1).astype(jnp.float32).T,
        'mask': mask,
        'mask_r': mask.T,
    }

    x = jax.random.normal(ks[11], (N, T, d), jnp.float32)

    fwd = jax.jit(chgan_forward)
    out = jax.block_until_ready(fwd(x, params, graph))
    ref = jax.block_until_ready(jax.jit(reference_forward)(x, params, graph))

    np.testing.assert_allclose(np.asarray(out), np.asarray(ref),
                               rtol=2e-4, atol=2e-4)
    print("KERNEL_OK")
</pallas_src>

<mosaic_0001>
module attributes {stable_mosaic.version = 11 : i64} {
  func.func @chgan_fused_kernel(%arg0: memref<64x96xf32, #tpu.memory_space<vmem>>, %arg1: memref<96x128xf32, #tpu.memory_space<vmem>>, %arg2: memref<2x128x64xf32, #tpu.memory_space<vmem>>, %arg3: memref<64x32xf32, #tpu.memory_space<vmem>>, %arg4: memref<1x32xf32, #tpu.memory_space<vmem>>, %arg5: memref<64x32xf32, #tpu.memory_space<vmem>>) attributes {dimension_semantics = [], scalar_prefetch = 0 : i64, scratch_operands = 0 : i64, tpu.core_type = #tpu.core_type<tc>} {
    %c0 = arith.constant 0 : index
    %c0_0 = arith.constant 0 : index
    %0 = vector.load %arg0[%c0, %c0_0] : memref<64x96xf32, #tpu.memory_space<vmem>>, vector<64x96xf32>
    %c0_1 = arith.constant 0 : index
    %c0_2 = arith.constant 0 : index
    %1 = vector.load %arg1[%c0_1, %c0_2] : memref<96x128xf32, #tpu.memory_space<vmem>>, vector<96x128xf32>
    %cst = arith.constant dense<0.000000e+00> : vector<64x128xf32>
    %2 = tpu.matmul %0, %1, %cst {dimension_numbers = #tpu.dot_dimension_numbers<[1], [0], [0], [1], [0, 0, 1, 1], [], []>} : vector<64x96xf32>, vector<96x128xf32>, vector<64x128xf32> -> vector<64x128xf32>
    %3 = vector.extract_strided_slice %2 {offsets = [0, 0], sizes = [64, 32], strides = [1, 1]} : vector<64x128xf32> to vector<64x32xf32>
    %4 = vector.extract_strided_slice %2 {offsets = [0, 32], sizes = [64, 32], strides = [1, 1]} : vector<64x128xf32> to vector<64x32xf32>
    %5 = vector.extract_strided_slice %2 {offsets = [0, 64], sizes = [64, 32], strides = [1, 1]} : vector<64x128xf32> to vector<64x32xf32>
    %6 = vector.extract_strided_slice %2 {offsets = [0, 96], sizes = [64, 32], strides = [1, 1]} : vector<64x128xf32> to vector<64x32xf32>
    %c0_3 = arith.constant 0 : index
    %c0_4 = arith.constant 0 : index
    %c0_5 = arith.constant 0 : index
    %7 = vector.load %arg2[%c0_3, %c0_4, %c0_5] : memref<2x128x64xf32, #tpu.memory_space<vmem>>, vector<1x128x64xf32>
    %8 = vector.shape_cast %7 : vector<1x128x64xf32> to vector<128x64xf32>
    %c1 = arith.constant 1 : index
    %c0_6 = arith.constant 0 : index
    %c0_7 = arith.constant 0 : index
    %9 = vector.load %arg2[%c1, %c0_6, %c0_7] : memref<2x128x64xf32, #tpu.memory_space<vmem>>, vector<1x128x64xf32>
    %10 = vector.shape_cast %9 : vector<1x128x64xf32> to vector<128x64xf32>
    %11 = tpu.concatenate %3, %3 in 0 : vector<64x32xf32>, vector<64x32xf32> -> vector<128x32xf32>
    %12 = tpu.iota {dimensions = array<i32: 1>} : vector<1x32xi32>
    %cst_8 = arith.constant 0.000000e+00 : f32
    %13 = vector.broadcast %cst_8 : f32 to vector<128x32xf32>
    %c0_i32 = arith.constant 0 : i32
    %14 = vector.broadcast %c0_i32 : i32 to vector<1x32xi32>
    %15 = arith.cmpi sge, %12, %14 : vector<1x32xi32>
    %c8_i32 = arith.constant 8 : i32
    %16 = vector.broadcast %c8_i32 : i32 to vector<1x32xi32>
    %17 = arith.cmpi slt, %12, %16 : vector<1x32xi32>
    %18 = arith.andi %15, %17 : vector<1x32xi1>
    %19 = arith.extui %18 : vector<1x32xi1> to vector<1x32xi32>
    %20 = arith.sitofp %19 : vector<1x32xi32> to vector<1x32xf32>
    %21 = vector.broadcast %20 : vector<1x32xf32> to vector<128x32xf32>
    %22 = arith.mulf %11, %21 : vector<128x32xf32>
    "tpu.trace_start"() <{level = 10 : i32, message = "id,jd->ij"}> : () -> ()
    %cst_9 = arith.constant dense<0.000000e+00> : vector<128x64xf32>
    %23 = tpu.matmul %22, %4, %cst_9 {dimension_numbers = #tpu.dot_dimension_numbers<[1], [1], [0], [0], [0, 0, 1, 0], [], []>} : vector<128x32xf32>, vector<64x32xf32>, vector<128x64xf32> -> vector<128x64xf32>
    "tpu.trace_stop"() : () -> ()
    %24 = arith.mulf %23, %8 : vector<128x64xf32>
    %25 = arith.addf %24, %10 : vector<128x64xf32>
    %cst_10 = arith.constant dense<0xFF800000> : vector<128xf32>
    %26 = vector.multi_reduction <maximumf>, %25, %cst_10 [1] : vector<128x64xf32> to vector<128xf32>
    %27 = vector.shape_cast %26 : vector<128xf32> to vector<128x1xf32>
    %28 = vector.broadcast %27 : vector<128x1xf32> to vector<128x64xf32>
    %29 = arith.subf %25, %28 : vector<128x64xf32>
    %30 = math.exp %29 : vector<128x64xf32>
    %cst_11 = arith.constant dense<0.000000e+00> : vector<128xf32>
    %31 = vector.multi_reduction <add>, %30, %cst_11 [1] : vector<128x64xf32> to vector<128xf32>
    %32 = vector.shape_cast %31 : vector<128xf32> to vector<128x1xf32>
    %33 = tpu.reciprocal %32 {approx = true} : vector<128x1xf32> -> vector<128x1xf32>
    %34 = arith.mulf %32, %33 : vector<128x1xf32>
    %cst_12 = arith.constant 2.000000e+00 : f32
    %35 = vector.broadcast %cst_12 : f32 to vector<128x1xf32>
    %36 = arith.subf %35, %34 : vector<128x1xf32>
    %37 = arith.mulf %33, %36 : vector<128x1xf32>
    %38 = vector.broadcast %37 : vector<128x1xf32> to vector<128x64xf32>
    %39 = arith.mulf %30, %38 : vector<128x64xf32>
    %40 = vector.broadcast %20 : vector<1x32xf32> to vector<64x32xf32>
    %41 = arith.mulf %5, %40 : vector<64x32xf32>
    %cst_13 = arith.constant dense<0.000000e+00> : vector<128x32xf32>
    %42 = tpu.matmul %39, %41, %cst_13 {dimension_numbers = #tpu.dot_dimension_numbers<[1], [0], [0], [1], [0, 0, 1, 1], [], []>} : vector<128x64xf32>, vector<64x32xf32>, vector<128x32xf32> -> vector<128x32xf32>
    %43 = arith.addf %13, %42 : vector<128x32xf32>
    %c8_i32_14 = arith.constant 8 : i32
    %44 = vector.broadcast %c8_i32_14 : i32 to vector<1x32xi32>
    %45 = arith.cmpi sge, %12, %44 : vector<1x32xi32>
    %c16_i32 = arith.constant 16 : i32
    %46 = vector.broadcast %c16_i32 : i32 to vector<1x32xi32>
    %47 = arith.cmpi slt, %12, %46 : vector<1x32xi32>
    %48 = arith.andi %45, %47 : vector<1x32xi1>
    %49 = arith.extui %48 : vector<1x32xi1> to vector<1x32xi32>
    %50 = arith.sitofp %49 : vector<1x32xi32> to vector<1x32xf32>
    %51 = vector.broadcast %50 : vector<1x32xf32> to vector<128x32xf32>
    %52 = arith.mulf %11, %51 : vector<128x32xf32>
    "tpu.trace_start"() <{level = 10 : i32, message = "id,jd->ij"}> : () -> ()
    %cst_15 = arith.constant dense<0.000000e+00> : vector<128x64xf32>
    %53 = tpu.matmul %52, %4, %cst_15 {dimension_numbers = #tpu.dot_dimension_numbers<[1], [1], [0], [0], [0, 0, 1, 0], [], []>} : vector<128x32xf32>, vector<64x32xf32>, vector<128x64xf32> -> vector<128x64xf32>
    "tpu.trace_stop"() : () -> ()
    %54 = arith.mulf %53, %8 : vector<128x64xf32>
    %55 = arith.addf %54, %10 : vector<128x64xf32>
    %cst_16 = arith.constant dense<0xFF800000> : vector<128xf32>
    %56 = vector.multi_reduction <maximumf>, %55, %cst_16 [1] : vector<128x64xf32> to vector<128xf32>
    %57 = vector.shape_cast %56 : vector<128xf32> to vector<128x1xf32>
    %58 = vector.broadcast %57 : vector<128x1xf32> to vector<128x64xf32>
    %59 = arith.subf %55, %58 : vector<128x64xf32>
    %60 = math.exp %59 : vector<128x64xf32>
    %cst_17 = arith.constant dense<0.000000e+00> : vector<128xf32>
    %61 = vector.multi_reduction <add>, %60, %cst_17 [1] : vector<128x64xf32> to vector<128xf32>
    %62 = vector.shape_cast %61 : vector<128xf32> to vector<128x1xf32>
    %63 = tpu.reciprocal %62 {approx = true} : vector<128x1xf32> -> vector<128x1xf32>
    %64 = arith.mulf %62, %63 : vector<128x1xf32>
    %cst_18 = arith.constant 2.000000e+00 : f32
    %65 = vector.broadcast %cst_18 : f32 to vector<128x1xf32>
    %66 = arith.subf %65, %64 : vector<128x1xf32>
    %67 = arith.mulf %63, %66 : vector<128x1xf32>
    %68 = vector.broadcast %67 : vector<128x1xf32> to vector<128x64xf32>
    %69 = arith.mulf %60, %68 : vector<128x64xf32>
    %70 = vector.broadcast %50 : vector<1x32xf32> to vector<64x32xf32>
    %71 = arith.mulf %5, %70 : vector<64x32xf32>
    %cst_19 = arith.constant dense<0.000000e+00> : vector<128x32xf32>
    %72 = tpu.matmul %69, %71, %cst_19 {dimension_numbers = #tpu.dot_dimension_numbers<[1], [0], [0], [1], [0, 0, 1, 1], [], []>} : vector<128x64xf32>, vector<64x32xf32>, vector<128x32xf32> -> vector<128x32xf32>
    %73 = arith.addf %43, %72 : vector<128x32xf32>
    %c16_i32_20 = arith.constant 16 : i32
    %74 = vector.broadcast %c16_i32_20 : i32 to vector<1x32xi32>
    %75 = arith.cmpi sge, %12, %74 : vector<1x32xi32>
    %c24_i32 = arith.constant 24 : i32
    %76 = vector.broadcast %c24_i32 : i32 to vector<1x32xi32>
    %77 = arith.cmpi slt, %12, %76 : vector<1x32xi32>
    %78 = arith.andi %75, %77 : vector<1x32xi1>
    %79 = arith.extui %78 : vector<1x32xi1> to vector<1x32xi32>
    %80 = arith.sitofp %79 : vector<1x32xi32> to vector<1x32xf32>
    %81 = vector.broadcast %80 : vector<1x32xf32> to vector<128x32xf32>
    %82 = arith.mulf %11, %81 : vector<128x32xf32>
    "tpu.trace_start"() <{level = 10 : i32, message = "id,jd->ij"}> : () -> ()
    %cst_21 = arith.constant dense<0.000000e+00> : vector<128x64xf32>
    %83 = tpu.matmul %82, %4, %cst_21 {dimension_numbers = #tpu.dot_dimension_numbers<[1], [1], [0], [0], [0, 0, 1, 0], [], []>} : vector<128x32xf32>, vector<64x32xf32>, vector<128x64xf32> -> vector<128x64xf32>
    "tpu.trace_stop"() : () -> ()
    %84 = arith.mulf %83, %8 : vector<128x64xf32>
    %85 = arith.addf %84, %10 : vector<128x64xf32>
    %cst_22 = arith.constant dense<0xFF800000> : vector<128xf32>
    %86 = vector.multi_reduction <maximumf>, %85, %cst_22 [1] : vector<128x64xf32> to vector<128xf32>
    %87 = vector.shape_cast %86 : vector<128xf32> to vector<128x1xf32>
    %88 = vector.broadcast %87 : vector<128x1xf32> to vector<128x64xf32>
    %89 = arith.subf %85, %88 : vector<128x64xf32>
    %90 = math.exp %89 : vector<128x64xf32>
    %cst_23 = arith.constant dense<0.000000e+00> : vector<128xf32>
    %91 = vector.multi_reduction <add>, %90, %cst_23 [1] : vector<128x64xf32> to vector<128xf32>
    %92 = vector.shape_cast %91 : vector<128xf32> to vector<128x1xf32>
    %93 = tpu.reciprocal %92 {approx = true} : vector<128x1xf32> -> vector<128x1xf32>
    %94 = arith.mulf %92, %93 : vector<128x1xf32>
    %cst_24 = arith.constant 2.000000e+00 : f32
    %95 = vector.broadcast %cst_24 : f32 to vector<128x1xf32>
    %96 = arith.subf %95, %94 : vector<128x1xf32>
    %97 = arith.mulf %93, %96 : vector<128x1xf32>
    %98 = vector.broadcast %97 : vector<128x1xf32> to vector<128x64xf32>
    %99 = arith.mulf %90, %98 : vector<128x64xf32>
    %100 = vector.broadcast %80 : vector<1x32xf32> to vector<64x32xf32>
    %101 = arith.mulf %5, %100 : vector<64x32xf32>
    %cst_25 = arith.constant dense<0.000000e+00> : vector<128x32xf32>
    %102 = tpu.matmul %99, %101, %cst_25 {dimension_numbers = #tpu.dot_dimension_numbers<[1], [0], [0], [1], [0, 0, 1, 1], [], []>} : vector<128x64xf32>, vector<64x32xf32>, vector<128x32xf32> -> vector<128x32xf32>
    %103 = arith.addf %73, %102 : vector<128x32xf32>
    %c24_i32_26 = arith.constant 24 : i32
    %104 = vector.broadcast %c24_i32_26 : i32 to vector<1x32xi32>
    %105 = arith.cmpi sge, %12, %104 : vector<1x32xi32>
    %c32_i32 = arith.constant 32 : i32
    %106 = vector.broadcast %c32_i32 : i32 to vector<1x32xi32>
    %107 = arith.cmpi slt, %12, %106 : vector<1x32xi32>
    %108 = arith.andi %105, %107 : vector<1x32xi1>
    %109 = arith.extui %108 : vector<1x32xi1> to vector<1x32xi32>
    %110 = arith.sitofp %109 : vector<1x32xi32> to vector<1x32xf32>
    %111 = vector.broadcast %110 : vector<1x32xf32> to vector<128x32xf32>
    %112 = arith.mulf %11, %111 : vector<128x32xf32>
    "tpu.trace_start"() <{level = 10 : i32, message = "id,jd->ij"}> : () -> ()
    %cst_27 = arith.constant dense<0.000000e+00> : vector<128x64xf32>
    %113 = tpu.matmul %112, %4, %cst_27 {dimension_numbers = #tpu.dot_dimension_numbers<[1], [1], [0], [0], [0, 0, 1, 0], [], []>} : vector<128x32xf32>, vector<64x32xf32>, vector<128x64xf32> -> vector<128x64xf32>
    "tpu.trace_stop"() : () -> ()
    %114 = arith.mulf %113, %8 : vector<128x64xf32>
    %115 = arith.addf %114, %10 : vector<128x64xf32>
    %cst_28 = arith.constant dense<0xFF800000> : vector<128xf32>
    %116 = vector.multi_reduction <maximumf>, %115, %cst_28 [1] : vector<128x64xf32> to vector<128xf32>
    %117 = vector.shape_cast %116 : vector<128xf32> to vector<128x1xf32>
    %118 = vector.broadcast %117 : vector<128x1xf32> to vector<128x64xf32>
    %119 = arith.subf %115, %118 : vector<128x64xf32>
    %120 = math.exp %119 : vector<128x64xf32>
    %cst_29 = arith.constant dense<0.000000e+00> : vector<128xf32>
    %121 = vector.multi_reduction <add>, %120, %cst_29 [1] : vector<128x64xf32> to vector<128xf32>
    %122 = vector.shape_cast %121 : vector<128xf32> to vector<128x1xf32>
    %123 = tpu.reciprocal %122 {approx = true} : vector<128x1xf32> -> vector<128x1xf32>
    %124 = arith.mulf %122, %123 : vector<128x1xf32>
    %cst_30 = arith.constant 2.000000e+00 : f32
    %125 = vector.broadcast %cst_30 : f32 to vector<128x1xf32>
    %126 = arith.subf %125, %124 : vector<128x1xf32>
    %127 = arith.mulf %123, %126 : vector<128x1xf32>
    %128 = vector.broadcast %127 : vector<128x1xf32> to vector<128x64xf32>
    %129 = arith.mulf %120, %128 : vector<128x64xf32>
    %130 = vector.broadcast %110 : vector<1x32xf32> to vector<64x32xf32>
    %131 = arith.mulf %5, %130 : vector<64x32xf32>
    %cst_31 = arith.constant dense<0.000000e+00> : vector<128x32xf32>
    %132 = tpu.matmul %129, %131, %cst_31 {dimension_numbers = #tpu.dot_dimension_numbers<[1], [0], [0], [1], [0, 0, 1, 1], [], []>} : vector<128x64xf32>, vector<64x32xf32>, vector<128x32xf32> -> vector<128x32xf32>
    %133 = arith.addf %103, %132 : vector<128x32xf32>
    %c0_32 = arith.constant 0 : index
    %c0_33 = arith.constant 0 : index
    %134 = vector.load %arg3[%c0_32, %c0_33] : memref<64x32xf32, #tpu.memory_space<vmem>>, vector<64x32xf32>
    %135 = vector.extract_strided_slice %133 {offsets = [0, 0], sizes = [64, 32], strides = [1, 1]} : vector<128x32xf32> to vector<64x32xf32>
    %136 = vector.extract_strided_slice %134 {offsets = [0, 0], sizes = [32, 32], strides = [1, 1]} : vector<64x32xf32> to vector<32x32xf32>
    %cst_34 = arith.constant dense<0.000000e+00> : vector<64x32xf32>
    %137 = tpu.matmul %135, %136, %cst_34 {dimension_numbers = #tpu.dot_dimension_numbers<[1], [0], [0], [1], [0, 0, 1, 1], [], []>} : vector<64x32xf32>, vector<32x32xf32>, vector<64x32xf32> -> vector<64x32xf32>
    %138 = vector.extract_strided_slice %133 {offsets = [64, 0], sizes = [64, 32], strides = [1, 1]} : vector<128x32xf32> to vector<64x32xf32>
    %139 = vector.extract_strided_slice %134 {offsets = [32, 0], sizes = [32, 32], strides = [1, 1]} : vector<64x32xf32> to vector<32x32xf32>
    %cst_35 = arith.constant dense<0.000000e+00> : vector<64x32xf32>
    %140 = tpu.matmul %138, %139, %cst_35 {dimension_numbers = #tpu.dot_dimension_numbers<[1], [0], [0], [1], [0, 0, 1, 1], [], []>} : vector<64x32xf32>, vector<32x32xf32>, vector<64x32xf32> -> vector<64x32xf32>
    %141 = arith.addf %137, %140 : vector<64x32xf32>
    %c0_36 = arith.constant 0 : index
    %c0_37 = arith.constant 0 : index
    %142 = vector.load %arg4[%c0_36, %c0_37] : memref<1x32xf32, #tpu.memory_space<vmem>>, vector<1x32xf32>
    %143 = vector.broadcast %142 : vector<1x32xf32> to vector<64x32xf32>
    %144 = arith.addf %141, %143 : vector<64x32xf32>
    %145 = arith.addf %144, %6 : vector<64x32xf32>
    %c0_38 = arith.constant 0 : index
    %c0_39 = arith.constant 0 : index
    %146 = vector.load %arg5[%c0_38, %c0_39] : memref<64x32xf32, #tpu.memory_space<vmem>>, vector<64x32xf32>
    tpu.vector_store %arg5[%c0_38, %c0_39], %145 {strides = array<i32>} : memref<64x32xf32, #tpu.memory_space<vmem>>, vector<64x32xf32>,
    return
  }
}

</mosaic_0001>

<bundles_post_ra>
// kernel: chgan_forward.1
= control target key start
LH: loop header
LB: loop body
LE: loop exit
PB: predicated region body
PF: predicated region fallthrough
CT: control target
= control target key end

     0   :  { %vm40_vm0 = vcmask 785408   ;;  %v203_v26 = vlaneseq  ;;  %v4767_v28 = vmov 0.0   ;;  %vm242_vm11 = vcmask 261120   ;;  %s4769_s7 = smov 64   ;;  %s6685_s1 = inlined_call_operand.vmem [shape: f32[96,128], index: 1, kind: input, shape index: {}]   ;;  %s6686_s0 = inlined_call_operand.vmem [shape: f32[64,96], index: 0, kind: input, shape index: {}]   ;;  %s6687_s2 = inlined_call_operand.vmem [shape: f32[2,128,64], index: 2, kind: input, shape index: {}]   ;;  %s6688_s3 = inlined_call_operand.vmem [shape: f32[64,32], index: 3, kind: input, shape index: {}]   ;;  %s6689_s4 = inlined_call_operand.vmem [shape: f32[1,32], index: 4, kind: input, shape index: {}]   ;;  %s6690_s5 = inlined_call_operand.vmem [shape: f32[64,32], index: 5, kind: output, shape index: {}]  }
   0x1   :  { %v28_v0 = vld [vmem:[%s6685_s1] sm:$0xff]  ;;  %v29_v1 = vld [vmem:[%s6685_s1 + $0x8] sm:$0xff]  ;;  %v30_v2 = vld [vmem:[%s6685_s1 + $0x10] sm:$0xff]  ;;  %vm460_vm13 = vcmask 523264  }
   0x2   :  { %v4141_v3 = vpack.c.bf16 %v29_v1, %v28_v0  ;;  %v31_v4 = vld [vmem:[%s6685_s1 + $0x18] sm:$0xff]  ;;  %v32_v6 = vld [vmem:[%s6685_s1 + $0x20] sm:$0xff]  ;;  %v33_v7 = vld [vmem:[%s6685_s1 + $0x28] sm:$0xff]  ;;  %v204_v27 = vand.u32 127, %v203_v26 }
   0x3   :  { %v4145_v5 = vpack.c.bf16 %v31_v4, %v30_v2  ;;  %v20_v8 = vld [vmem:[%s6686_s0] sm:$0xff]  ;;  %v4149_v9 = vpack.c.bf16 %v33_v7, %v32_v6  ;;  %v34_v10 = vld [vmem:[%s6685_s1 + $0x30] sm:$0xff]  ;;  %v35_v11 = vld [vmem:[%s6685_s1 + $0x38] sm:$0xff] }
   0x4   :  { %4142 = vmatprep.subr.bf16.mxu0 %v4141_v3  ;;  %3769 = vmatprep.mubr.msk.f32.mxu0 %vm40_vm0, %v20_v8  ;;  %v4153_v12 = vpack.c.bf16 %v35_v11, %v34_v10  ;;  %v36_v13 = vld [vmem:[%s6685_s1 + $0x40] sm:$0xff]  ;;  %v37_v14 = vld [vmem:[%s6685_s1 + $0x48] sm:$0xff]  ;;  %v38_v16 = vld [vmem:[%s6685_s1 + $0x50] sm:$0xff]  ;;  %vm1597_vm1 = vcmp.ge.s32.totalorder %v204_v27, 16  ;;  %vm1598_vm2 = vcmp.lt.s32.totalorder %v204_v27, 24  ;;  %vm2288_vm4 = vcmp.ge.s32.totalorder %v204_v27, 24 }
   0x5   :  { %4144 = vmatpush3.bf16.msra.mxu0 %v4141_v3  ;;  %v4157_v15 = vpack.c.bf16 %v37_v14, %v36_v13  ;;  %v39_v17 = vld [vmem:[%s6685_s1 + $0x58] sm:$0xff]  ;;  %v21_v19 = vld [vmem:[%s6686_s0 + $0x8] sm:$0xff]  ;;  %v22_v20 = vld [vmem:[%s6686_s0 + $0x10] sm:$0xff]  ;;  %vm2289_vm5 = vcmp.lt.s32.totalorder %v204_v27, 32  ;;  %vm697_vm7 = vcmp.ge.s32.totalorder %v204_v27, 8  ;;  %vm698_vm8 = vcmp.lt.s32.totalorder %v204_v27, 16 }
   0x6   :  { %4146 = vmatprep.subr.bf16.mxu0 %v4145_v5  ;;  %v4161_v18 = vpack.c.bf16 %v39_v17, %v38_v16  ;;  %v23_v21 = vld [vmem:[%s6686_s0 + $0x18] sm:$0xff]  ;;  %v24_v22 = vld [vmem:[%s6686_s0 + $0x20] sm:$0xff]  ;;  %v25_v23 = vld [vmem:[%s6686_s0 + $0x28] sm:$0xff]  ;;  %vm206_vm9 = vcmp.lt.s32.totalorder %v204_v27, 8 }
   0x7   :  { %v26_v24 = vld [vmem:[%s6686_s0 + $0x30] sm:$0xff]  ;;  %v27_v25 = vld [vmem:[%s6686_s0 + $0x38] sm:$0xff]  ;;  %vm1599_vm3 = vmand %vm1597_vm1, %vm1598_vm2  ;;  %v4873_v31 = vsel %vm206_vm9, 1.0, %v4767_v28  ;;  %s4768_s0 = smov 96  }
   0x8   :  { %v4869_v29 = vsel %vm1599_vm3, 1.0, %v4767_v28  ;;  %vm2290_vm6 = vmand %vm2288_vm4, %vm2289_vm5 }
   0x9   :  { %4148 = vmatpush3.bf16.msra.mxu0 %v4145_v5  ;;  %v4871_v30 = vsel %vm2290_vm6, 1.0, %v4767_v28  ;;  %vm699_vm10 = vmand %vm697_vm7, %vm698_vm8 }
   0xa   :  { %4150 = vmatprep.subr.bf16.mxu0 %v4149_v9  ;;  %v4875_v32 = vsel %vm699_vm10, 1.0, %v4767_v28  ;;  %vm4950_vm12 = vmpackc.low %vm242_vm11, %vm242_vm11 }
   0xb   :  { %v4421_v45 = vpack.i.bf16 %v4873_v31, %v4875_v32 }
   0xd   :  { %4152 = vmatpush3.bf16.msra.mxu0 %v4149_v9 }
   0xe   :  { %4154 = vmatprep.subr.bf16.mxu0 %v4153_v12 }
  0x11   :  { %4156 = vmatpush3.bf16.msra.mxu0 %v4153_v12 }
  0x12   :  { %4158 = vmatprep.subr.bf16.mxu0 %v4157_v15 }
  0x15   :  { %4160 = vmatpush3.bf16.msra.mxu0 %v4157_v15 }
  0x16   :  { %4162 = vmatprep.subr.bf16.mxu0 %v4161_v18 }
  0x19   :  { %4164 = vmatpush3.bf16.msra.mxu0 %v4161_v18 }
  0x1c   :  { %3770 = vmatmul.mubr.msk.f32.vlgmr.msra.gmra.mrb[0].mxu0 %vm40_vm0, %v21_v19 }
  0x1d   :  { %3772 = vmatprep.mubr.msk.f32.mxu0 %vm40_vm0, %v22_v20 }
  0x20   :  { %3773 = vmatmul.mubr.msk.f32.gmra.mrb[2].mxu0 %vm40_vm0, %v23_v21 }
  0x21   :  { %3775 = vmatprep.mubr.msk.f32.mxu0 %vm40_vm0, %v24_v22 }
  0x24   :  { %3776 = vmatmul.mubr.msk.f32.gmra.mrb[4].mxu0 %vm40_vm0, %v25_v23 }
  0x25   :  { %3778 = vmatprep.mubr.msk.f32.mxu0 %vm40_vm0, %v26_v24 }
  0x28   :  { %3779 = vmatmul.mubr.msk.f32.gmra.mrb[6].mxu0 %vm40_vm0, %v27_v25 }
  0xef   :  { %v4877_v33 = vpop.f32.mrb[0].mxu0 }
  0xf0   :  { %6771 = vst [vmem:[#allocation2_spill] sm:$0xff] %v4877_v33  ;;  %v4879_v34 = vpop.f32.mrb[1].mxu0  ;;  %v4883_v35 = vmul.f32 %v4877_v33, %v4869_v29 }
  0xf1   :  { %6772 = vst [vmem:[#allocation3_spill] sm:$0xff] %v4879_v34  ;;  %v4401_v36 = vpack.i.bf16 %v4877_v33, %v4879_v34  ;;  %v4889_v37 = vmul.f32 %v4873_v31, %v4879_v34  ;;  %v4893_v38 = vmul.f32 %v4875_v32, %v4879_v34  ;;  %v4897_v39 = vmul.f32 %v4869_v29, %v4879_v34 }
  0xf3   :  { %4402 = vrot.lane.b32.xlu0 %v4401_v36, %s4768_s0  ;;  %v4899_v40 = vpop.f32.mrb[2].mxu0  ;;  %3797 = vmatprep.mubr.msk.f32.mxu1 %vm242_vm11, %v4889_v37 }
  0xf4   :  { %6773 = vst [vmem:[#allocation4_spill] sm:$0xff] %v4899_v40  ;;  %3837 = vmatprep.mubr.msk.f32.mxu0 %vm242_vm11, %v4893_v38  ;;  %v4905_v41 = vpop.f32.mrb[3].mxu0  ;;  %v4909_v42 = vmul.f32 %v4899_v40, %v4869_v29 }
  0xf5   :  { %6774 = vst [vmem:[#allocation5_spill] sm:$0xff] %v4905_v41  ;;  %v4406_v43 = vpack.i.bf16 %v4899_v40, %v4905_v41  ;;  %v4915_v44 = vmul.f32 %v4869_v29, %v4905_v41 }
  0xf7   :  { %4407 = vrot.lane.b32.xlu0 %v4406_v43, %s4768_s0  ;;  %v4919_v46 = vpop.f32.mrb[4].mxu0 }
  0xf8   :  { %6775 = vst [vmem:[#allocation6_spill] sm:$0xff] %v4919_v46  ;;  %v4921_v47 = vpop.f32.mrb[5].mxu0  ;;  %v4925_v48 = vmul.f32 %v4919_v46, %v4869_v29 }
  0xf9   :  { %6776 = vst [vmem:[#allocation7_spill] sm:$0xff] %v4921_v47  ;;  %v4411_v49 = vpack.i.bf16 %v4919_v46, %v4921_v47  ;;  %v4931_v50 = vmul.f32 %v4869_v29, %v4921_v47 }
  0xfb   :  { %4422 = vrot.lane.b32.xlu0 %v4421_v45, %s4769_s7  ;;  %4412 = vrot.lane.b32.xlu1 %v4411_v49, %s4768_s0  ;;  %v4934_v51 = vpop.f32.mrb[6].mxu0 }
  0xfc   :  { %6777 = vst [vmem:[#allocation8_spill] sm:$0xff] %v4934_v51  ;;  %v4936_v52 = vpop.f32.mrb[7].mxu0  ;;  %v4940_v53 = vmul.f32 %v4934_v51, %v4869_v29 }
  0xfd   :  { %6778 = vst [vmem:[#allocation9_spill] sm:$0xff] %v4936_v52  ;;  %v4416_v54 = vpack.i.bf16 %v4934_v51, %v4936_v52  ;;  %v4946_v55 = vmul.f32 %v4869_v29, %v4936_v52 }
  0xff   :  { %4417 = vrot.lane.b32.xlu1 %v4416_v54, %s4768_s0 }
 0x165   :  { %v4403_v56 = vpop.permute.xlu0 %4402 }
 0x166   :  { %v4405_v57 = vunpack.i.h.bf16 %v4403_v56  ;;  %v4404_v58 = vunpack.i.l.bf16 %v4403_v56 }
 0x168   :  { %v4954_v60 = vpack.c.bf16 %v4405_v57, %v4404_v58  ;;  %v211_v58 = vmul.f32 %v4877_v33, %v4873_v31 }
 0x169   :  { %v4408_v61 = vpop.permute.xlu0 %4407 }
 0x16a   :  { %v4410_v62 = vunpack.i.h.bf16 %v4408_v61  ;;  %v4409_v63 = vunpack.i.l.bf16 %v4408_v61  ;;  %4167 = vmatprep.subr.msk.bf16.mxu1 %vm4950_vm12, %v4954_v60  ;;  %4191 = vmatprep.subr.msk.bf16.mxu0 %vm4950_vm12, %v4954_v60  ;;  %v703_v61 = vmul.f32 %v4877_v33, %v4875_v32 }
 0x16b   :  { %4170 = vmatpush3.bf16.xpose.msk.msra.mxu1 %vm4950_vm12, %v4954_v60  ;;  %4194 = vmatpush3.bf16.xpose.msk.msra.mxu0 %vm4950_vm12, %v4954_v60 }
 0x16c   :  { %v4968_v0 = vpack.c.bf16 %v4410_v62, %v4409_v63  ;;  %v212_v62 = vmul.f32 %v4873_v31, %v4905_v41  ;;  %v704_v63 = vmul.f32 %v4875_v32, %v4905_v41 }
 0x16d   :  { %v4423_v1 = vpop.permute.xlu0 %4422  ;;  %v4413_v2 = vpop.permute.xlu1 %4412 }
 0x16e   :  { %v4425_v3 = vunpack.i.h.bf16 %v4423_v1  ;;  %v4424_v4 = vunpack.i.l.bf16 %v4423_v1  ;;  %4173 = vmatprep.subr.msk.bf16.mxu1 %vm4950_vm12, %v4968_v0  ;;  %4197 = vmatprep.subr.msk.bf16.mxu0 %vm4950_vm12, %v4968_v0  ;;  %v4415_v5 = vunpack.i.h.bf16 %v4413_v2  ;;  %v4414_v6 = vunpack.i.l.bf16 %v4413_v2 }
 0x16f   :  { %v213_v1 = vmul.f32 %v4899_v40, %v4873_v31  ;;  %v705_v2 = vmul.f32 %v4899_v40, %v4875_v32 }
 0x170   :  { %v1139_v7 = vmul.f32 %v4424_v4, %v4879_v34  ;;  %v1140_v8 = vmul.f32 %v4424_v4, %v4877_v33  ;;  %v4978_v9 = vpack.c.bf16 %v4415_v5, %v4414_v6  ;;  %v1141_v10 = vmul.f32 %v4424_v4, %v4905_v41 }
 0x171   :  { %v1142_v11 = vmul.f32 %v4424_v4, %v4899_v40  ;;  %v1143_v12 = vmul.f32 %v4424_v4, %v4921_v47  ;;  %v690_v13 = vmul.f32 %v4425_v3, %v4877_v33  ;;  %v691_v14 = vmul.f32 %v4425_v3, %v4905_v41  ;;  %v4418_v15 = vpop.permute.xlu1 %4417 }
 0x172   :  { %v4426_v16 = vpack.i.bf16 %v1140_v8, %v1139_v7  ;;  %v693_v17 = vmul.f32 %v4425_v3, %v4921_v47  ;;  %v694_v18 = vmul.f32 %v4425_v3, %v4919_v46  ;;  %v4420_v23 = vunpack.i.h.bf16 %v4418_v15 }
 0x173   :  { %4176 = vmatpush3.bf16.xpose.msk.msra.mxu1 %vm4950_vm12, %v4968_v0  ;;  %4200 = vmatpush3.bf16.xpose.msk.msra.mxu0 %vm4950_vm12, %v4968_v0  ;;  %v4431_v19 = vpack.i.bf16 %v1142_v11, %v1141_v10  ;;  %v4436_v20 = vpack.i.bf16 %v1143_v12, %v4869_v29  ;;  %v4441_v21 = vpack.i.bf16 %v691_v14, %v690_v13  ;;  %v4419_v24 = vunpack.i.l.bf16 %v4418_v15 }
 0x174   :  { %4427 = vrot.lane.b32.xlu0 %v4426_v16, %s4769_s7  ;;  %4179 = vmatprep.subr.msk.bf16.mxu1 %vm4950_vm12, %v4978_v9  ;;  %v4451_v22 = vpack.i.bf16 %v694_v18, %v693_v17  ;;  %v4999_v25 = vmul.f32 %v4425_v3, %v4879_v34  ;;  %v5006_v26 = vmul.f32 %v4424_v4, %v4934_v51 }
 0x175   :  { %4432 = vrot.lane.b32.xlu1 %v4431_v19, %s4769_s7  ;;  %4203 = vmatprep.subr.msk.bf16.mxu0 %vm4950_vm12, %v4978_v9  ;;  %v5009_v27 = vmul.f32 %v4425_v3, %v4936_v52  ;;  %v5012_v28 = vmul.f32 %v4425_v3, %v4934_v51  ;;  %v692_v29 = vmul.f32 %v4425_v3, %v4899_v40 }
 0x176   :  { %v5016_v36 = vmul.f32 %v4424_v4, %v4919_v46  ;;  %v5019_v43 = vmul.f32 %v4424_v4, %v4936_v52  ;;  %v4476_v45 = vpack.i.bf16 %v4999_v25, %v5006_v26  ;;  %v5026_v54 = vpack.c.bf16 %v4420_v23, %v4419_v24  ;;  %v5286_v25 = vld [vmem:[%s6687_s2 + $0x8] sm:$0xff]  ;;  %v5291_v26 = vld [vmem:[%s6687_s2] sm:$0xff] }
 0x177   :  { %v4486_v49 = vpack.i.bf16 %v5012_v28, %v5009_v27  ;;  %v4446_v57 = vpack.i.bf16 %v4871_v30, %v692_v29  ;;  %v214_v3 = vmul.f32 %v4873_v31, %v4921_v47  ;;  %v706_v4 = vmul.f32 %v4875_v32, %v4921_v47 }
 0x178   :  { %4437 = vrot.lane.b32.xlu0 %v4436_v20, %s4769_s7  ;;  %v4481_v56 = vpack.i.bf16 %v5019_v43, %v5016_v36  ;;  %v215_v5 = vmul.f32 %v4919_v46, %v4873_v31  ;;  %v707_v6 = vmul.f32 %v4919_v46, %v4875_v32  ;;  %v216_v7 = vmul.f32 %v4873_v31, %v4936_v52  ;;  %v5296_v36 = vld [vmem:[%s6687_s2 + $0x88] sm:$0xff] }
 0x179   :  { %4442 = vrot.lane.b32.xlu1 %v4441_v21, %s4769_s7  ;;  %v708_v8 = vmul.f32 %v4875_v32, %v4936_v52  ;;  %v217_v10 = vmul.f32 %v4934_v51, %v4873_v31  ;;  %v709_v11 = vmul.f32 %v4934_v51, %v4875_v32  ;;  %v2293_v31 = vmul.f32 %v4871_v30, %v4879_v34 }
 0x17a   :  { %v2294_v32 = vmul.f32 %v4877_v33, %v4871_v30 }
 0x17b   :  { %4182 = vmatpush3.bf16.xpose.msk.msra.mxu1 %vm4950_vm12, %v4978_v9  ;;  %4206 = vmatpush3.bf16.xpose.msk.msra.mxu0 %vm4950_vm12, %v4978_v9 }
 0x17c   :  { %4447 = vrot.lane.b32.xlu0 %v4446_v57, %s4769_s7  ;;  %4185 = vmatprep.subr.msk.bf16.mxu1 %vm4950_vm12, %v5026_v54 }
 0x17d   :  { %4452 = vrot.lane.b32.xlu1 %v4451_v22, %s4769_s7  ;;  %4209 = vmatprep.subr.msk.bf16.mxu0 %vm4950_vm12, %v5026_v54 }
 0x183   :  { %4188 = vmatpush3.bf16.xpose.msk.msra.mxu1 %vm4950_vm12, %v5026_v54  ;;  %4212 = vmatpush3.bf16.xpose.msk.msra.mxu0 %vm4950_vm12, %v5026_v54 }
 0x184   :  { %4247 = vmatprep.subr.msk.bf16.mxu0 %vm4950_vm12, %v4954_v60 }
 0x18a   :  { %3798 = vmatmul.mubr.msk.f32.vlgmr.msra.gmra.mrb[0].mxu1 %vm242_vm11, %v211_v58  ;;  %3838 = vmatmul.mubr.msk.f32.vlgmr.msra.gmra.mrb[8].mxu0 %vm242_vm11, %v703_v61 }
 0x18b   :  { %3800 = vmatprep.mubr.msk.f32.mxu1 %vm242_vm11, %v212_v62  ;;  %3840 = vmatprep.mubr.msk.f32.mxu0 %vm242_vm11, %v704_v63 }
 0x18c   :  { %4250 = vmatpush3.bf16.xpose.msk.msra.mxu0 %vm4950_vm12, %v4954_v60 }
 0x18d   :  { %4253 = vmatprep.subr.msk.bf16.mxu0 %vm4950_vm12, %v4968_v0 }
 0x18e   :  { %3801 = vmatmul.mubr.msk.f32.gmra.mrb[2].mxu1 %vm242_vm11, %v213_v1  ;;  %3841 = vmatmul.mubr.msk.f32.gmra.mrb[10].mxu0 %vm242_vm11, %v705_v2 }
 0x18f   :  { %3803 = vmatprep.mubr.msk.f32.mxu1 %vm242_vm11, %v214_v3  ;;  %3843 = vmatprep.mubr.msk.f32.mxu0 %vm242_vm11, %v706_v4 }
 0x192   :  { %3804 = vmatmul.mubr.msk.f32.gmra.mrb[4].mxu1 %vm242_vm11, %v215_v5  ;;  %3844 = vmatmul.mubr.msk.f32.gmra.mrb[12].mxu0 %vm242_vm11, %v707_v6 }
 0x193   :  { %3806 = vmatprep.mubr.msk.f32.mxu1 %vm242_vm11, %v216_v7  ;;  %3846 = vmatprep.mubr.msk.f32.mxu0 %vm242_vm11, %v708_v8 }
 0x194   :  { %4256 = vmatpush3.bf16.xpose.msk.msra.mxu0 %vm4950_vm12, %v4968_v0 }
 0x195   :  { %4259 = vmatprep.subr.msk.bf16.mxu0 %vm4950_vm12, %v4978_v9 }
 0x196   :  { %3807 = vmatmul.mubr.msk.f32.gmra.mrb[6].mxu1 %vm242_vm11, %v217_v10  ;;  %3847 = vmatmul.mubr.msk.f32.gmra.mrb[14].mxu0 %vm242_vm11, %v709_v11 }
 0x197   :  { %3809 = vmatprep.mubr.msk.f32.mxu1 %vm242_vm11, %v4889_v37  ;;  %3849 = vmatprep.mubr.msk.f32.mxu0 %vm242_vm11, %v4893_v38  ;;  %v2296_v37 = vmul.f32 %v4899_v40, %v4871_v30  ;;  %v2297_v38 = vmul.f32 %v4871_v30, %v4921_v47 }
 0x19a   :  { %3810 = vmatmul.mubr.msk.f32.gmra.mrb[8].mxu1 %vm242_vm11, %v211_v58  ;;  %3850 = vmatmul.mubr.msk.f32.gmra.mrb[16].mxu0 %vm242_vm11, %v703_v61 }
 0x19b   :  { %3812 = vmatprep.mubr.msk.f32.mxu1 %vm242_vm11, %v212_v62  ;;  %3852 = vmatprep.mubr.msk.f32.mxu0 %vm242_vm11, %v704_v63 }
 0x19c   :  { %4262 = vmatpush3.bf16.xpose.msk.msra.mxu0 %vm4950_vm12, %v4978_v9 }
 0x19d   :  { %4265 = vmatprep.subr.msk.bf16.mxu0 %vm4950_vm12, %v5026_v54 }
 0x19e   :  { %3813 = vmatmul.mubr.msk.f32.gmra.mrb[10].mxu1 %vm242_vm11, %v213_v1  ;;  %3853 = vmatmul.mubr.msk.f32.gmra.mrb[18].mxu0 %vm242_vm11, %v705_v2 }
 0x19f   :  { %3815 = vmatprep.mubr.msk.f32.mxu1 %vm242_vm11, %v214_v3  ;;  %3855 = vmatprep.mubr.msk.f32.mxu0 %vm242_vm11, %v706_v4 }
 0x1a2   :  { %3816 = vmatmul.mubr.msk.f32.gmra.mrb[12].mxu1 %vm242_vm11, %v215_v5  ;;  %3856 = vmatmul.mubr.msk.f32.gmra.mrb[20].mxu0 %vm242_vm11, %v707_v6 }
 0x1a3   :  { %3818 = vmatprep.mubr.msk.f32.mxu1 %vm242_vm11, %v216_v7  ;;  %3858 = vmatprep.mubr.msk.f32.mxu0 %vm242_vm11, %v708_v8  ;;  %v5428_v7 = vld [vmem:[%s6687_s2 + $0xb8] sm:$0xff] }
 0x1a4   :  { %4268 = vmatpush3.bf16.xpose.msk.msra.mxu0 %vm4950_vm12, %v5026_v54 }
 0x1a5   :  { %4287 = vmatprep.subr.msk.bf16.mxu0 %vm4950_vm12, %v4954_v60 }
 0x1a6   :  { %3819 = vmatmul.mubr.msk.f32.gmra.mrb[14].mxu1 %vm242_vm11, %v217_v10  ;;  %3859 = vmatmul.mubr.msk.f32.gmra.mrb[22].mxu0 %vm242_vm11, %v709_v11  ;;  %v5303_v10 = vld [vmem:[%s6687_s2 + $0x80] sm:$0xff] }
 0x1a7   :  { %3957 = vmatprep.mubr.msk.f32.mxu0 %vm242_vm11, %v4897_v39 }
 0x1ab   :  { %3958 = vmatmul.mubr.msk.f32.vlgmr.msra.gmra.mrb[24].mxu0 %vm242_vm11, %v4883_v35 }
 0x1ac   :  { %3960 = vmatprep.mubr.msk.f32.mxu0 %vm242_vm11, %v4915_v44  ;;  %4290 = vmatpush3.bf16.xpose.msk.msra.mxu0 %vm4950_vm12, %v4954_v60 }
 0x1ad   :  { %4293 = vmatprep.subr.msk.bf16.mxu0 %vm4950_vm12, %v4968_v0 }
 0x1af   :  { %3961 = vmatmul.mubr.msk.f32.gmra.mrb[26].mxu0 %vm242_vm11, %v4909_v42 }
 0x1b0   :  { %3963 = vmatprep.mubr.msk.f32.mxu0 %vm242_vm11, %v4931_v50 }
 0x1b3   :  { %3964 = vmatmul.mubr.msk.f32.gmra.mrb[28].mxu0 %vm242_vm11, %v4925_v48 }
 0x1b4   :  { %3966 = vmatprep.mubr.msk.f32.mxu0 %vm242_vm11, %v4946_v55  ;;  %4296 = vmatpush3.bf16.xpose.msk.msra.mxu0 %vm4950_vm12, %v4968_v0 }
 0x1b5   :  { %4299 = vmatprep.subr.msk.bf16.mxu0 %vm4950_vm12, %v4978_v9 }
 0x1b7   :  { %3967 = vmatmul.mubr.msk.f32.gmra.mrb[30].mxu0 %vm242_vm11, %v4940_v53 }
 0x1b8   :  { %3969 = vmatprep.mubr.msk.f32.mxu0 %vm242_vm11, %v4897_v39  ;;  %v2298_v39 = vmul.f32 %v4919_v46, %v4871_v30 }
 0x1bb   :  { %3970 = vmatmul.mubr.msk.f32.gmra.mrb[32].mxu0 %vm242_vm11, %v4883_v35  ;;  %v2295_v35 = vmul.f32 %v4871_v30, %v4905_v41 }
 0x1bc   :  { %3972 = vmatprep.mubr.msk.f32.mxu0 %vm242_vm11, %v4915_v44  ;;  %4302 = vmatpush3.bf16.xpose.msk.msra.mxu0 %vm4950_vm12, %v4978_v9  ;;  %v2300_v44 = vmul.f32 %v4934_v51, %v4871_v30 }
 0x1bd   :  { %4305 = vmatprep.subr.msk.bf16.mxu0 %vm4950_vm12, %v5026_v54 }
 0x1bf   :  { %3973 = vmatmul.mubr.msk.f32.gmra.mrb[34].mxu0 %vm242_vm11, %v4909_v42  ;;  %v2299_v42 = vmul.f32 %v4871_v30, %v4936_v52 }
 0x1c0   :  { %3975 = vmatprep.mubr.msk.f32.mxu0 %vm242_vm11, %v4931_v50 }
 0x1c3   :  { %3976 = vmatmul.mubr.msk.f32.gmra.mrb[36].mxu0 %vm242_vm11, %v4925_v48 }
 0x1c4   :  { %3978 = vmatprep.mubr.msk.f32.mxu0 %vm242_vm11, %v4946_v55  ;;  %4308 = vmatpush3.bf16.xpose.msk.msra.mxu0 %vm4950_vm12, %v5026_v54 }
 0x1c7   :  { %3979 = vmatmul.mubr.msk.f32.gmra.mrb[38].mxu0 %vm242_vm11, %v4940_v53 }
 0x1c8   :  { %4037 = vmatprep.mubr.msk.f32.mxu0 %vm242_vm11, %v2293_v31 }
 0x1cb   :  { %4038 = vmatmul.mubr.msk.f32.vlgmr.msra.gmra.mrb[40].mxu0 %vm242_vm11, %v2294_v32 }
 0x1cc   :  { %4040 = vmatprep.mubr.msk.f32.mxu0 %vm242_vm11, %v2295_v35 }
 0x1cf   :  { %4041 = vmatmul.mubr.msk.f32.gmra.mrb[42].mxu0 %vm242_vm11, %v2296_v37 }
 0x1d0   :  { %4043 = vmatprep.mubr.msk.f32.mxu0 %vm242_vm11, %v2297_v38 }
 0x1d3   :  { %4044 = vmatmul.mubr.msk.f32.gmra.mrb[44].mxu0 %vm242_vm11, %v2298_v39 }
 0x1d4   :  { %4046 = vmatprep.mubr.msk.f32.mxu0 %vm242_vm11, %v2299_v42 }
 0x1d7   :  { %4047 = vmatmul.mubr.msk.f32.gmra.mrb[46].mxu0 %vm242_vm11, %v2300_v44 }
 0x1d8   :  { %4049 = vmatprep.mubr.msk.f32.mxu0 %vm242_vm11, %v2293_v31 }
 0x1db   :  { %4050 = vmatmul.mubr.msk.f32.gmra.mrb[48].mxu0 %vm242_vm11, %v2294_v32  ;;  %v5310_v32 = vld [vmem:[%s6687_s2 + $0x18] sm:$0xff] }
 0x1dc   :  { %4052 = vmatprep.mubr.msk.f32.mxu0 %vm242_vm11, %v2295_v35 }
 0x1df   :  { %4053 = vmatmul.mubr.msk.f32.gmra.mrb[50].mxu0 %vm242_vm11, %v2296_v37  ;;  %v5317_v37 = vld [vmem:[%s6687_s2 + $0x10] sm:$0xff] }
 0x1e0   :  { %4055 = vmatprep.mubr.msk.f32.mxu0 %vm242_vm11, %v2297_v38 }
 0x1e3   :  { %4056 = vmatmul.mubr.msk.f32.gmra.mrb[52].mxu0 %vm242_vm11, %v2298_v39 }
 0x1e4   :  { %4058 = vmatprep.mubr.msk.f32.mxu0 %vm242_vm11, %v2299_v42 }
 0x1e6   :  { %v4428_v48 = vpop.permute.xlu0 %4427 }
 0x1e7   :  { %v4430_v50 = vunpack.i.h.bf16 %v4428_v48  ;;  %v4429_v53 = vunpack.i.l.bf16 %v4428_v48  ;;  %v4433_v30 = vpop.permute.xlu1 %4432  ;;  %4059 = vmatmul.mubr.msk.f32.gmra.mrb[54].mxu0 %vm242_vm11, %v2300_v44 }
 0x1e8   :  { %v4435_v55 = vunpack.i.h.bf16 %v4433_v30  ;;  %v4434_v59 = vunpack.i.l.bf16 %v4433_v30 }
 0x1e9   :  { %v4213_v60 = vpack.c.bf16 %v4430_v50, %v4429_v53 }
 0x1ea   :  { %v5224_v0 = vpop.permute.xlu0 %4437  ;;  %v4217_v12 = vpack.c.bf16 %v4435_v55, %v4434_v59 }
 0x1eb   :  { %v4439_v9 = vunpack.i.l.bf16 %v5224_v0  ;;  %4214 = vmatprep.subr.bf16.mxu1 %v4213_v60  ;;  %v5281_v8 = vpop.permute.xlu1 %4442 }
 0x1ec   :  { %4216 = vmatpush3.bf16.msra.mxu1 %v4213_v60  ;;  %6788 = vst [vmem:[#allocation17_spill] sm:$0xff] %v5281_v8 }
 0x1ed   :  { %4218 = vmatprep.subr.bf16.mxu1 %v4217_v12  ;;  %v2039_v13 = vmul.f32 %v4439_v9, %v4879_v34  ;;  %v2040_v14 = vmul.f32 %v4439_v9, %v4877_v33  ;;  %v2041_v15 = vmul.f32 %v4439_v9, %v4905_v41  ;;  %v2042_v16 = vmul.f32 %v4439_v9, %v4899_v40 }
 0x1ee   :  { %v5231_v17 = vpop.permute.xlu0 %4447  ;;  %v2043_v18 = vmul.f32 %v4439_v9, %v4921_v47  ;;  %v2044_v19 = vmul.f32 %v4439_v9, %v4919_v46  ;;  %v2045_v20 = vmul.f32 %v4439_v9, %v4936_v52  ;;  %v2046_v21 = vmul.f32 %v4439_v9, %v4934_v51 }
 0x1ef   :  { %6781 = vst [vmem:[#allocation10_spill] sm:$0xff] %v5231_v17  ;;  %v4450_v22 = vunpack.i.h.bf16 %v5231_v17  ;;  %v4456_v23 = vpack.i.bf16 %v2040_v14, %v2039_v13  ;;  %v4461_v24 = vpack.i.bf16 %v2042_v16, %v2041_v15  ;;  %v5312_v35 = vpop.permute.xlu1 %4452  ;;  %v5342_v13 = vld [vmem:[%s6687_s2 + $0x98] sm:$0xff]  ;;  %v5347_v14 = vld [vmem:[%s6687_s2 + $0x90] sm:$0xff]  ;;  %v5354_v16 = vld [vmem:[%s6687_s2 + $0x20] sm:$0xff] }
 0x1f0   :  { %4220 = vmatpush3.bf16.msra.mxu1 %v4217_v12  ;;  %v4466_v29 = vpack.i.bf16 %v2044_v19, %v2043_v18  ;;  %v4491_v54 = vpack.i.bf16 %v2046_v21, %v2045_v20  ;;  %6789 = vst [vmem:[#allocation18_spill] sm:$0xff] %v5312_v35 }
 0x1f1   :  { %4457 = vrot.lane.b32.xlu0 %v4456_v23, %s4769_s7  ;;  %4462 = vrot.lane.b32.xlu1 %v4461_v24, %s4769_s7  ;;  %v2730_v57 = vmul.f32 %v4450_v22, %v4879_v34  ;;  %v2731_v58 = vmul.f32 %v4450_v22, %v4877_v33  ;;  %v5243_v61 = vmul.f32 %v4450_v22, %v4905_v41  ;;  %v4444_v41 = vunpack.i.l.bf16 %v5281_v8 }
 0x1f2   :  { %v5246_v62 = vmul.f32 %v4450_v22, %v4899_v40  ;;  %v5249_v63 = vmul.f32 %v4450_v22, %v4921_v47  ;;  %v5252_v1 = vmul.f32 %v4450_v22, %v4919_v46  ;;  %v5255_v3 = vmul.f32 %v4450_v22, %v4936_v52 }
 0x1f3   :  { %6782 = vst [vmem:[#allocation11_spill] sm:$0xff] %v5243_v61  ;;  %v4471_v2 = vpack.i.bf16 %v2731_v58, %v2730_v57  ;;  %v5258_v4 = vmul.f32 %v4450_v22, %v4934_v51 }
 0x1f4   :  { %6783 = vst [vmem:[#allocation12_spill] sm:$0xff] %v5246_v62  ;;  %6784 = vst [vmem:[#allocation13_spill] sm:$0xff] %v5249_v63 }
 0x1f5   :  { %6785 = vst [vmem:[#allocation14_spill] sm:$0xff] %v5252_v1  ;;  %6786 = vst [vmem:[#allocation15_spill] sm:$0xff] %v5255_v3  ;;  %4467 = vrot.lane.b32.xlu0 %v4466_v29, %s4769_s7  ;;  %4477 = vrot.lane.b32.xlu1 %v4476_v45, %s4769_s7 }
 0x1f6   :  { %6787 = vst [vmem:[#allocation16_spill] sm:$0xff] %v5258_v4 }
 0x1f9   :  { %4472 = vrot.lane.b32.xlu0 %v4471_v2, %s4769_s7  ;;  %4487 = vrot.lane.b32.xlu1 %v4486_v49, %s4769_s7  ;;  %v5373_v2 = vld [vmem:[%s6687_s2 + $0xa0] sm:$0xff] }
 0x1fd   :  { %4482 = vrot.lane.b32.xlu0 %v4481_v56, %s4769_s7  ;;  %4492 = vrot.lane.b32.xlu1 %v4491_v54, %s4769_s7 }
 0x25d   :  { %v3799_v27 = vpop.f32.mrb[0].mxu1  ;;  %v3839_v28 = vpop.f32.mrb[8].mxu0 }
 0x25e   :  { %v429_v43 = vmul.f32 %v3799_v27, %v5286_v25  ;;  %v880_v45 = vmul.f32 %v3839_v28, %v5286_v25  ;;  %v349_v49 = vpop.f32.mrb[1].mxu1  ;;  %v800_v56 = vpop.f32.mrb[9].mxu0 }
 0x25f   :  { %v428_v11 = vmul.f32 %v349_v49, %v5291_v26  ;;  %v879_v31 = vmul.f32 %v800_v56, %v5291_v26  ;;  %v5382_v49 = vld [vmem:[%s6687_s2 + $0x28] sm:$0xff] }
 0x260   :  { %v5320_v38 = vadd.f32 %v5296_v36, %v429_v43  ;;  %v5323_v39 = vadd.f32 %v5296_v36, %v880_v45 }
 0x261   :  { %v3802_v42 = vpop.f32.mrb[2].mxu1  ;;  %v3842_v44 = vpop.f32.mrb[10].mxu0  ;;  %v5326_v48 = vadd.f32 %v5303_v10, %v879_v31  ;;  %v5334_v60 = vadd.f32 %v5303_v10, %v428_v11 }
 0x262   :  { %v882_v50 = vmul.f32 %v3842_v44, %v5310_v32  ;;  %v359_v53 = vpop.f32.mrb[3].mxu1  ;;  %v810_v30 = vpop.f32.mrb[11].mxu0  ;;  %v464_v55 = vsel %vm460_vm13, %v5320_v38, -inf  ;;  %v914_v59 = vsel %vm460_vm13, %v5323_v39, -inf  ;;  %v431_v18 = vmul.f32 %v3802_v42, %v5310_v32 }
 0x263   :  { %v430_v9 = vmul.f32 %v359_v53, %v5317_v37  ;;  %v5337_v12 = vpop.permute.xlu0 %4457  ;;  %465 = vmax.xlane.f32.xlu0 %v464_v55  ;;  %915 = vmax.xlane.f32.xlu1 %v914_v59  ;;  %v5349_v15 = vpop.permute.xlu1 %4462  ;;  %v911_v23 = vsel %vm460_vm13, %v5326_v48, -inf  ;;  %v461_v24 = vsel %vm460_vm13, %v5334_v60, -inf  ;;  %v881_v27 = vmul.f32 %v810_v30, %v5317_v37  ;;  %v5395_v53 = vld [vmem:[%s6687_s2 + $0x38] sm:$0xff] }
 0x264   :  { %6790 = vst [vmem:[#allocation19_spill] sm:$0xff] %v5337_v12  ;;  %6791 = vst [vmem:[#allocation20_spill] sm:$0xff] %v5349_v15  ;;  %v5362_v29 = vadd.f32 %v5342_v13, %v882_v50  ;;  %v5377_v45 = vadd.f32 %v5342_v13, %v431_v18 }
 0x265   :  { %v3805_v19 = vpop.f32.mrb[4].mxu1  ;;  %v3845_v20 = vpop.f32.mrb[12].mxu0  ;;  %v5365_v54 = vadd.f32 %v5347_v14, %v430_v9 }
 0x266   :  { %v369_v21 = vpop.f32.mrb[5].mxu1  ;;  %v820_v22 = vpop.f32.mrb[13].mxu0  ;;  %6794 = vst [vmem:[#allocation23_spill] sm:$0xff] %v5377_v45  ;;  %v920_v42 = vsel %vm460_vm13, %v5362_v29, -inf  ;;  %v884_v59 = vmul.f32 %v3845_v20, %v5382_v49  ;;  %v5418_v20 = vld [vmem:[%s6687_s2 + $0xa8] sm:$0xff] }
 0x267   :  { %6792 = vst [vmem:[#allocation21_spill] sm:$0xff] %v5365_v54  ;;  %v883_v57 = vmul.f32 %v820_v22, %v5354_v16  ;;  %v5368_v58 = vpop.permute.xlu0 %4467  ;;  %912 = vmax.xlane.f32.xlu0 %v911_v23  ;;  %462 = vmax.xlane.f32.xlu1 %v461_v24  ;;  %v432_v56 = vmul.f32 %v369_v21, %v5354_v16  ;;  %v467_v44 = vsel %vm460_vm13, %v5365_v54, -inf  ;;  %v4478_v55 = vpop.permute.xlu1 %4477 }
 0x268   :  { %6793 = vst [vmem:[#allocation22_spill] sm:$0xff] %v5368_v58  ;;  %v5401_v21 = vadd.f32 %v5347_v14, %v881_v27  ;;  %v5423_v27 = vld [vmem:[%s6687_s2 + $0x30] sm:$0xff]  ;;  %v4479_v58 = vunpack.i.l.bf16 %v4478_v55  ;;  %v4480_v40 = vunpack.i.h.bf16 %v4478_v55 }
 0x269   :  { %v3808_v28 = vpop.f32.mrb[6].mxu1  ;;  %v3848_v43 = vpop.f32.mrb[14].mxu0  ;;  %v5390_v50 = vadd.f32 %v5373_v2, %v883_v57  ;;  %v470_v57 = vsel %vm460_vm13, %v5377_v45, -inf }
 0x26a   :  { %v379_v11 = vpop.f32.mrb[7].mxu1  ;;  %v830_v31 = vpop.f32.mrb[15].mxu0  ;;  %6797 = vst [vmem:[#allocation26_spill] sm:$0xff] %v5401_v21  ;;  %v435_v22 = vmul.f32 %v3808_v28, %v5395_v53  ;;  %v886_v33 = vmul.f32 %v3848_v43, %v5395_v53  ;;  %v5476_v55 = vpack.c.bf16 %v4444_v41, %v4480_v40 }
 0x26b   :  { %6795 = vst [vmem:[#allocation24_spill] sm:$0xff] %v5390_v50  ;;  %v5397_v30 = vpop.permute.xlu0 %4472  ;;  %921 = vmax.xlane.f32.xlu0 %v920_v42  ;;  %468 = vmax.xlane.f32.xlu1 %v467_v44  ;;  %v923_v42 = vsel %vm460_vm13, %v5390_v50, -inf  ;;  %v5413_v44 = vadd.f32 %v5373_v2, %v432_v56  ;;  %v4440_v56 = vunpack.i.h.bf16 %v5224_v0  ;;  %v885_v46 = vmul.f32 %v830_v31, %v5423_v27 }
 0x26c   :  { %6796 = vst [vmem:[#allocation25_spill] sm:$0xff] %v5397_v30  ;;  %v433_v30 = vmul.f32 %v3805_v19, %v5382_v49  ;;  %v434_v34 = vmul.f32 %v379_v11, %v5423_v27  ;;  %6803 = vst [vmem:[#allocation32_spill] sm:$0xff] %v5476_v55 }
 0x26d   :  { %v3811_v9 = vpop.f32.mrb[8].mxu1  ;;  %v3851_v18 = vpop.f32.mrb[16].mxu0  ;;  %6798 = vst [vmem:[#allocation27_spill] sm:$0xff] %v5413_v44  ;;  %v473_v0 = vsel %vm460_vm13, %v5413_v44, -inf }
 0x26e   :  { %v5404_v23 = vpop.f32.mrb[9].mxu1  ;;  %v5406_v24 = vpop.f32.mrb[17].mxu0  ;;  %v5471_v43 = vadd.f32 %v5418_v20, %v433_v30  ;;  %v5485_v30 = vld [vmem:[%s6687_s2 + $0x40] sm:$0xff] }
 0x26f   :  { %471 = vmax.xlane.f32.xlu0 %v470_v57  ;;  %v4483_v28 = vpop.permute.xlu0 %4482  ;;  %924 = vmax.xlane.f32.xlu1 %v923_v42  ;;  %v917_v57 = vsel %vm460_vm13, %v5401_v21, -inf  ;;  %v5437_v42 = vadd.f32 %v5418_v20, %v884_v59  ;;  %v5452_v59 = vld [vmem:[%s6687_s2 + $0xb0] sm:$0xff] }
 0x270   :  { %v4485_v6 = vunpack.i.h.bf16 %v4483_v28  ;;  %v4484_v5 = vunpack.i.l.bf16 %v4483_v28  ;;  %v5447_v28 = vadd.f32 %v5428_v7, %v435_v22  ;;  %v5460_v22 = vld [vmem:[%s6687_s2 + $0x48] sm:$0xff]  ;;  %6801 = vst [vmem:[#allocation30_spill] sm:$0xff] %v5471_v43  ;;  %v5474_v11 = vadd.f32 %v5452_v59, %v885_v46 }
 0x271   :  { %v5432_v15 = vpop.f32.mrb[10].mxu1  ;;  %v3854_v51 = vpop.f32.mrb[18].mxu0  ;;  %6799 = vst [vmem:[#allocation28_spill] sm:$0xff] %v5437_v42  ;;  %v888_v3 = vmul.f32 %v3851_v18, %v5460_v22  ;;  %v476_v40 = vsel %vm460_vm13, %v5471_v43, -inf  ;;  %v5500_v18 = vadd.f32 %v5452_v59, %v434_v34 }
 0x272   :  { %v5440_v52 = vpop.f32.mrb[11].mxu1  ;;  %v5442_v47 = vpop.f32.mrb[19].mxu0  ;;  %v4221_v19 = vpack.c.bf16 %v4484_v5, %v4440_v56  ;;  %6800 = vst [vmem:[#allocation29_spill] sm:$0xff] %v5447_v28  ;;  %v4225_v31 = vpack.c.bf16 %v4479_v58, %v4485_v6  ;;  %v926_v6 = vsel %vm460_vm13, %v5437_v42, -inf  ;;  %v482_v58 = vsel %vm460_vm13, %v5447_v28, -inf  ;;  %6802 = vst [vmem:[#allocation31_spill] sm:$0xff] %v5474_v11 }
 0x273   :  { %918 = vmax.xlane.f32.xlu0 %v917_v57  ;;  %474 = vmax.xlane.f32.xlu1 %v473_v0  ;;  %v929_v41 = vsel %vm460_vm13, %v5474_v11, -inf  ;;  %6805 = vst [vmem:[#allocation34_spill] sm:$0xff] %v5500_v18  ;;  %v479_v1 = vsel %vm460_vm13, %v5500_v18, -inf }
 0x274   :  { %4222 = vmatprep.subr.bf16.mxu1 %v4221_v19 }
 0x275   :  { %v3817_v5 = vpop.f32.mrb[12].mxu1  ;;  %v3857_v56 = vpop.f32.mrb[20].mxu0  ;;  %4224 = vmatpush3.bf16.msra.mxu1 %v4221_v19  ;;  %v437_v19 = vmul.f32 %v3811_v9, %v5460_v22  ;;  %v5497_v9 = vadd.f32 %v5428_v7, %v886_v33 }
 0x276   :  { %v5462_v57 = vpop.f32.mrb[13].mxu1  ;;  %v5464_v0 = vpop.f32.mrb[21].mxu0  ;;  %4226 = vmatprep.subr.bf16.mxu1 %v4225_v31 }
 0x277   :  { %927 = vmax.xlane.f32.xlu0 %v926_v6  ;;  %483 = vmax.xlane.f32.xlu1 %v482_v58  ;;  %6804 = vst [vmem:[#allocation33_spill] sm:$0xff] %v5497_v9  ;;  %v5510_v6 = vld [vmem:[%s6687_s2 + $0x58] sm:$0xff]  ;;  %v887_v58 = vmul.f32 %v5406_v24, %v5485_v30  ;;  %v932_v63 = vsel %vm460_vm13, %v5497_v9, -inf  ;;  %v5530_v24 = vld [vmem:[%s6687_s2 + $0x68] sm:$0xff] }
 0x278   :  { %v890_v34 = vmul.f32 %v3854_v51, %v5510_v6  ;;  %v5537_v51 = vld [vmem:[%s6687_s2 + $0xd8] sm:$0xff]  ;;  %v892_v17 = vmul.f32 %v3857_v56, %v5530_v24  ;;  %v439_v56 = vmul.f32 %v5432_v15, %v5510_v6 }
 0x279   :  { %v5480_v4 = vpop.f32.mrb[14].mxu1  ;;  %v3860_v12 = vpop.f32.mrb[22].mxu0  ;;  %4228 = vmatpush3.bf16.msra.mxu1 %v4225_v31  ;;  %v5505_v31 = vld [vmem:[%s6687_s2 + $0xc8] sm:$0xff] }
 0x27a   :  { %v5487_v35 = vpop.f32.mrb[15].mxu1  ;;  %v5489_v46 = vpop.f32.mrb[23].mxu0  ;;  %4230 = vmatprep.subr.bf16.mxu1 %v5476_v55  ;;  %v5515_v33 = vadd.f32 %v5505_v31, %v888_v3  ;;  %v5525_v8 = vadd.f32 %v5505_v31, %v437_v19  ;;  %v436_v19 = vmul.f32 %v5404_v23, %v5485_v30  ;;  %v5552_v61 = vadd.f32 %v5537_v51, %v890_v34  ;;  %v5563_v23 = vld [vmem:[%s6687_s2 + $0xe8] sm:$0xff] }
 0x27b   :  { %477 = vmax.xlane.f32.xlu0 %v476_v40  ;;  %930 = vmax.xlane.f32.xlu1 %v929_v41  ;;  %v5542_v40 = vld [vmem:[%s6687_s2 + $0xc0] sm:$0xff] }
 0x27c   :  { %6806 = vst [vmem:[#allocation35_spill] sm:$0xff] %v5515_v33  ;;  %6807 = vst [vmem:[#allocation36_spill] sm:$0xff] %v5525_v8  ;;  %v938_v41 = vsel %vm460_vm13, %v5515_v33, -inf  ;;  %v5555_v62 = vadd.f32 %v5542_v40, %v887_v58  ;;  %v5568_v34 = vadd.f32 %v5542_v40, %v436_v19  ;;  %v944_v33 = vsel %vm460_vm13, %v5552_v61, -inf }
 0x27d   :  { %6808 = vst [vmem:[#allocation37_spill] sm:$0xff] %v5552_v61  ;;  %v5584_v19 = vadd.f32 %v5563_v23, %v892_v17  ;;  %v5596_v61 = vadd.f32 %v5537_v51, %v439_v56 }
 0x27e   :  { %v5518_v55 = vpop.f32.mrb[24].mxu0  ;;  %6809 = vst [vmem:[#allocation38_spill] sm:$0xff] %v5555_v62  ;;  %6810 = vst [vmem:[#allocation39_spill] sm:$0xff] %v5568_v34  ;;  %v935_v15 = vsel %vm460_vm13, %v5555_v62, -inf  ;;  %v485_v9 = vsel %vm460_vm13, %v5568_v34, -inf }
 0x27f   :  { %v5532_v3 = vpop.f32.mrb[25].mxu0  ;;  %933 = vmax.xlane.f32.xlu0 %v932_v63  ;;  %480 = vmax.xlane.f32.xlu1 %v479_v1  ;;  %v488_v1 = vsel %vm460_vm13, %v5525_v8, -inf  ;;  %6811 = vst [vmem:[#allocation40_spill] sm:$0xff] %v5584_v19  ;;  %6812 = vst [vmem:[#allocation41_spill] sm:$0xff] %v5596_v61  ;;  %v950_v17 = vsel %vm460_vm13, %v5584_v19, -inf }
 0x282   :  { %v3962_v63 = vpop.f32.mrb[26].mxu0 }
 0x283   :  { %v1782_v11 = vmul.f32 %v3962_v63, %v5310_v32  ;;  %v5558_v28 = vpop.f32.mrb[27].mxu0  ;;  %939 = vmax.xlane.f32.xlu0 %v938_v41  ;;  %489 = vmax.xlane.f32.xlu1 %v488_v1  ;;  %v5576_v63 = vld [vmem:[%s6687_s2 + $0x50] sm:$0xff]  ;;  %v441_v41 = vmul.f32 %v3817_v5, %v5530_v24 }
 0x284   :  { %v889_v5 = vmul.f32 %v5442_v47, %v5576_v63  ;;  %v438_v56 = vmul.f32 %v5440_v52, %v5576_v63 }
 0x285   :  { %v5571_v58 = vadd.f32 %v5342_v13, %v1782_v11  ;;  %v5589_v11 = vld [vmem:[%s6687_s2 + $0x78] sm:$0xff]  ;;  %v5604_v43 = vadd.f32 %v5563_v23, %v441_v41 }
 0x286   :  { %v3965_v1 = vpop.f32.mrb[28].mxu0  ;;  %v894_v62 = vmul.f32 %v3860_v12, %v5589_v11  ;;  %v5616_v12 = vld [vmem:[%s6687_s2 + $0xf8] sm:$0xff] }
 0x287   :  { %v5591_v8 = vpop.f32.mrb[29].mxu0  ;;  %945 = vmax.xlane.f32.xlu0 %v944_v33  ;;  %936 = vmax.xlane.f32.xlu1 %v935_v15  ;;  %6813 = vst [vmem:[#allocation42_spill] sm:$0xff] %v5604_v43  ;;  %v5609_v33 = vld [vmem:[%s6687_s2 + $0xd0] sm:$0xff]  ;;  %v5626_v15 = vld [vmem:[%s6687_s2 + $0x60] sm:$0xff]  ;;  %v1784_v19 = vmul.f32 %v3965_v1, %v5382_v49  ;;  %v500_v34 = vsel %vm460_vm13, %v5604_v43, -inf }
 0x288   :  { %v5621_v41 = vadd.f32 %v5609_v33, %v889_v5  ;;  %v5634_v50 = vadd.f32 %v5616_v12, %v894_v62  ;;  %v891_v42 = vmul.f32 %v5464_v0, %v5626_v15  ;;  %v5642_v44 = vadd.f32 %v5609_v33, %v438_v56  ;;  %v5658_v0 = vld [vmem:[%s6687_s2 + $0xe0] sm:$0xff] }
 0x28a   :  { %v3968_v18 = vpop.f32.mrb[30].mxu0  ;;  %6814 = vst [vmem:[#allocation43_spill] sm:$0xff] %v5621_v41  ;;  %6815 = vst [vmem:[#allocation44_spill] sm:$0xff] %v5634_v50  ;;  %v941_v1 = vsel %vm460_vm13, %v5621_v41, -inf  ;;  %v956_v62 = vsel %vm460_vm13, %v5634_v50, -inf  ;;  %v491_v56 = vsel %vm460_vm13, %v5642_v44, -inf }
 0x28b   :  { %v5611_v47 = vpop.f32.mrb[31].mxu0  ;;  %951 = vmax.xlane.f32.xlu0 %v950_v17  ;;  %486 = vmax.xlane.f32.xlu1 %v485_v9  ;;  %v494_v9 = vsel %vm460_vm13, %v5596_v61, -inf  ;;  %6816 = vst [vmem:[#allocation45_spill] sm:$0xff] %v5642_v44  ;;  %v1786_v61 = vmul.f32 %v3968_v18, %v5395_v53  ;;  %v440_v18 = vmul.f32 %v5462_v57, %v5626_v15 }
 0x28c   :  { %v443_v57 = vmul.f32 %v5480_v4, %v5589_v11 }
 0x28d   :  { %v5676_v44 = vadd.f32 %v5658_v0, %v440_v18 }
 0x28e   :  { %v3971_v17 = vpop.f32.mrb[32].mxu0 }
 0x28f   :  { %v1740_v52 = vpop.f32.mrb[33].mxu0  ;;  %495 = vmax.xlane.f32.xlu1 %v494_v9  ;;  %501 = vmax.xlane.f32.xlu0 %v500_v34  ;;  %v5648_v9 = vadd.f32 %v5418_v20, %v1784_v19  ;;  %v1788_v19 = vmul.f32 %v3971_v17, %v5460_v22  ;;  %6820 = vst [vmem:[#allocation49_spill] sm:$0xff] %v5676_v44  ;;  %v5681_v17 = vld [vmem:[%s6687_s2 + $0x70] sm:$0xff]  ;;  %v497_v21 = vsel %vm460_vm13, %v5676_v44, -inf }
 0x290   :  { %v1787_v5 = vmul.f32 %v1740_v52, %v5485_v30  ;;  %v893_v18 = vmul.f32 %v5489_v46, %v5681_v17 }
 0x291   :  { %6817 = vst [vmem:[#allocation46_spill] sm:$0xff] %v5648_v9 }
 0x292   :  { %v3974_v43 = vpop.f32.mrb[34].mxu0  ;;  %v5651_v34 = vadd.f32 %v5542_v40, %v1787_v5  ;;  %v1826_v5 = vsel %vm460_vm13, %v5648_v9, -inf }
 0x293   :  { %v5653_v52 = vpop.f32.mrb[35].mxu0  ;;  %942 = vmax.xlane.f32.xlu1 %v941_v1  ;;  %957 = vmax.xlane.f32.xlu0 %v956_v62  ;;  %v5668_v1 = vadd.f32 %v5658_v0, %v891_v42  ;;  %v5671_v62 = vadd.f32 %v5428_v7, %v1786_v61  ;;  %v1790_v42 = vmul.f32 %v3974_v43, %v5510_v6 }
 0x295   :  { %6818 = vst [vmem:[#allocation47_spill] sm:$0xff] %v5668_v1  ;;  %6819 = vst [vmem:[#allocation48_spill] sm:$0xff] %v5671_v62  ;;  %v947_v61 = vsel %vm460_vm13, %v5668_v1, -inf }
 0x296   :  { %v3977_v50 = vpop.f32.mrb[36].mxu0 }
 0x297   :  { %v1760_v41 = vpop.f32.mrb[37].mxu0  ;;  %492 = vmax.xlane.f32.xlu1 %v491_v56  ;;  %1827 = vmax.xlane.f32.xlu0 %v1826_v5  ;;  %v1832_v56 = vsel %vm460_vm13, %v5671_v62, -inf  ;;  %v5689_v5 = vadd.f32 %v5505_v31, %v1788_v19  ;;  %v1792_v43 = vmul.f32 %v3977_v50, %v5530_v24  ;;  %v5699_v62 = vadd.f32 %v5537_v51, %v1790_v42 }
 0x298   :  { %v5702_v19 = vadd.f32 %v5616_v12, %v443_v57  ;;  %v442_v50 = vmul.f32 %v5487_v35, %v5681_v17  ;;  %v1791_v42 = vmul.f32 %v1760_v41, %v5626_v15  ;;  %v1780_v35 = vmul.f32 %v5518_v55, %v5286_v25 }
 0x299   :  { %6821 = vst [vmem:[#allocation50_spill] sm:$0xff] %v5689_v5  ;;  %v1838_v1 = vsel %vm460_vm13, %v5689_v5, -inf  ;;  %6822 = vst [vmem:[#allocation51_spill] sm:$0xff] %v5699_v62  ;;  %v1844_v57 = vsel %vm460_vm13, %v5699_v62, -inf  ;;  %v5720_v54 = vadd.f32 %v5563_v23, %v1792_v43 }
 0x29a   :  { %v3980_v9 = vpop.f32.mrb[38].mxu0  ;;  %6823 = vst [vmem:[#allocation52_spill] sm:$0xff] %v5702_v19  ;;  %v506_v44 = vsel %vm460_vm13, %v5702_v19, -inf }
 0x29b   :  { %v1770_v4 = vpop.f32.mrb[39].mxu0  ;;  %948 = vmax.xlane.f32.xlu1 %v947_v61  ;;  %1833 = vmax.xlane.f32.xlu0 %v1832_v56  ;;  %v5707_v61 = vld [vmem:[%s6687_s2 + $0xf0] sm:$0xff]  ;;  %v1794_v62 = vmul.f32 %v3980_v9, %v5589_v11  ;;  %v1850_v43 = vsel %vm460_vm13, %v5720_v54, -inf  ;;  %s4770_s2 = smov 32  }
 0x29c   :  { %v5712_v56 = vadd.f32 %v5707_v61, %v893_v18  ;;  %v5728_v41 = vadd.f32 %v5707_v61, %v442_v50 }
 0x29e   :  { %v4039_v45 = vpop.f32.mrb[40].mxu0  ;;  %v503_v9 = vsel %vm460_vm13, %v5728_v41, -inf }
 0x29f   :  { %v2391_v46 = vpop.f32.mrb[41].mxu0  ;;  %1839 = vmax.xlane.f32.xlu0 %v1838_v1  ;;  %498 = vmax.xlane.f32.xlu1 %v497_v21 }
 0x2a2   :  { %v4042_v5 = vpop.f32.mrb[42].mxu0 }
 0x2a3   :  { %v2473_v21 = vmul.f32 %v4042_v5, %v5310_v32  ;;  %v5723_v1 = vpop.f32.mrb[43].mxu0  ;;  %1845 = vmax.xlane.f32.xlu0 %v1844_v57  ;;  %507 = vmax.xlane.f32.xlu1 %v506_v44  ;;  %v953_v32 = vsel %vm460_vm13, %v5712_v56, -inf  ;;  %v5739_v44 = vadd.f32 %v5658_v0, %v1791_v42  ;;  %v1793_v57 = vmul.f32 %v1770_v4, %v5681_v17 }
 0x2a5   :  { %v5731_v18 = vadd.f32 %v5342_v13, %v2473_v21  ;;  %v1779_v13 = vmul.f32 %v5532_v3, %v5291_v26  ;;  %v1847_v42 = vsel %vm460_vm13, %v5739_v44, -inf }
 0x2a6   :  { %v4045_v19 = vpop.f32.mrb[44].mxu0 }
 0x2a7   :  { %v2475_v55 = vmul.f32 %v4045_v19, %v5382_v49  ;;  %v5742_v5 = vpop.f32.mrb[45].mxu0  ;;  %1851 = vmax.xlane.f32.xlu0 %v1850_v43  ;;  %954 = vmax.xlane.f32.xlu1 %v953_v32  ;;  %v5755_v49 = vadd.f32 %v5616_v12, %v1794_v62  ;;  %v5758_v19 = vadd.f32 %v5296_v36, %v1780_v35 }
 0x2a8   :  { %v2471_v32 = vmul.f32 %v4039_v45, %v5286_v25  ;;  %v1781_v25 = vmul.f32 %v5558_v28, %v5317_v37 }
 0x2a9   :  { %v5749_v50 = vadd.f32 %v5418_v20, %v2475_v55  ;;  %v5762_v20 = vadd.f32 %v5303_v10, %v1779_v13  ;;  %v1856_v62 = vsel %vm460_vm13, %v5755_v49, -inf  ;;  %v1814_v35 = vsel %vm460_vm13, %v5758_v19, -inf }
 0x2aa   :  { %v4048_v21 = vpop.f32.mrb[46].mxu0 }
 0x2ab   :  { %v2477_v3 = vmul.f32 %v4048_v21, %v5395_v53  ;;  %v2421_v43 = vpop.f32.mrb[47].mxu0  ;;  %1848 = vmax.xlane.f32.xlu0 %v1847_v42  ;;  %504 = vmax.xlane.f32.xlu1 %v503_v9  ;;  %v5773_v53 = vadd.f32 %v5707_v61, %v1793_v57  ;;  %v1811_v45 = vsel %vm460_vm13, %v5762_v20, -inf  ;;  %v2470_v42 = vmul.f32 %v2391_v46, %v5291_v26 }
 0x2ac   :  { %v5797_v26 = vadd.f32 %v5347_v14, %v1781_v25 }
 0x2ad   :  { %v5765_v4 = vadd.f32 %v5428_v7, %v2477_v3  ;;  %v5788_v3 = vadd.f32 %v5296_v36, %v2471_v32  ;;  %v1820_v36 = vsel %vm460_vm13, %v5571_v58, -inf }
 0x2ae   :  { %v4051_v55 = vpop.f32.mrb[48].mxu0 }
 0x2af   :  { %v2479_v9 = vmul.f32 %v4051_v55, %v5460_v22  ;;  %v2431_v21 = vpop.f32.mrb[49].mxu0  ;;  %1857 = vmax.xlane.f32.xlu0 %v1856_v62  ;;  %1815 = vmax.xlane.f32.xlu1 %v1814_v35  ;;  %v1853_v22 = vsel %vm460_vm13, %v5773_v53, -inf  ;;  %v2505_v62 = vsel %vm460_vm13, %v5788_v3, -inf }
 0x2b0   :  { %v2478_v7 = vmul.f32 %v2431_v21, %v5485_v30 }
 0x2b1   :  { %v5782_v13 = vadd.f32 %v5505_v31, %v2479_v9  ;;  %v1783_v31 = vmul.f32 %v5591_v8, %v5354_v16  ;;  %v1817_v9 = vsel %vm460_vm13, %v5797_v26, -inf }
 0x2b2   :  { %v4054_v57 = vpop.f32.mrb[50].mxu0  ;;  %v5791_v30 = vadd.f32 %v5542_v40, %v2478_v7  ;;  %v5804_v40 = vadd.f32 %v5303_v10, %v2470_v42  ;;  %v1785_v7 = vmul.f32 %v5611_v47, %v5423_v27  ;;  %v2472_v10 = vmul.f32 %v5723_v1, %v5317_v37 }
 0x2b3   :  { %v2441_v55 = vpop.f32.mrb[51].mxu0  ;;  %1854 = vmax.xlane.f32.xlu0 %v1853_v22  ;;  %1812 = vmax.xlane.f32.xlu1 %v1811_v45  ;;  %v5813_v21 = vadd.f32 %v5373_v2, %v1783_v31  ;;  %v2511_v22 = vsel %vm460_vm13, %v5731_v18, -inf  ;;  %v2476_v1 = vmul.f32 %v2421_v43, %v5423_v27 }
 0x2b4   :  { %v2480_v28 = vmul.f32 %v2441_v55, %v5576_v63  ;;  %v2502_v45 = vsel %vm460_vm13, %v5804_v40, -inf  ;;  %v5829_v47 = vadd.f32 %v5347_v14, %v2472_v10  ;;  %v5832_v37 = vadd.f32 %v5452_v59, %v1785_v7 }
 0x2b5   :  { %v1823_v55 = vsel %vm460_vm13, %v5813_v21, -inf  ;;  %v1835_v14 = vsel %vm460_vm13, %v5651_v34, -inf }
 0x2b6   :  { %v4057_v46 = vpop.f32.mrb[52].mxu0  ;;  %v5807_v32 = vadd.f32 %v5609_v33, %v2480_v28  ;;  %v2508_v28 = vsel %vm460_vm13, %v5829_v47, -inf  ;;  %v1829_v31 = vsel %vm460_vm13, %v5832_v37, -inf }
 0x2b7   :  { %v2451_v35 = vpop.f32.mrb[53].mxu0  ;;  %2506 = vmax.xlane.f32.xlu0 %v2505_v62  ;;  %1821 = vmax.xlane.f32.xlu1 %v1820_v36  ;;  %v2481_v62 = vmul.f32 %v4054_v57, %v5510_v6  ;;  %v2523_v36 = vsel %vm460_vm13, %v5765_v4, -inf }
 0x2b8   :  { %v2482_v8 = vmul.f32 %v2451_v35, %v5626_v15  ;;  %v2517_v35 = vsel %vm460_vm13, %v5749_v50, -inf }
 0x2b9   :  { %v5859_v57 = vadd.f32 %v5537_v51, %v2481_v62 }
 0x2ba   :  { %v4060_v25 = vpop.f32.mrb[54].mxu0  ;;  %v5822_v42 = vadd.f32 %v5658_v0, %v2482_v8  ;;  %v1789_v0 = vmul.f32 %v5653_v52, %v5576_v63  ;;  %v5847_v63 = vadd.f32 %v5452_v59, %v2476_v1  ;;  %v2474_v52 = vmul.f32 %v5742_v5, %v5354_v16 }
 0x2bb   :  { %v2461_v15 = vpop.f32.mrb[55].mxu0  ;;  %2503 = vmax.xlane.f32.xlu0 %v2502_v45  ;;  %1818 = vmax.xlane.f32.xlu1 %v1817_v9  ;;  %v2483_v59 = vmul.f32 %v4057_v46, %v5530_v24  ;;  %v2532_v5 = vsel %vm460_vm13, %v5807_v32, -inf  ;;  %v2485_v24 = vmul.f32 %v4060_v25, %v5589_v11  ;;  %v5896_v45 = vpop.permute.xlu1 %4487 }
 0x2bc   :  { %v5850_v27 = vadd.f32 %v5609_v33, %v1789_v0  ;;  %v2520_v43 = vsel %vm460_vm13, %v5847_v63, -inf  ;;  %v2535_v33 = vsel %vm460_vm13, %v5859_v57, -inf  ;;  %v5867_v16 = vadd.f32 %v5373_v2, %v2474_v52 }
 0x2bd   :  { %v5874_v8 = vadd.f32 %v5563_v23, %v2483_v59  ;;  %v2529_v2 = vsel %vm460_vm13, %v5782_v13, -inf  ;;  %v2484_v9 = vmul.f32 %v2461_v15, %v5681_v17  ;;  %v2538_v7 = vsel %vm460_vm13, %v5822_v42, -inf }
 0x2be   :  { %v1841_v6 = vsel %vm460_vm13, %v5850_v27, -inf  ;;  %v2514_v51 = vsel %vm460_vm13, %v5867_v16, -inf  ;;  %v2526_v23 = vsel %vm460_vm13, %v5791_v30, -inf  ;;  %v5887_v10 = vadd.f32 %v5616_v12, %v2485_v24 }
 0x2bf   :  { %2512 = vmax.xlane.f32.xlu0 %v2511_v22  ;;  %1824 = vmax.xlane.f32.xlu1 %v1823_v55  ;;  %v2541_v46 = vsel %vm460_vm13, %v5874_v8, -inf  ;;  %v5892_v25 = vadd.f32 %v5707_v61, %v2484_v9  ;;  %v5898_v15 = vpop.permute.xlu1 %4492 }
 0x2c0   :  { %v2547_v11 = vsel %vm460_vm13, %v5887_v10, -inf  ;;  %6824 = vst [vmem:[#allocation53_spill] sm:$0xff] %v5898_v15 }
 0x2c1   :  { %v2544_v17 = vsel %vm460_vm13, %v5892_v25, -inf }
 0x2c3   :  { %2509 = vmax.xlane.f32.xlu0 %v2508_v28  ;;  %1830 = vmax.xlane.f32.xlu1 %v1829_v31 }
 0x2c7   :  { %2524 = vmax.xlane.f32.xlu0 %v2523_v36  ;;  %1836 = vmax.xlane.f32.xlu1 %v1835_v14 }
 0x2cb   :  { %2521 = vmax.xlane.f32.xlu0 %v2520_v43  ;;  %1842 = vmax.xlane.f32.xlu1 %v1841_v6 }
 0x2cf   :  { %2536 = vmax.xlane.f32.xlu0 %v2535_v33  ;;  %2518 = vmax.xlane.f32.xlu1 %v2517_v35 }
 0x2d3   :  { %2533 = vmax.xlane.f32.xlu0 %v2532_v5  ;;  %2515 = vmax.xlane.f32.xlu1 %v2514_v51  ;;  %v6826_v51 = vld [vmem:[#allocation23_spill] sm:$0xff] }
 0x2d7   :  { %2542 = vmax.xlane.f32.xlu0 %v2541_v46  ;;  %2530 = vmax.xlane.f32.xlu1 %v2529_v2 }
 0x2db   :  { %2539 = vmax.xlane.f32.xlu0 %v2538_v7  ;;  %2527 = vmax.xlane.f32.xlu1 %v2526_v23  ;;  %v6828_v23 = vld [vmem:[#allocation26_spill] sm:$0xff] }
 0x2df   :  { %2548 = vmax.xlane.f32.xlu1 %v2547_v11 }
 0x2e3   :  { %2545 = vmax.xlane.f32.xlu1 %v2544_v17  ;;  %v6829_v17 = vld [vmem:[#allocation27_spill] sm:$0xff] }
 0x2f0   :  { %v466_v22 = vpop.xlane.xlu0 %465  ;;  %v916_v12 = vpop.xlane.xlu1 %915 }
 0x2f1   :  { %v510_v55 = vsub.f32 %v5320_v38, %v466_v22  ;;  %v960_v0 = vsub.f32 %v5323_v39, %v916_v12  ;;  %v6825_v39 = vld [vmem:[#allocation21_spill] sm:$0xff] }
 0x2f3   :  { %v527_v1 = vmul.f32 1.442695, %v510_v55  ;;  %v977_v28 = vmul.f32 1.442695, %v960_v0 }
 0x2f4   :  { %v913_v31 = vpop.xlane.xlu0 %912  ;;  %v463_v61 = vpop.xlane.xlu1 %462 }
 0x2f5   :  { %4511 = vpow2.f32 %v527_v1  ;;  %v959_v14 = vsub.f32 %v5326_v48, %v913_v31  ;;  %v509_v62 = vsub.f32 %v5334_v60, %v463_v61 }
 0x2f6   :  { %4513 = vpow2.f32 %v977_v28 }
 0x2f7   :  { %v975_v36 = vmul.f32 1.442695, %v959_v14  ;;  %v525_v52 = vmul.f32 1.442695, %v509_v62  ;;  %v6830_v62 = vld [vmem:[#allocation28_spill] sm:$0xff] }
 0x2f8   :  { %v922_v43 = vpop.xlane.xlu0 %921  ;;  %v469_v6 = vpop.xlane.xlu1 %468 }
 0x2f9   :  { %4515 = vpow2.f32 %v975_v36  ;;  %v962_v59 = vsub.f32 %v5362_v29, %v922_v43  ;;  %v511_v33 = vsub.f32 %v6825_v39, %v469_v6  ;;  %v6831_v6 = vld [vmem:[#allocation24_spill] sm:$0xff] }
 0x2fa   :  { %4517 = vpow2.f32 %v525_v52 }
 0x2fb   :  { %v981_v38 = vmul.f32 1.442695, %v962_v59  ;;  %v529_v60 = vmul.f32 1.442695, %v511_v33 }
 0x2fc   :  { %v472_v35 = vpop.xlane.xlu0 %471  ;;  %v925_v5 = vpop.xlane.xlu1 %924 }
 0x2fd   :  { %4519 = vpow2.f32 %v981_v38  ;;  %v512_v24 = vsub.f32 %v6826_v51, %v472_v35  ;;  %v963_v59 = vsub.f32 %v6831_v6, %v925_v5  ;;  %v6832_v51 = vld [vmem:[#allocation30_spill] sm:$0xff] }
 0x2ff   :  { %v5907_v48 = vpop.eup %4511  ;;  %v531_v46 = vmul.f32 1.442695, %v512_v24 }
 0x300   :  { %6827 = vst [vmem:[#allocation21_spill] sm:$0xff] %v5907_v48  ;;  %v5909_v2 = vpop.eup %4513  ;;  %v919_v9 = vpop.xlane.xlu0 %918  ;;  %v560_v29 = vsel %vm460_vm13, %v5907_v48, 0.0 }
 0x301   :  { %v475_v7 = vpop.xlane.xlu1 %474  ;;  %4521 = vpow2.f32 %v531_v46  ;;  %v961_v11 = vsub.f32 %v6828_v23, %v919_v9  ;;  %561 = vadd.xlane.f32.xlu0 %v560_v29  ;;  %v1010_v12 = vsel %vm460_vm13, %v5909_v2, 0.0  ;;  %v983_v46 = vmul.f32 1.442695, %v963_v59 }
 0x302   :  { %v513_v22 = vsub.f32 %v6829_v17, %v475_v7  ;;  %1011 = vadd.xlane.f32.xlu1 %v1010_v12  ;;  %4523 = vpow2.f32 %v529_v60 }
 0x303   :  { %v5917_v55 = vpop.eup %4515  ;;  %v979_v0 = vmul.f32 1.442695, %v961_v11  ;;  %v6835_v11 = vld [vmem:[#allocation33_spill] sm:$0xff] }
 0x304   :  { %v533_v1 = vmul.f32 1.442695, %v513_v22  ;;  %v5919_v28 = vpop.eup %4517  ;;  %v928_v31 = vpop.xlane.xlu0 %927  ;;  %v1007_v14 = vsel %vm460_vm13, %v5917_v55, 0.0  ;;  %v6836_v22 = vld [vmem:[#allocation34_spill] sm:$0xff] }
 0x305   :  { %v484_v61 = vpop.xlane.xlu1 %483  ;;  %4525 = vpow2.f32 %v979_v0  ;;  %v964_v36 = vsub.f32 %v6830_v62, %v928_v31  ;;  %v557_v52 = vsel %vm460_vm13, %v5919_v28, 0.0 }
 0x306   :  { %558 = vadd.xlane.f32.xlu0 %v557_v52  ;;  %1008 = vadd.xlane.f32.xlu1 %v1007_v14  ;;  %4527 = vpow2.f32 %v533_v1  ;;  %v6837_v1 = vld [vmem:[#allocation29_spill] sm:$0xff] }
 0x307   :  { %v5926_v43 = vpop.eup %4519  ;;  %v985_v38 = vmul.f32 1.442695, %v964_v36  ;;  %v516_v31 = vsub.f32 %v6837_v1, %v484_v61 }
 0x308   :  { %v478_v39 = vpop.xlane.xlu0 %477  ;;  %v1016_v35 = vsel %vm460_vm13, %v5926_v43, 0.0 }
 0x309   :  { %v931_v33 = vpop.xlane.xlu1 %930  ;;  %4529 = vpow2.f32 %v985_v38  ;;  %v514_v24 = vsub.f32 %v6832_v51, %v478_v39  ;;  %v6839_v39 = vld [vmem:[#allocation36_spill] sm:$0xff]  ;;  %v539_v61 = vmul.f32 1.442695, %v516_v31 }
 0x30a   :  { %1017 = vadd.xlane.f32.xlu1 %v1016_v35 }
 0x30b   :  { %v5932_v60 = vpop.eup %4521  ;;  %v535_v9 = vmul.f32 1.442695, %v514_v24  ;;  %v6840_v24 = vld [vmem:[#allocation31_spill] sm:$0xff] }
 0x30c   :  { %6833 = vst [vmem:[#allocation23_spill] sm:$0xff] %v5932_v60  ;;  %v934_v7 = vpop.xlane.xlu0 %933  ;;  %v566_v5 = vsel %vm460_vm13, %v5932_v60, 0.0  ;;  %v5936_v23 = vpop.eup %4523 }
 0x30d   :  { %v481_v29 = vpop.xlane.xlu1 %480  ;;  %6834 = vst [vmem:[#allocation26_spill] sm:$0xff] %v5936_v23  ;;  %4531 = vpow2.f32 %v535_v9  ;;  %v966_v17 = vsub.f32 %v6835_v11, %v934_v7  ;;  %567 = vadd.xlane.f32.xlu0 %v566_v5  ;;  %v563_v6 = vsel %vm460_vm13, %v5936_v23, 0.0 }
 0x30e   :  { %v515_v12 = vsub.f32 %v6836_v22, %v481_v29  ;;  %4533 = vpow2.f32 %v983_v46  ;;  %v965_v46 = vsub.f32 %v6840_v24, %v931_v33 }
 0x30f   :  { %v5940_v0 = vpop.eup %4525  ;;  %v989_v14 = vmul.f32 1.442695, %v966_v17 }
 0x310   :  { %v537_v62 = vmul.f32 1.442695, %v515_v12  ;;  %v940_v36 = vpop.xlane.xlu0 %939  ;;  %v1013_v59 = vsel %vm460_vm13, %v5940_v0, 0.0  ;;  %v5947_v38 = vpop.eup %4527  ;;  %v987_v22 = vmul.f32 1.442695, %v965_v46  ;;  %v6842_v12 = vld [vmem:[#allocation35_spill] sm:$0xff] }
 0x311   :  { %v490_v52 = vpop.xlane.xlu1 %489  ;;  %6838 = vst [vmem:[#allocation27_spill] sm:$0xff] %v5947_v38  ;;  %564 = vadd.xlane.f32.xlu0 %v563_v6  ;;  %1014 = vadd.xlane.f32.xlu1 %v1013_v59  ;;  %v569_v5 = vsel %vm460_vm13, %v5947_v38, 0.0  ;;  %v968_v1 = vsub.f32 %v6842_v12, %v940_v36 }
 0x312   :  { %v518_v35 = vsub.f32 %v6839_v39, %v490_v52  ;;  %4535 = vpow2.f32 %v537_v62  ;;  %v6843_v52 = vld [vmem:[#allocation39_spill] sm:$0xff]  ;;  %v6844_v39 = vld [vmem:[#allocation38_spill] sm:$0xff] }
 0x313   :  { %v5950_v51 = vpop.eup %4529  ;;  %4537 = vpow2.f32 %v989_v14  ;;  %v993_v59 = vmul.f32 1.442695, %v968_v1 }
 0x314   :  { %v543_v9 = vmul.f32 1.442695, %v518_v35  ;;  %v946_v7 = vpop.xlane.xlu0 %945  ;;  %v1022_v11 = vsel %vm460_vm13, %v5950_v51, 0.0 }
 0x315   :  { %v937_v29 = vpop.xlane.xlu1 %936  ;;  %570 = vadd.xlane.f32.xlu0 %v569_v5  ;;  %1023 = vadd.xlane.f32.xlu1 %v1022_v11 }
 0x316   :  { %4539 = vpow2.f32 %v543_v9  ;;  %v967_v35 = vsub.f32 %v6844_v39, %v937_v29 }
 0x317   :  { %v5957_v17 = vpop.eup %4531  ;;  %4541 = vpow2.f32 %v539_v61 }
 0x318   :  { %6841 = vst [vmem:[#allocation28_spill] sm:$0xff] %v5957_v17  ;;  %v5960_v33 = vpop.xlane.xlu0 %951  ;;  %v572_v14 = vsel %vm460_vm13, %v5957_v17, 0.0  ;;  %v5964_v62 = vpop.eup %4533  ;;  %4543 = vpow2.f32 %v987_v22  ;;  %v6846_v22 = vld [vmem:[#allocation37_spill] sm:$0xff]  ;;  %v991_v29 = vmul.f32 1.442695, %v967_v35 }
 0x319   :  { %v487_v31 = vpop.xlane.xlu1 %486  ;;  %573 = vadd.xlane.f32.xlu1 %v572_v14  ;;  %v1019_v9 = vsel %vm460_vm13, %v5964_v62, 0.0  ;;  %v970_v12 = vsub.f32 %v6846_v22, %v946_v7  ;;  %v6850_v7 = vld [vmem:[#allocation42_spill] sm:$0xff]  ;;  %v6851_v17 = vld [vmem:[#allocation45_spill] sm:$0xff] }
 0x31a   :  { %v517_v6 = vsub.f32 %v6843_v52, %v487_v31 }
 0x31c   :  { %v541_v24 = vmul.f32 1.442695, %v517_v6  ;;  %v5968_v61 = vpop.eup %4535  ;;  %v502_v36 = vpop.xlane.xlu0 %501 }
 0x31d   :  { %6845 = vst [vmem:[#allocation24_spill] sm:$0xff] %v5968_v61  ;;  %v496_v46 = vpop.xlane.xlu1 %495  ;;  %v5972_v5 = vpop.eup %4537  ;;  %v575_v11 = vsel %vm460_vm13, %v5968_v61, 0.0  ;;  %1020 = vadd.xlane.f32.xlu1 %v1019_v9  ;;  %v6849_v9 = vld [vmem:[#allocation41_spill] sm:$0xff]  ;;  %v522_v35 = vsub.f32 %v6850_v7, %v502_v36  ;;  %v6854_v7 = vld [vmem:[#allocation47_spill] sm:$0xff] }
 0x31e   :  { %4545 = vpow2.f32 %v541_v24  ;;  %576 = vadd.xlane.f32.xlu0 %v575_v11  ;;  %v1028_v52 = vsel %vm460_vm13, %v5972_v5, 0.0  ;;  %v520_v24 = vsub.f32 %v6849_v9, %v496_v46 }
 0x31f   :  { %4547 = vpow2.f32 %v993_v59  ;;  %v997_v59 = vmul.f32 1.442695, %v970_v12  ;;  %v551_v46 = vmul.f32 1.442695, %v522_v35 }
 0x320   :  { %v5977_v1 = vpop.eup %4539  ;;  %v958_v14 = vpop.xlane.xlu0 %957  ;;  %4549 = vpow2.f32 %v991_v29 }
 0x321   :  { %6847 = vst [vmem:[#allocation30_spill] sm:$0xff] %v5977_v1  ;;  %v943_v31 = vpop.xlane.xlu1 %942  ;;  %v5981_v6 = vpop.eup %4541  ;;  %v584_v39 = vsel %vm460_vm13, %v5977_v1, 0.0  ;;  %1029 = vadd.xlane.f32.xlu1 %v1028_v52  ;;  %v547_v1 = vmul.f32 1.442695, %v520_v24  ;;  %v6852_v52 = vld [vmem:[#allocation43_spill] sm:$0xff]  ;;  %4551 = vpow2.f32 %v997_v59 }
 0x322   :  { %6848 = vst [vmem:[#allocation33_spill] sm:$0xff] %v5981_v6  ;;  %585 = vadd.xlane.f32.xlu0 %v584_v39  ;;  %v578_v22 = vsel %vm460_vm13, %v5981_v6, 0.0  ;;  %v5989_v61 = vpop.eup %4543  ;;  %v969_v60 = vsub.f32 %v6852_v52, %v943_v31  ;;  %v6855_v31 = vld [vmem:[#allocation40_spill] sm:$0xff] }
 0x323   :  { %v1025_v39 = vsel %vm460_vm13, %v5989_v61, 0.0  ;;  %v972_v24 = vsub.f32 %v6855_v31, %v5960_v33  ;;  %v6858_v31 = vld [vmem:[#allocation52_spill] sm:$0xff] }
 0x324   :  { %v5992_v38 = vpop.xlane.xlu0 %1827 }
 0x325   :  { %v493_v11 = vpop.xlane.xlu1 %492  ;;  %579 = vadd.xlane.f32.xlu1 %v578_v22 }
 0x326   :  { %v519_v15 = vsub.f32 %v6851_v17, %v493_v11 }
 0x328   :  { %v545_v12 = vmul.f32 1.442695, %v519_v15  ;;  %v5995_v29 = vpop.eup %4545  ;;  %v995_v15 = vmul.f32 1.442695, %v969_v60  ;;  %v6006_v35 = vpop.xlane.xlu0 %1833 }
 0x329   :  { %6853 = vst [vmem:[#allocation34_spill] sm:$0xff] %v5995_v29  ;;  %v949_v36 = vpop.xlane.xlu1 %948  ;;  %v5999_v9 = vpop.eup %4547  ;;  %v581_v11 = vsel %vm460_vm13, %v5995_v29, 0.0  ;;  %1026 = vadd.xlane.f32.xlu1 %v1025_v39  ;;  %v1001_v39 = vmul.f32 1.442695, %v972_v24  ;;  %v6857_v29 = vld [vmem:[#allocation44_spill] sm:$0xff] }
 0x32a   :  { %4553 = vpow2.f32 %v545_v12  ;;  %v971_v17 = vsub.f32 %v6854_v7, %v949_v36  ;;  %582 = vadd.xlane.f32.xlu0 %v581_v11  ;;  %v1034_v52 = vsel %vm460_vm13, %v5999_v9, 0.0  ;;  %v6010_v12 = vpop.eup %4549  ;;  %v6856_v36 = vld [vmem:[#allocation49_spill] sm:$0xff]  ;;  %v974_v33 = vsub.f32 %v6857_v29, %v958_v14 }
 0x32b   :  { %4555 = vpow2.f32 %v547_v1 }
 0x32c   :  { %4557 = vpow2.f32 %v551_v46  ;;  %v999_v59 = vmul.f32 1.442695, %v971_v17  ;;  %v1031_v46 = vsel %vm460_vm13, %v6010_v12, 0.0  ;;  %v6016_v17 = vpop.eup %4551  ;;  %v6018_v11 = vpop.xlane.xlu0 %1839 }
 0x32d   :  { %v499_v22 = vpop.xlane.xlu1 %498  ;;  %1035 = vadd.xlane.f32.xlu1 %v1034_v52  ;;  %4559 = vpow2.f32 %v995_v15 }
 0x32e   :  { %v521_v7 = vsub.f32 %v6856_v36, %v499_v22  ;;  %4561 = vpow2.f32 %v999_v59  ;;  %v1005_v22 = vmul.f32 1.442695, %v974_v33  ;;  %v1040_v59 = vsel %vm460_vm13, %v6016_v17, 0.0 }
 0x32f   :  { %4563 = vpow2.f32 %v1001_v39 }
 0x330   :  { %v549_v60 = vmul.f32 1.442695, %v521_v7  ;;  %v6032_v39 = vpop.xlane.xlu0 %1845 }
 0x331   :  { %v508_v1 = vpop.xlane.xlu1 %507  ;;  %1032 = vadd.xlane.f32.xlu1 %v1031_v46 }
 0x332   :  { %v524_v6 = vsub.f32 %v6858_v31, %v508_v1  ;;  %4565 = vpow2.f32 %v549_v60 }
 0x333   :  { %4567 = vpow2.f32 %v1005_v22 }
 0x334   :  { %v6021_v52 = vpop.eup %4553  ;;  %v555_v24 = vmul.f32 1.442695, %v524_v6 }
 0x335   :  { %6859 = vst [vmem:[#allocation29_spill] sm:$0xff] %v6021_v52  ;;  %v6023_v14 = vpop.eup %4555  ;;  %v955_v29 = vpop.xlane.xlu1 %954  ;;  %v587_v15 = vsel %vm460_vm13, %v6021_v52, 0.0  ;;  %1041 = vadd.xlane.f32.xlu1 %v1040_v59 }
 0x336   :  { %6860 = vst [vmem:[#allocation36_spill] sm:$0xff] %v6023_v14  ;;  %v6029_v36 = vpop.eup %4557  ;;  %v973_v7 = vsub.f32 %v5712_v56, %v955_v29  ;;  %588 = vadd.xlane.f32.xlu0 %v587_v15  ;;  %4569 = vpow2.f32 %v555_v24  ;;  %v590_v46 = vsel %vm460_vm13, %v6023_v14, 0.0 }
 0x337   :  { %6861 = vst [vmem:[#allocation31_spill] sm:$0xff] %v6029_v36  ;;  %v6034_v33 = vpop.eup %4559  ;;  %v596_v1 = vsel %vm460_vm13, %v6029_v36, 0.0  ;;  %v6051_v36 = vpop.xlane.xlu0 %1851 }
 0x338   :  { %v1003_v6 = vmul.f32 1.442695, %v973_v7  ;;  %v6040_v31 = vpop.eup %4561  ;;  %v1037_v59 = vsel %vm460_vm13, %v6034_v33, 0.0 }
 0x339   :  { %v505_v60 = vpop.xlane.xlu1 %504  ;;  %591 = vadd.xlane.f32.xlu1 %v590_v46  ;;  %v6043_v29 = vpop.eup %4563  ;;  %v1043_v15 = vsel %vm460_vm13, %v6040_v31, 0.0 }
 0x33a   :  { %v523_v56 = vsub.f32 %v5728_v41, %v505_v60  ;;  %597 = vadd.xlane.f32.xlu0 %v596_v1  ;;  %4571 = vpow2.f32 %v1003_v6  ;;  %v1046_v46 = vsel %vm460_vm13, %v6043_v29, 0.0 }
 0x33c   :  { %v553_v22 = vmul.f32 1.442695, %v523_v56  ;;  %v6049_v7 = vpop.eup %4565 }
 0x33d   :  { %v1816_v24 = vpop.xlane.xlu1 %1815  ;;  %6862 = vst [vmem:[#allocation35_spill] sm:$0xff] %v6049_v7  ;;  %1038 = vadd.xlane.f32.xlu1 %v1037_v59  ;;  %v6054_v6 = vpop.eup %4567  ;;  %v593_v1 = vsel %vm460_vm13, %v6049_v7, 0.0 }
 0x33e   :  { %v1860_v14 = vsub.f32 %v5758_v19, %v1816_v24  ;;  %1044 = vadd.xlane.f32.xlu0 %v1043_v15  ;;  %4573 = vpow2.f32 %v553_v22  ;;  %6863 = vst [vmem:[#allocation39_spill] sm:$0xff] %v6054_v6  ;;  %v6064_v19 = vpop.xlane.xlu0 %1848  ;;  %v1052_v22 = vsel %vm460_vm13, %v6054_v6, 0.0 }
 0x340   :  { %v1877_v41 = vmul.f32 1.442695, %v1860_v14  ;;  %v6062_v56 = vpop.eup %4569 }
 0x341   :  { %v6056_v60 = vpop.xlane.xlu1 %1812  ;;  %6864 = vst [vmem:[#allocation38_spill] sm:$0xff] %v6062_v56  ;;  %1047 = vadd.xlane.f32.xlu1 %v1046_v46  ;;  %v602_v14 = vsel %vm460_vm13, %v6062_v56, 0.0 }
 0x342   :  { %594 = vadd.xlane.f32.xlu0 %v593_v1  ;;  %4575 = vpow2.f32 %v1877_v41  ;;  %v6865_v41 = vld [vmem:[#allocation46_spill] sm:$0xff]  ;;  %v1858_v56 = vpop.xlane.xlu0 %1857 }
 0x343   :  { %v1864_v1 = vsub.f32 %v6865_v41, %v5992_v38 }
 0x344   :  { %v6070_v15 = vpop.eup %4571 }
 0x345   :  { %v1822_v24 = vpop.xlane.xlu1 %1821  ;;  %1053 = vadd.xlane.f32.xlu1 %v1052_v22  ;;  %v1049_v23 = vsel %vm460_vm13, %v6070_v15, 0.0 }
 0x346   :  { %v1862_v59 = vsub.f32 %v5571_v58, %v1822_v24  ;;  %603 = vadd.xlane.f32.xlu0 %v602_v14  ;;  %v1885_v14 = vmul.f32 1.442695, %v1864_v1  ;;  %v6087_v41 = vpop.xlane.xlu0 %1854 }
 0x348   :  { %v1881_v7 = vmul.f32 1.442695, %v1862_v59  ;;  %v6073_v52 = vpop.eup %4573 }
 0x349   :  { %v1819_v46 = vpop.xlane.xlu1 %1818  ;;  %1050 = vadd.xlane.f32.xlu1 %v1049_v23  ;;  %v599_v6 = vsel %vm460_vm13, %v6073_v52, 0.0 }
 0x34a   :  { %v1861_v48 = vsub.f32 %v5797_v26, %v1819_v46  ;;  %4577 = vpow2.f32 %v1881_v7  ;;  %600 = vadd.xlane.f32.xlu0 %v599_v6  ;;  %v6866_v26 = vld [vmem:[#allocation48_spill] sm:$0xff] }
 0x34b   :  { %v1866_v23 = vsub.f32 %v6866_v26, %v6006_v35 }
 0x34c   :  { %v1879_v58 = vmul.f32 1.442695, %v1861_v48  ;;  %v6082_v24 = vpop.eup %4575 }
 0x34d   :  { %v1825_v22 = vpop.xlane.xlu1 %1824  ;;  %v1910_v59 = vsel %vm460_vm13, %v6082_v24, 0.0  ;;  %v1889_v46 = vmul.f32 1.442695, %v1866_v23  ;;  %v6870_v23 = vld [vmem:[#allocation11_spill] sm:$0xff] }
 0x34e   :  { %v1863_v38 = vsub.f32 %v5813_v21, %v1825_v22  ;;  %4579 = vpow2.f32 %v1879_v58  ;;  %1911 = vadd.xlane.f32.xlu0 %v1910_v59  ;;  %v2507_v21 = vpop.xlane.xlu0 %2506 }
 0x34f   :  { %4581 = vpow2.f32 %v1885_v14 }
 0x350   :  { %v1883_v7 = vmul.f32 1.442695, %v1863_v38 }
 0x351   :  { %v1831_v6 = vpop.xlane.xlu1 %1830 }
 0x352   :  { %4583 = vpow2.f32 %v1883_v7  ;;  %v1865_v1 = vsub.f32 %v5832_v37, %v1831_v6  ;;  %v6869_v37 = vld [vmem:[#allocation12_spill] sm:$0xff]  ;;  %v6107_v6 = vpop.xlane.xlu0 %2503 }
 0x353   :  { %4585 = vpow2.f32 %v1889_v46  ;;  %v6871_v7 = vpack.i.bf16 %v6869_v37, %v6870_v23 }
 0x354   :  { %v6091_v48 = vpop.eup %4577  ;;  %v1887_v14 = vmul.f32 1.442695, %v1865_v1 }
 0x355   :  { %6867 = vst [vmem:[#allocation37_spill] sm:$0xff] %v6091_v48  ;;  %v1837_v22 = vpop.xlane.xlu1 %1836  ;;  %v1916_v58 = vsel %vm460_vm13, %v6091_v48, 0.0 }
 0x356   :  { %1917 = vadd.xlane.f32.xlu0 %v1916_v58  ;;  %v1867_v35 = vsub.f32 %v5651_v34, %v1837_v22  ;;  %v6872_v58 = vld [vmem:[#allocation51_spill] sm:$0xff]  ;;  %4587 = vpow2.f32 %v1887_v14  ;;  %v2551_v14 = vsub.f32 %v5788_v3, %v2507_v21  ;;  %v6873_v3 = vld [vmem:[#allocation50_spill] sm:$0xff] }
 0x357   :  { %v1870_v48 = vsub.f32 %v6872_v58, %v6032_v39  ;;  %v1868_v21 = vsub.f32 %v6873_v3, %v6018_v11 }
 0x358   :  { %v6096_v59 = vpop.eup %4579  ;;  %v1891_v46 = vmul.f32 1.442695, %v1867_v35 }
 0x359   :  { %6868 = vst [vmem:[#allocation41_spill] sm:$0xff] %v6096_v59  ;;  %v1913_v38 = vsel %vm460_vm13, %v6096_v59, 0.0  ;;  %v6101_v26 = vpop.eup %4581  ;;  %v1897_v22 = vmul.f32 1.442695, %v1870_v48  ;;  %v2513_v59 = vpop.xlane.xlu0 %2512  ;;  %v2568_v48 = vmul.f32 1.442695, %v2551_v14 }
 0x35a   :  { %1914 = vadd.xlane.f32.xlu0 %v1913_v38  ;;  %4497 = vrot.lane.b32.xlu1 %v6871_v7, %s4769_s7  ;;  %v1922_v34 = vsel %vm460_vm13, %v6101_v26, 0.0  ;;  %v1874_v38 = vsub.f32 %v5755_v49, %v1858_v56  ;;  %4589 = vpow2.f32 %v1891_v46  ;;  %v1843_v35 = vpop.xlane.xlu1 %1842  ;;  %v1859_v49 = vsub.f32 %v5762_v20, %v6056_v60 }
 0x35b   :  { %4591 = vpow2.f32 %v1897_v22  ;;  %v2553_v46 = vsub.f32 %v5731_v18, %v2513_v59  ;;  %v1893_v59 = vmul.f32 1.442695, %v1868_v21  ;;  %v1869_v14 = vsub.f32 %v5850_v27, %v1843_v35 }
 0x35c   :  { %v6113_v1 = vpop.eup %4583  ;;  %v1905_v39 = vmul.f32 1.442695, %v1874_v38  ;;  %v1875_v38 = vmul.f32 1.442695, %v1859_v49 }
 0x35d   :  { %v1919_v37 = vsel %vm460_vm13, %v6113_v1, 0.0  ;;  %v6118_v23 = vpop.eup %4585  ;;  %v2510_v56 = vpop.xlane.xlu0 %2509  ;;  %v1895_v3 = vmul.f32 1.442695, %v1869_v14 }
 0x35e   :  { %1923 = vadd.xlane.f32.xlu0 %v1922_v34  ;;  %v1928_v7 = vsel %vm460_vm13, %v6118_v23, 0.0  ;;  %4593 = vpow2.f32 %v1905_v39  ;;  %v2552_v20 = vsub.f32 %v5829_v47, %v2510_v56  ;;  %v1872_v56 = vsub.f32 %v5720_v54, %v6051_v36 }
 0x35f   :  { %4595 = vpow2.f32 %v2568_v48 }
 0x360   :  { %v6123_v58 = vpop.eup %4587  ;;  %4597 = vpow2.f32 %v1875_v38  ;;  %v1901_v38 = vmul.f32 1.442695, %v1872_v56 }
 0x361   :  { %v1925_v34 = vsel %vm460_vm13, %v6123_v58, 0.0  ;;  %v2525_v60 = vpop.xlane.xlu0 %2524 }
 0x362   :  { %1920 = vadd.xlane.f32.xlu0 %v1919_v37  ;;  %v2519_v37 = vpop.xlane.xlu1 %2518 }
 0x363   :  { %v2555_v11 = vsub.f32 %v5749_v50, %v2519_v37  ;;  %v1871_v37 = vsub.f32 %v5739_v44, %v6064_v19  ;;  %v1873_v44 = vsub.f32 %v5773_v53, %v6087_v41  ;;  %v2550_v53 = vsub.f32 %v5804_v40, %v6107_v6 }
 0x364   :  { %v6130_v22 = vpop.eup %4589 }
 0x365   :  { %v1931_v39 = vsel %vm460_vm13, %v6130_v22, 0.0  ;;  %v6137_v18 = vpop.eup %4591  ;;  %v2576_v21 = vmul.f32 1.442695, %v2555_v11  ;;  %v1899_v14 = vmul.f32 1.442695, %v1871_v37 }
 0x366   :  { %1929 = vadd.xlane.f32.xlu0 %v1928_v7  ;;  %v2572_v7 = vmul.f32 1.442695, %v2553_v46  ;;  %v2516_v49 = vpop.xlane.xlu1 %2515  ;;  %v1940_v48 = vsel %vm460_vm13, %v6137_v18, 0.0  ;;  %v2522_v46 = vpop.xlane.xlu0 %2521 }
 0x367   :  { %v2554_v27 = vsub.f32 %v5867_v16, %v2516_v49 }
 0x368   :  { %4599 = vpow2.f32 %v2572_v7  ;;  %v6143_v47 = vpop.eup %4593  ;;  %v2557_v7 = vsub.f32 %v5765_v4, %v2525_v60 }
 0x369   :  { %4601 = vpow2.f32 %v1893_v59  ;;  %v1952_v50 = vsel %vm460_vm13, %v6143_v47, 0.0  ;;  %v6150_v35 = vpop.eup %4595  ;;  %v2574_v54 = vmul.f32 1.442695, %v2554_v27 }
 0x36a   :  { %1926 = vadd.xlane.f32.xlu0 %v1925_v34  ;;  %v2570_v34 = vmul.f32 1.442695, %v2552_v20  ;;  %v6155_v36 = vpop.eup %4597  ;;  %v2537_v20 = vpop.xlane.xlu0 %2536  ;;  %v2601_v16 = vsel %vm460_vm13, %v6150_v35, 0.0  ;;  %v2580_v19 = vmul.f32 1.442695, %v2557_v7 }
 0x36b   :  { %v2561_v4 = vsub.f32 %v5859_v57, %v2537_v20  ;;  %v1907_v11 = vsel %vm460_vm13, %v6155_v36, 0.0 }
 0x36c   :  { %4603 = vpow2.f32 %v2570_v34 }
 0x36d   :  { %4605 = vpow2.f32 %v1895_v3  ;;  %v2588_v57 = vmul.f32 1.442695, %v2561_v4 }
 0x36e   :  { %1932 = vadd.xlane.f32.xlu0 %v1931_v39  ;;  %4607 = vpow2.f32 %v2576_v21  ;;  %v2531_v39 = vpop.xlane.xlu1 %2530 }
 0x36f   :  { %4609 = vpow2.f32 %v1901_v38  ;;  %v2556_v38 = vsub.f32 %v5847_v63, %v2522_v46  ;;  %v2559_v20 = vsub.f32 %v5782_v13, %v2531_v39  ;;  %v2534_v63 = vpop.xlane.xlu0 %2533 }
 0x370   :  { %4611 = vpow2.f32 %v2574_v54 }
 0x371   :  { %4613 = vpow2.f32 %v1899_v14  ;;  %v2584_v4 = vmul.f32 1.442695, %v2559_v20 }
 0x372   :  { %1941 = vadd.xlane.f32.xlu0 %v1940_v48  ;;  %v6159_v59 = vpop.eup %4599  ;;  %v1903_v48 = vmul.f32 1.442695, %v1873_v44  ;;  %v2528_v56 = vpop.xlane.xlu1 %2527  ;;  %4615 = vpow2.f32 %v2580_v19 }
 0x373   :  { %6874 = vst [vmem:[#allocation42_spill] sm:$0xff] %v6159_v59  ;;  %v6164_v60 = vpop.eup %4601  ;;  %v2607_v34 = vsel %vm460_vm13, %v6159_v59, 0.0  ;;  %v2558_v13 = vsub.f32 %v5791_v30, %v2528_v56 }
 0x374   :  { %v1934_v21 = vsel %vm460_vm13, %v6164_v60, 0.0  ;;  %4617 = vpow2.f32 %v1903_v48 }
 0x375   :  { %4619 = vpow2.f32 %v2588_v57  ;;  %v2543_v57 = vpop.xlane.xlu0 %2542 }
 0x376   :  { %1953 = vadd.xlane.f32.xlu0 %v1952_v50  ;;  %v6170_v49 = vpop.eup %4603  ;;  %v2566_v50 = vmul.f32 1.442695, %v2550_v53  ;;  %v6185_v6 = vpop.xlane.xlu1 %2548  ;;  %v2563_v20 = vsub.f32 %v5874_v8, %v2543_v57 }
 0x377   :  { %v6174_v41 = vpop.eup %4605  ;;  %v2604_v3 = vsel %vm460_vm13, %v6170_v49, 0.0 }
 0x378   :  { %v6180_v27 = vpop.eup %4607  ;;  %v1937_v7 = vsel %vm460_vm13, %v6174_v41, 0.0  ;;  %4621 = vpow2.f32 %v2566_v50  ;;  %v2582_v50 = vmul.f32 1.442695, %v2558_v13 }
 0x379   :  { %6875 = vst [vmem:[#allocation45_spill] sm:$0xff] %v6180_v27  ;;  %v6183_v40 = vpop.eup %4609  ;;  %v2613_v37 = vsel %vm460_vm13, %v6180_v27, 0.0 }
 0x37a   :  { %2602 = vadd.xlane.f32.xlu0 %v2601_v16  ;;  %v6191_v54 = vpop.eup %4611  ;;  %v2578_v16 = vmul.f32 1.442695, %v2556_v38  ;;  %v1946_v44 = vsel %vm460_vm13, %v6183_v40, 0.0 }
 0x37b   :  { %6876 = vst [vmem:[#allocation43_spill] sm:$0xff] %v6191_v54  ;;  %v6194_v46 = vpop.eup %4613  ;;  %v2610_v14 = vsel %vm460_vm13, %v6191_v54, 0.0 }
 0x37c   :  { %v6200_v19 = vpop.eup %4615  ;;  %4623 = vpow2.f32 %v2578_v16  ;;  %v1943_v48 = vsel %vm460_vm13, %v6194_v46, 0.0  ;;  %v2540_v16 = vpop.xlane.xlu0 %2539 }
 0x37d   :  { %6877 = vst [vmem:[#allocation47_spill] sm:$0xff] %v6200_v19  ;;  %4625 = vpow2.f32 %v2584_v4  ;;  %v2592_v4 = vmul.f32 1.442695, %v2563_v20 }
 0x37e   :  { %2608 = vadd.xlane.f32.xlu0 %v2607_v34  ;;  %1908 = vadd.xlane.f32.xlu1 %v1907_v11  ;;  %v2546_v34 = vpop.xlane.xlu1 %2545  ;;  %v6203_v39 = vpop.eup %4617  ;;  %v2619_v11 = vsel %vm460_vm13, %v6200_v19, 0.0 }
 0x37f   :  { %v6209_v53 = vpop.eup %4619  ;;  %v1949_v56 = vsel %vm460_vm13, %v6203_v39, 0.0 }
 0x380   :  { %6878 = vst [vmem:[#allocation40_spill] sm:$0xff] %v6209_v53  ;;  %v2631_v30 = vsel %vm460_vm13, %v6209_v53, 0.0 }
 0x382   :  { %2605 = vadd.xlane.f32.xlu0 %v2604_v3  ;;  %1935 = vadd.xlane.f32.xlu1 %v1934_v21  ;;  %v2560_v21 = vsub.f32 %v5807_v32, %v2534_v63  ;;  %v6216_v38 = vpop.eup %4621 }
 0x383   :  { %v2598_v32 = vsel %vm460_vm13, %v6216_v38, 0.0 }
 0x386   :  { %2614 = vadd.xlane.f32.xlu0 %v2613_v37  ;;  %1938 = vadd.xlane.f32.xlu1 %v1937_v7  ;;  %v2586_v7 = vmul.f32 1.442695, %v2560_v21  ;;  %v6221_v63 = vpop.eup %4623  ;;  %v2564_v21 = vsub.f32 %v5892_v25, %v2546_v34 }
 0x387   :  { %6879 = vst [vmem:[#allocation49_spill] sm:$0xff] %v6221_v63  ;;  %v6224_v13 = vpop.eup %4625  ;;  %v2616_v8 = vsel %vm460_vm13, %v6221_v63, 0.0 }
 0x388   :  { %6880 = vst [vmem:[#allocation44_spill] sm:$0xff] %v6224_v13  ;;  %v2594_v20 = vmul.f32 1.442695, %v2564_v21 }
 0x38a   :  { %2611 = vadd.xlane.f32.xlu0 %v2610_v14  ;;  %1947 = vadd.xlane.f32.xlu1 %v1946_v44  ;;  %v2562_v14 = vsub.f32 %v5822_v42, %v2540_v16  ;;  %v2625_v42 = vsel %vm460_vm13, %v6224_v13, 0.0 }
 0x38c   :  { %v2590_v57 = vmul.f32 1.442695, %v2562_v14 }
 0x38e   :  { %2620 = vadd.xlane.f32.xlu0 %v2619_v11  ;;  %1944 = vadd.xlane.f32.xlu1 %v1943_v48  ;;  %v6228_v48 = vpop.xlane.xlu0 %561 }
 0x38f   :  { %v1012_v3 = vpop.xlane.xlu1 %1011 }
 0x390   :  { %4627 = vrcp.f32 %v1012_v3 }
 0x391   :  { %4629 = vpow2.f32 %v2582_v50 }
 0x392   :  { %2632 = vadd.xlane.f32.xlu0 %v2631_v30  ;;  %1950 = vadd.xlane.f32.xlu1 %v1949_v56 }
 0x393   :  { %v1009_v37 = vpop.xlane.xlu1 %1008 }
 0x394   :  { %4631 = vrcp.f32 %v1009_v37 }
 0x395   :  { %4633 = vpow2.f32 %v2586_v7 }
 0x396   :  { %2599 = vadd.xlane.f32.xlu1 %v2598_v32  ;;  %v6235_v32 = vpop.xlane.xlu0 %558 }
 0x397   :  { %v1018_v44 = vpop.xlane.xlu1 %1017 }
 0x398   :  { %4635 = vrcp.f32 %v1018_v44 }
 0x399   :  { %4637 = vpow2.f32 %v2592_v4 }
 0x39a   :  { %v4628_v11 = vpop.eup %4627  ;;  %2617 = vadd.xlane.f32.xlu1 %v2616_v8  ;;  %4639 = vpow2.f32 %v2590_v57  ;;  %v6241_v13 = vpop.xlane.xlu0 %567  ;;  %v6883_v57 = vld [vmem:[#allocation10_spill] sm:$0xff] }
 0x39b   :  { %v1072_v50 = vmul.f32 %v4628_v11, %v1012_v3  ;;  %v6233_v30 = vpop.eup %4629  ;;  %v4449_v21 = vunpack.i.l.bf16 %v6883_v57 }
 0x39c   :  { %6881 = vst [vmem:[#allocation52_spill] sm:$0xff] %v6233_v30  ;;  %v2622_v25 = vsel %vm460_vm13, %v6233_v30, 0.0 }
 0x39d   :  { %v1088_v16 = vsub.f32 2.0, %v1072_v50 }
 0x39e   :  { %2626 = vadd.xlane.f32.xlu1 %v2625_v42  ;;  %v1015_v56 = vpop.xlane.xlu1 %1014  ;;  %v4632_v7 = vpop.eup %4631 }
 0x39f   :  { %v1071_v53 = vmul.f32 %v4632_v7, %v1009_v37  ;;  %4641 = vrcp.f32 %v1015_v56  ;;  %v6239_v34 = vpop.eup %4633  ;;  %v1104_v8 = vmul.f32 %v4628_v11, %v1088_v16  ;;  %v6887_v16 = vld [vmem:[#allocation13_spill] sm:$0xff] }
 0x3a0   :  { %6882 = vst [vmem:[#allocation46_spill] sm:$0xff] %v6239_v34  ;;  %4643 = vpow2.f32 %v2594_v20  ;;  %v2628_v37 = vsel %vm460_vm13, %v6239_v34, 0.0  ;;  %v6889_v34 = vld [vmem:[#allocation18_spill] sm:$0xff] }
 0x3a1   :  { %v1087_v3 = vsub.f32 2.0, %v1071_v53  ;;  %v1120_v11 = vmul.f32 %v5909_v2, %v1104_v8  ;;  %v4455_v63 = vunpack.i.h.bf16 %v6889_v34 }
 0x3a2   :  { %2623 = vadd.xlane.f32.xlu1 %v2622_v25  ;;  %v1024_v14 = vpop.xlane.xlu1 %1023  ;;  %v4636_v4 = vpop.eup %4635  ;;  %v6885_v25 = vld [vmem:[#allocation17_spill] sm:$0xff] }
 0x3a3   :  { %v1103_v42 = vmul.f32 %v4632_v7, %v1087_v3  ;;  %4645 = vrcp.f32 %v1024_v14  ;;  %v6246_v50 = vpop.eup %4637  ;;  %v1074_v19 = vmul.f32 %v4636_v4, %v1018_v44  ;;  %v4445_v20 = vunpack.i.h.bf16 %v6885_v25  ;;  %v6886_v7 = vld [vmem:[#allocation14_spill] sm:$0xff] }
 0x3a4   :  { %6884 = vst [vmem:[#allocation48_spill] sm:$0xff] %v6246_v50  ;;  %v6888_v3 = vpack.i.bf16 %v6886_v7, %v6887_v16  ;;  %v6258_v57 = vpop.eup %4639  ;;  %v4490_v16 = vunpack.i.h.bf16 %v5896_v45 }
 0x3a5   :  { %v1119_v30 = vmul.f32 %v5917_v55, %v1103_v42  ;;  %v4454_v55 = vunpack.i.l.bf16 %v6889_v34  ;;  %v4233_v44 = vpack.c.bf16 %v4449_v21, %v4445_v20  ;;  %v2637_v42 = vsel %vm460_vm13, %v6246_v50, 0.0 }
 0x3a6   :  { %2629 = vadd.xlane.f32.xlu1 %v2628_v37  ;;  %v6249_v53 = vpop.xlane.xlu1 %573  ;;  %v1090_v8 = vsub.f32 2.0, %v1074_v19  ;;  %v6890_v37 = vld [vmem:[#allocation32_spill] sm:$0xff]  ;;  %v4489_v34 = vunpack.i.l.bf16 %v5896_v45  ;;  %v2634_v19 = vsel %vm460_vm13, %v6258_v57, 0.0 }
 0x3a7   :  { %3877 = vmatprep.mubr.msk.f32.mxu1 %vm460_vm13, %v1119_v30  ;;  %v6265_v30 = vpop.xlane.xlu0 %564  ;;  %v4237_v20 = vpack.c.bf16 %v4455_v63, %v4454_v55  ;;  %v2565_v63 = vsub.f32 %v5887_v10, %v6185_v6 }
 0x3a8   :  { %4502 = vrot.lane.b32.xlu0 %v6888_v3, %s4769_s7  ;;  %3878 = vmatmul.mubr.msk.f32.vlgmr.msra.gmra.mrb[16].mxu1 %vm460_vm13, %v1120_v11  ;;  %v1106_v50 = vmul.f32 %v4636_v4, %v1090_v8  ;;  %v4241_v45 = vpack.c.bf16 %v4490_v16, %v4489_v34 }
 0x3a9   :  { %v4642_v2 = vpop.eup %4641  ;;  %4232 = vmatpush3.bf16.msra.mxu1 %v6890_v37  ;;  %v2596_v6 = vmul.f32 1.442695, %v2565_v63 }
 0x3aa   :  { %2638 = vadd.xlane.f32.xlu1 %v2637_v42  ;;  %v1021_v25 = vpop.xlane.xlu1 %1020  ;;  %v1073_v7 = vmul.f32 %v4642_v2, %v1015_v56  ;;  %4234 = vmatprep.subr.bf16.mxu1 %v4233_v44  ;;  %v6270_v11 = vpop.eup %4643  ;;  %v6891_v56 = vld [vmem:[#allocation19_spill] sm:$0xff] }
 0x3ab   :  { %4647 = vrcp.f32 %v1021_v25  ;;  %v4460_v27 = vunpack.i.h.bf16 %v6891_v56  ;;  %v4459_v54 = vunpack.i.l.bf16 %v6891_v56  ;;  %v6276_v59 = vpop.xlane.xlu0 %570  ;;  %v2640_v4 = vsel %vm460_vm13, %v6270_v11, 0.0 }
 0x3ac   :  { %v1089_v21 = vsub.f32 2.0, %v1073_v7 }
 0x3ad   :  { %v4646_v3 = vpop.eup %4645  ;;  %4236 = vmatpush3.bf16.msra.mxu1 %v4233_v44  ;;  %v1122_v44 = vmul.f32 %v5926_v43, %v1106_v50 }
 0x3ae   :  { %2635 = vadd.xlane.f32.xlu1 %v2634_v19  ;;  %v1030_v42 = vpop.xlane.xlu1 %1029  ;;  %v1105_v37 = vmul.f32 %v4642_v2, %v1089_v21  ;;  %4238 = vmatprep.subr.bf16.mxu1 %v4237_v20  ;;  %v1076_v7 = vmul.f32 %v4646_v3, %v1024_v14  ;;  %v6290_v14 = vpack.c.bf16 %v4460_v27, %v4459_v54 }
 0x3af   :  { %4649 = vrcp.f32 %v1030_v42  ;;  %v6287_v8 = vpop.xlane.xlu0 %576 }
 0x3b0   :  { %v1121_v55 = vmul.f32 %v5940_v0, %v1105_v37  ;;  %v1092_v0 = vsub.f32 2.0, %v1076_v7 }
 0x3b1   :  { %4240 = vmatpush3.bf16.msra.mxu1 %v4237_v20 }
 0x3b2   :  { %2641 = vadd.xlane.f32.xlu1 %v2640_v4  ;;  %v6284_v2 = vpop.xlane.xlu1 %579  ;;  %4242 = vmatprep.subr.bf16.mxu1 %v4241_v45  ;;  %v1108_v50 = vmul.f32 %v4646_v3, %v1092_v0 }
 0x3b3   :  { %3880 = vmatprep.mubr.msk.f32.mxu1 %vm460_vm13, %v1121_v55  ;;  %v6293_v19 = vpop.xlane.xlu0 %585 }
 0x3b4   :  { %3881 = vmatmul.mubr.msk.f32.gmra.mrb[18].mxu1 %vm460_vm13, %v1122_v44  ;;  %v1124_v27 = vmul.f32 %v5950_v51, %v1108_v50  ;;  %v6894_v51 = vld [vmem:[#allocation15_spill] sm:$0xff] }
 0x3b5   :  { %v4648_v10 = vpop.eup %4647  ;;  %4244 = vmatpush3.bf16.msra.mxu1 %v4241_v45 }
 0x3b6   :  { %v1075_v16 = vmul.f32 %v4648_v10, %v1021_v25  ;;  %v1027_v34 = vpop.xlane.xlu1 %1026  ;;  %4270 = vmatprep.subr.bf16.mxu1 %v6290_v14 }
 0x3b7   :  { %4651 = vrcp.f32 %v1027_v34  ;;  %v6297_v25 = vpop.xlane.xlu0 %582 }
 0x3b8   :  { %v1091_v43 = vsub.f32 2.0, %v1075_v16  ;;  %4653 = vpow2.f32 %v2596_v6 }
 0x3b9   :  { %v4650_v21 = vpop.eup %4649 }
 0x3ba   :  { %v1107_v20 = vmul.f32 %v4648_v10, %v1091_v43  ;;  %v1036_v37 = vpop.xlane.xlu1 %1035  ;;  %v1078_v54 = vmul.f32 %v4650_v21, %v1030_v42 }
 0x3bb   :  { %4655 = vrcp.f32 %v1036_v37 }
 0x3bc   :  { %v1123_v56 = vmul.f32 %v5964_v62, %v1107_v20  ;;  %v1094_v63 = vsub.f32 2.0, %v1078_v54  ;;  %v6893_v62 = vld [vmem:[#allocation16_spill] sm:$0xff] }
 0x3bd   :  { %v6895_v42 = vpack.i.bf16 %v6893_v62, %v6894_v51  ;;  %v6897_v62 = vld [vmem:[#allocation2_spill] sm:$0xff] }
 0x3be   :  { %3883 = vmatprep.mubr.msk.f32.mxu1 %vm460_vm13, %v1123_v56  ;;  %v1033_v45 = vpop.xlane.xlu1 %1032  ;;  %v1110_v0 = vmul.f32 %v4650_v21, %v1094_v63  ;;  %v6896_v56 = vld [vmem:[#allocation3_spill] sm:$0xff] }
 0x3bf   :  { %4657 = vrcp.f32 %v1033_v45  ;;  %3884 = vmatmul.mubr.msk.f32.gmra.mrb[20].mxu1 %vm460_vm13, %v1124_v27 }
 0x3c0   :  { %v1126_v21 = vmul.f32 %v5972_v5, %v1110_v0 }
 0x3c1   :  { %v4652_v3 = vpop.eup %4651 }
 0x3c2   :  { %v1077_v55 = vmul.f32 %v4652_v3, %v1027_v34  ;;  %v1042_v4 = vpop.xlane.xlu1 %1041  ;;  %v6303_v44 = vpop.eup %4653 }
 0x3c3   :  { %v6301_v7 = vpop.xlane.xlu0 %588  ;;  %6892 = vst [vmem:[#allocation12_spill] sm:$0xff] %v6303_v44  ;;  %4507 = vrot.lane.b32.xlu1 %v6895_v42, %s4769_s7  ;;  %4659 = vrcp.f32 %v1042_v4  ;;  %v2643_v34 = vsel %vm460_vm13, %v6303_v44, 0.0  ;;  %v6902_v44 = vld [vmem:[#allocation6_spill] sm:$0xff] }
 0x3c4   :  { %v1093_v10 = vsub.f32 2.0, %v1077_v55 }
 0x3c5   :  { %v4656_v6 = vpop.eup %4655 }
 0x3c6   :  { %v1109_v16 = vmul.f32 %v4652_v3, %v1093_v10  ;;  %v1080_v43 = vmul.f32 %v4656_v6, %v1036_v37  ;;  %v6313_v20 = vpop.xlane.xlu1 %591 }
 0x3c7   :  { %v6309_v50 = vpop.xlane.xlu0 %597  ;;  %2644 = vadd.xlane.f32.xlu0 %v2643_v34  ;;  %3260 = vrot.lane.b32.xlu1 %v6896_v56, %s4770_s2 }
 0x3c8   :  { %v1125_v27 = vmul.f32 %v5989_v61, %v1109_v16  ;;  %v1096_v63 = vsub.f32 2.0, %v1080_v43 }
 0x3c9   :  { %v4658_v54 = vpop.eup %4657 }
 0x3ca   :  { %v1079_v3 = vmul.f32 %v4658_v54, %v1033_v45  ;;  %3886 = vmatprep.mubr.msk.f32.mxu1 %vm460_vm13, %v1125_v27  ;;  %v1039_v55 = vpop.xlane.xlu1 %1038  ;;  %v1112_v42 = vmul.f32 %v4656_v6, %v1096_v63  ;;  %v6898_v45 = vld [vmem:[#allocation5_spill] sm:$0xff]  ;;  %v6899_v27 = vld [vmem:[#allocation4_spill] sm:$0xff] }
 0x3cb   :  { %v1045_v37 = vpop.xlane.xlu0 %1044  ;;  %3262 = vrot.lane.b32.xlu1 %v6897_v62, %s4770_s2  ;;  %3887 = vmatmul.mubr.msk.f32.gmra.mrb[22].mxu1 %vm460_vm13, %v1126_v21 }
 0x3cc   :  { %4661 = vrcp.f32 %v1045_v37  ;;  %v1095_v51 = vsub.f32 2.0, %v1079_v3  ;;  %v1128_v43 = vmul.f32 %v5999_v9, %v1112_v42  ;;  %v6900_v3 = vld [vmem:[#allocation7_spill] sm:$0xff] }
 0x3cd   :  { %4663 = vrcp.f32 %v1039_v55  ;;  %v4660_v5 = vpop.eup %4659 }
 0x3ce   :  { %v1111_v10 = vmul.f32 %v4658_v54, %v1095_v51  ;;  %v1048_v16 = vpop.xlane.xlu1 %1047  ;;  %4665 = vrcp.f32 %v6235_v32  ;;  %v1082_v34 = vmul.f32 %v4660_v5, %v1042_v4 }
 0x3cf   :  { %v6323_v61 = vpop.xlane.xlu0 %594  ;;  %3264 = vrot.lane.b32.xlu1 %v6898_v45, %s4770_s2  ;;  %4667 = vrcp.f32 %v1048_v16 }
 0x3d0   :  { %v1127_v0 = vmul.f32 %v6010_v12, %v1111_v10  ;;  %4669 = vrcp.f32 %v6228_v48  ;;  %v1098_v21 = vsub.f32 2.0, %v1082_v34 }
 0x3d2   :  { %3889 = vmatprep.mubr.msk.f32.mxu1 %vm460_vm13, %v1127_v0  ;;  %v1054_v56 = vpop.xlane.xlu1 %1053  ;;  %v1114_v0 = vmul.f32 %v4660_v5, %v1098_v21 }
 0x3d3   :  { %v6332_v6 = vpop.xlane.xlu0 %603  ;;  %3266 = vrot.lane.b32.xlu1 %v6899_v27, %s4770_s2  ;;  %3890 = vmatmul.mubr.msk.f32.gmra.mrb[24].mxu1 %vm460_vm13, %v1128_v43  ;;  %4671 = vrcp.f32 %v1054_v56 }
 0x3d4   :  { %4673 = vrcp.f32 %v6265_v30 }
 0x3d6   :  { %v4662_v54 = vpop.eup %4661  ;;  %v1051_v4 = vpop.xlane.xlu1 %1050 }
 0x3d7   :  { %v4664_v12 = vpop.eup %4663  ;;  %v1083_v9 = vmul.f32 %v4662_v54, %v1045_v37  ;;  %4675 = vrcp.f32 %v1051_v4  ;;  %3268 = vrot.lane.b32.xlu1 %v6900_v3, %s4770_s2  ;;  %v6342_v10 = vpop.xlane.xlu0 %600 }
 0x3d8   :  { %v1081_v63 = vmul.f32 %v4664_v12, %v1039_v55  ;;  %4677 = vrcp.f32 %v6241_v13  ;;  %v4666_v51 = vpop.eup %4665  ;;  %v6901_v55 = vld [vmem:[#allocation9_spill] sm:$0xff] }
 0x3d9   :  { %v1099_v62 = vsub.f32 2.0, %v1083_v9  ;;  %4679 = vrcp.f32 %v6276_v59  ;;  %v4668_v45 = vpop.eup %4667  ;;  %v621_v27 = vmul.f32 %v4666_v51, %v6235_v32 }
 0x3da   :  { %v1097_v42 = vsub.f32 2.0, %v1081_v63  ;;  %v1084_v37 = vmul.f32 %v4668_v45, %v1048_v16  ;;  %4681 = vrcp.f32 %v6249_v53  ;;  %v4670_v3 = vpop.eup %4669 }
 0x3db   :  { %v1115_v43 = vmul.f32 %v4662_v54, %v1099_v62  ;;  %3272 = vrot.lane.b32.xlu1 %v6901_v55, %s4770_s2  ;;  %4683 = vrcp.f32 %v6287_v8  ;;  %v1130_v54 = vmul.f32 %v6016_v17, %v1114_v0  ;;  %v6354_v32 = vpop.xlane.xlu0 %1911 }
 0x3dc   :  { %v1113_v34 = vmul.f32 %v4664_v12, %v1097_v42  ;;  %v1100_v63 = vsub.f32 2.0, %v1084_v37  ;;  %v6903_v42 = vld [vmem:[#allocation8_spill] sm:$0xff]  ;;  %4685 = vrcp.f32 %v6284_v2 }
 0x3dd   :  { %3270 = vrot.lane.b32.xlu0 %v6902_v44, %s4770_s2  ;;  %v4672_v5 = vpop.eup %4671  ;;  %v1131_v12 = vmul.f32 %v6040_v31, %v1115_v43  ;;  %4687 = vrcp.f32 %v6297_v25 }
 0x3de   :  { %v1129_v9 = vmul.f32 %v6034_v33, %v1113_v34  ;;  %v4674_v16 = vpop.eup %4673  ;;  %v1116_v21 = vmul.f32 %v4668_v45, %v1100_v63  ;;  %v1086_v62 = vmul.f32 %v4672_v5, %v1054_v56  ;;  %v622_v33 = vmul.f32 %v4670_v3, %v6228_v48 }
 0x3df   :  { %3274 = vrot.lane.b32.xlu1 %v6903_v42, %s4770_s2  ;;  %v637_v34 = vsub.f32 2.0, %v621_v27  ;;  %v623_v45 = vmul.f32 %v4674_v16, %v6265_v30  ;;  %4689 = vrcp.f32 %v6293_v19 }
 0x3e0   :  { %3892 = vmatprep.mubr.msk.f32.mxu1 %vm460_vm13, %v1129_v9  ;;  %v1132_v31 = vmul.f32 %v6043_v29, %v1116_v21  ;;  %v1102_v44 = vsub.f32 2.0, %v1086_v62  ;;  %v638_v48 = vsub.f32 2.0, %v622_v33  ;;  %4691 = vrcp.f32 %v6301_v7 }
 0x3e1   :  { %3893 = vmatmul.mubr.msk.f32.gmra.mrb[26].mxu1 %vm460_vm13, %v1130_v54  ;;  %v4676_v17 = vpop.eup %4675  ;;  %v653_v55 = vmul.f32 %v4666_v51, %v637_v34  ;;  %v639_v54 = vsub.f32 2.0, %v623_v45  ;;  %4693 = vrcp.f32 %v6313_v20  ;;  %v6905_v45 = vld [vmem:[#allocation20_spill] sm:$0xff] }
 0x3e2   :  { %3895 = vmatprep.mubr.msk.f32.mxu1 %vm460_vm13, %v1131_v12  ;;  %v4678_v56 = vpop.eup %4677  ;;  %v1085_v0 = vmul.f32 %v4676_v17, %v1051_v4  ;;  %v1118_v29 = vmul.f32 %v4672_v5, %v1102_v44  ;;  %v654_v62 = vmul.f32 %v4670_v3, %v638_v48  ;;  %4695 = vrcp.f32 %v6323_v61  ;;  %v6904_v5 = vld [vmem:[#allocation39_spill] sm:$0xff] }
 0x3e3   :  { %v4680_v43 = vpop.eup %4679  ;;  %v6366_v37 = vpop.xlane.xlu0 %1917  ;;  %v624_v9 = vmul.f32 %v4678_v56, %v6241_v13  ;;  %v669_v51 = vmul.f32 %v5919_v28, %v653_v55  ;;  %v2984_v3 = vld [vmem:[%s6688_s3 + $0x28] sm:$0xff]  ;;  %v4464_v48 = vunpack.i.l.bf16 %v6905_v45  ;;  %4697 = vrcp.f32 %v6309_v50 }
 0x3e4   :  { %v1101_v27 = vsub.f32 2.0, %v1085_v0  ;;  %v4682_v63 = vpop.eup %4681  ;;  %v625_v30 = vmul.f32 %v4680_v43, %v6276_v59  ;;  %v1134_v34 = vmul.f32 %v6904_v5, %v1118_v29  ;;  %v2983_v59 = vld [vmem:[%s6688_s3 + $0x20] sm:$0xff]  ;;  %v4465_v0 = vunpack.i.h.bf16 %v6905_v45 }
 0x3e5   :  { %3896 = vmatmul.mubr.msk.f32.gmra.mrb[28].mxu1 %vm460_vm13, %v1132_v31  ;;  %v4684_v12 = vpop.eup %4683  ;;  %v640_v33 = vsub.f32 2.0, %v624_v9  ;;  %v626_v13 = vmul.f32 %v4682_v63, %v6249_v53  ;;  %v4325_v53 = vpack.c.bf16 %v2984_v3, %v2983_v59  ;;  %4699 = vrcp.f32 %v6342_v10  ;;  %v6908_v59 = vld [vmem:[#allocation22_spill] sm:$0xff] }
 0x3e6   :  { %v1117_v4 = vmul.f32 %v4676_v17, %v1101_v27  ;;  %v4686_v28 = vpop.eup %4685  ;;  %v655_v17 = vmul.f32 %v4674_v16, %v639_v54  ;;  %v641_v31 = vsub.f32 2.0, %v625_v30  ;;  %v6906_v27 = vld [vmem:[#allocation21_spill] sm:$0xff]  ;;  %v6907_v30 = vld [vmem:[#allocation26_spill] sm:$0xff]  ;;  %v4470_v3 = vunpack.i.h.bf16 %v6908_v59 }
 0x3e7   :  { %v6373_v21 = vpop.xlane.xlu0 %1914  ;;  %v4688_v44 = vpop.eup %4687  ;;  %v670_v9 = vmul.f32 %v6906_v27, %v654_v62  ;;  %4326 = vmatprep.subr.bf16.mxu0 %v4325_v53  ;;  %v642_v16 = vsub.f32 2.0, %v626_v13  ;;  %v628_v29 = vmul.f32 %v4686_v28, %v6284_v2  ;;  %v4273_v2 = vpack.c.bf16 %v4465_v0, %v4464_v48 }
 0x3e8   :  { %v1133_v42 = vmul.f32 %v6070_v15, %v1117_v4  ;;  %v627_v15 = vmul.f32 %v4684_v12, %v6287_v8  ;;  %v656_v8 = vmul.f32 %v4678_v56, %v640_v33  ;;  %4328 = vmatpush3.bf16.msra.mxu0 %v4325_v53  ;;  %v671_v4 = vmul.f32 %v6907_v30, %v655_v17  ;;  %v6909_v56 = vld [vmem:[#allocation23_spill] sm:$0xff] }
 0x3e9   :  { %v4690_v54 = vpop.eup %4689  ;;  %4701 = vrcp.f32 %v6332_v6  ;;  %v658_v33 = vmul.f32 %v4682_v63, %v642_v16  ;;  %v644_v13 = vsub.f32 2.0, %v628_v29 }
 0x3ea   :  { %3898 = vmatprep.mubr.msk.f32.mxu1 %vm460_vm13, %v1133_v42  ;;  %v657_v42 = vmul.f32 %v4680_v43, %v641_v31  ;;  %v643_v5 = vsub.f32 2.0, %v627_v15  ;;  %v4692_v62 = vpop.eup %4691  ;;  %v672_v43 = vmul.f32 %v6909_v56, %v656_v8  ;;  %v6910_v31 = vld [vmem:[#allocation27_spill] sm:$0xff]  ;;  %4703 = vrcp.f32 %v6354_v32 }
 0x3eb   :  { %v6391_v55 = vpop.xlane.xlu0 %1923  ;;  %3899 = vmatmul.mubr.msk.f32.gmra.mrb[30].mxu1 %vm460_vm13, %v1134_v34  ;;  %v629_v34 = vmul.f32 %v4688_v44, %v6297_v25  ;;  %v630_v25 = vmul.f32 %v4690_v54, %v6293_v19  ;;  %v4694_v17 = vpop.eup %4693  ;;  %v631_v0 = vmul.f32 %v4692_v62, %v6301_v7  ;;  %v6912_v19 = vld [vmem:[#allocation28_spill] sm:$0xff]  ;;  %4705 = vrcp.f32 %v6373_v21 }
 0x3ec   :  { %3917 = vmatprep.mubr.msk.f32.mxu1 %vm460_vm13, %v669_v51  ;;  %v4469_v51 = vunpack.i.l.bf16 %v6908_v59  ;;  %v673_v15 = vmul.f32 %v6910_v31, %v657_v42  ;;  %v659_v53 = vmul.f32 %v4684_v12, %v643_v5  ;;  %v4696_v48 = vpop.eup %4695  ;;  %v674_v8 = vmul.f32 %v6912_v19, %v658_v33  ;;  %v6913_v42 = vld [vmem:[#allocation24_spill] sm:$0xff]  ;;  %v6915_v33 = vld [vmem:[#allocation33_spill] sm:$0xff] }
 0x3ed   :  { %v645_v27 = vsub.f32 2.0, %v629_v34  ;;  %v646_v16 = vsub.f32 2.0, %v630_v25  ;;  %v660_v12 = vmul.f32 %v4686_v28, %v644_v13  ;;  %v632_v29 = vmul.f32 %v4694_v17, %v6313_v20  ;;  %v4698_v7 = vpop.eup %4697 }
 0x3ee   :  { %v4277_v63 = vpack.c.bf16 %v4470_v3, %v4469_v51  ;;  %v675_v5 = vmul.f32 %v6913_v42, %v659_v53  ;;  %v647_v59 = vsub.f32 2.0, %v631_v0  ;;  %v633_v56 = vmul.f32 %v4696_v48, %v6323_v61 }
 0x3ef   :  { %v6403_v45 = vpop.xlane.xlu0 %1920  ;;  %3918 = vmatmul.mubr.msk.f32.vlgmr.msra.gmra.mrb[16].mxu1 %vm460_vm13, %v670_v9  ;;  %v6911_v9 = vld [vmem:[#allocation53_spill] sm:$0xff]  ;;  %v661_v34 = vmul.f32 %v4688_v44, %v645_v27  ;;  %v4700_v31 = vpop.eup %4699  ;;  %v662_v20 = vmul.f32 %v4690_v54, %v646_v16  ;;  %v676_v25 = vmul.f32 %v6915_v33, %v660_v12  ;;  %v634_v44 = vmul.f32 %v4698_v7, %v6309_v50  ;;  %v6917_v54 = vld [vmem:[#allocation30_spill] sm:$0xff] }
 0x3f0   :  { %4272 = vmatpush3.bf16.msra.mxu1 %v6290_v14  ;;  %3920 = vmatprep.mubr.msk.f32.mxu1 %vm460_vm13, %v671_v4  ;;  %v4495_v30 = vunpack.i.h.bf16 %v6911_v9  ;;  %v4494_v14 = vunpack.i.l.bf16 %v6911_v9  ;;  %v648_v13 = vsub.f32 2.0, %v632_v29  ;;  %v663_v27 = vmul.f32 %v4692_v62, %v647_v59  ;;  %v6918_v62 = vld [vmem:[#allocation29_spill] sm:$0xff] }
 0x3f1   :  { %4274 = vmatprep.subr.bf16.mxu1 %v4273_v2  ;;  %v649_v0 = vsub.f32 2.0, %v633_v56  ;;  %v635_v9 = vmul.f32 %v4700_v31, %v6342_v10  ;;  %v678_v50 = vmul.f32 %v6917_v54, %v662_v20  ;;  %v6920_v56 = vld [vmem:[#allocation35_spill] sm:$0xff]  ;;  %4707 = vrcp.f32 %v6366_v37 }
 0x3f2   :  { %v4281_v28 = vpack.c.bf16 %v4495_v30, %v4494_v14  ;;  %v650_v14 = vsub.f32 2.0, %v634_v44  ;;  %v679_v16 = vmul.f32 %v6918_v62, %v663_v27  ;;  %4709 = vrcp.f32 %v6403_v45 }
 0x3f3   :  { %v6415_v4 = vpop.xlane.xlu0 %1929  ;;  %3921 = vmatmul.mubr.msk.f32.gmra.mrb[18].mxu1 %vm460_vm13, %v672_v43  ;;  %v6914_v43 = vld [vmem:[#allocation25_spill] sm:$0xff]  ;;  %v4702_v61 = vpop.eup %4701  ;;  %v665_v10 = vmul.f32 %v4696_v48, %v649_v0  ;;  %v651_v12 = vsub.f32 2.0, %v635_v9  ;;  %v6921_v48 = vld [vmem:[#allocation31_spill] sm:$0xff]  ;;  %4711 = vrcp.f32 %v6391_v55 }
 0x3f4   :  { %4276 = vmatpush3.bf16.msra.mxu1 %v4273_v2  ;;  %3923 = vmatprep.mubr.msk.f32.mxu1 %vm460_vm13, %v673_v15  ;;  %v4475_v3 = vunpack.i.h.bf16 %v6914_v43  ;;  %v4474_v51 = vunpack.i.l.bf16 %v6914_v43  ;;  %v6916_v15 = vld [vmem:[#allocation34_spill] sm:$0xff]  ;;  %v666_v42 = vmul.f32 %v4698_v7, %v650_v14  ;;  %v6456_v7 = vpop.permute.xlu1 %4497 }
 0x3f5   :  { %4278 = vmatprep.subr.bf16.mxu1 %v4277_v63  ;;  %v677_v53 = vmul.f32 %v6916_v15, %v661_v34  ;;  %v667_v43 = vmul.f32 %v4700_v31, %v651_v12  ;;  %v6922_v31 = vld [vmem:[#allocation38_spill] sm:$0xff] }
 0x3f6   :  { %v6436_v30 = vpack.c.bf16 %v4475_v3, %v4474_v51  ;;  %v682_v3 = vmul.f32 %v6921_v48, %v666_v42 }
 0x3f7   :  { %v6425_v2 = vpop.xlane.xlu0 %1926  ;;  %3924 = vmatmul.mubr.msk.f32.gmra.mrb[20].mxu1 %vm460_vm13, %v674_v8  ;;  %v636_v8 = vmul.f32 %v4702_v61, %v6332_v6 }
 0x3f8   :  { %4280 = vmatpush3.bf16.msra.mxu1 %v4277_v63  ;;  %3926 = vmatprep.mubr.msk.f32.mxu1 %vm460_vm13, %v675_v5  ;;  %v664_v63 = vmul.f32 %v4694_v17, %v648_v13  ;;  %v6919_v5 = vld [vmem:[#allocation36_spill] sm:$0xff]  ;;  %v681_v17 = vmul.f32 %v6920_v56, %v665_v10 }
 0x3f9   :  { %4282 = vmatprep.subr.bf16.mxu1 %v4281_v28  ;;  %v652_v59 = vsub.f32 2.0, %v636_v8 }
 0x3fa   :  { %v680_v34 = vmul.f32 %v6919_v5, %v664_v63 }
 0x3fb   :  { %v6433_v19 = vpop.xlane.xlu0 %1932  ;;  %3927 = vmatmul.mubr.msk.f32.gmra.mrb[22].mxu1 %vm460_vm13, %v676_v25  ;;  %v668_v51 = vmul.f32 %v4702_v61, %v652_v59  ;;  %v4704_v61 = vpop.eup %4703 }
 0x3fc   :  { %4284 = vmatpush3.bf16.msra.mxu1 %v4281_v28  ;;  %3929 = vmatprep.mubr.msk.f32.mxu1 %vm460_vm13, %v677_v53  ;;  %v683_v28 = vmul.f32 %v6073_v52, %v667_v43  ;;  %v4706_v15 = vpop.eup %4705  ;;  %v1972_v27 = vmul.f32 %v4704_v61, %v6354_v32 }
 0x3fd   :  { %4310 = vmatprep.subr.bf16.mxu1 %v6436_v30  ;;  %v684_v33 = vmul.f32 %v6922_v31, %v668_v51  ;;  %v4708_v53 = vpop.eup %4707  ;;  %v4500_v31 = vunpack.i.h.bf16 %v6456_v7 }
 0x3fe   :  { %v4710_v54 = vpop.eup %4709  ;;  %v1974_v63 = vmul.f32 %v4708_v53, %v6366_v37  ;;  %v1988_v62 = vsub.f32 2.0, %v1972_v27 }
 0x3ff   :  { %v6443_v29 = vpop.xlane.xlu0 %1941  ;;  %3930 = vmatmul.mubr.msk.f32.gmra.mrb[24].mxu1 %vm460_vm13, %v678_v50  ;;  %v1973_v50 = vmul.f32 %v4706_v15, %v6373_v21  ;;  %v4712_v14 = vpop.eup %4711 }
 0x400   :  { %3932 = vmatprep.mubr.msk.f32.mxu1 %vm460_vm13, %v679_v16  ;;  %v1975_v16 = vmul.f32 %v4710_v54, %v6403_v45  ;;  %v1976_v21 = vmul.f32 %v4712_v14, %v6391_v55  ;;  %v2004_v59 = vmul.f32 %v4704_v61, %v1988_v62 }
 0x401   :  { %v1989_v42 = vsub.f32 2.0, %v1973_v50 }
 0x402   :  { %v1991_v56 = vsub.f32 2.0, %v1975_v16  ;;  %v6923_v16 = vld [vmem:[#allocation41_spill] sm:$0xff] }
 0x403   :  { %v6449_v6 = vpop.xlane.xlu0 %1953  ;;  %3933 = vmatmul.mubr.msk.f32.gmra.mrb[26].mxu1 %vm460_vm13, %v680_v34  ;;  %v1990_v34 = vsub.f32 2.0, %v1974_v63 }
 0x404   :  { %3935 = vmatprep.mubr.msk.f32.mxu1 %vm460_vm13, %v681_v17  ;;  %v2007_v61 = vmul.f32 %v4710_v54, %v1991_v56 }
 0x405   :  { %v2006_v55 = vmul.f32 %v4708_v53, %v1990_v34 }
 0x407   :  { %v6459_v20 = vpop.xlane.xlu0 %2602  ;;  %3936 = vmatmul.mubr.msk.f32.gmra.mrb[28].mxu1 %vm460_vm13, %v682_v3  ;;  %v2005_v3 = vmul.f32 %v4706_v15, %v1989_v42 }
 0x408   :  { %3938 = vmatprep.mubr.msk.f32.mxu1 %vm460_vm13, %v683_v28 }
 0x409   :  { %v2021_v42 = vmul.f32 %v6923_v16, %v2005_v3 }
 0x40b   :  { %v6466_v25 = vpop.xlane.xlu0 %2608  ;;  %3939 = vmatmul.mubr.msk.f32.gmra.mrb[30].mxu1 %vm460_vm13, %v684_v33  ;;  %v1909_v52 = vpop.xlane.xlu1 %1908  ;;  %v4499_v33 = vunpack.i.l.bf16 %v6456_v7 }
 0x40c   :  { %4713 = vrcp.f32 %v1909_v52 }
 0x40d   :  { %4715 = vrcp.f32 %v6425_v2 }
 0x40e   :  { %4717 = vrcp.f32 %v6415_v4 }
 0x40f   :  { %v6471_v44 = vpop.xlane.xlu0 %2605  ;;  %v6473_v13 = vpop.xlane.xlu1 %1935  ;;  %4719 = vrcp.f32 %v6433_v19 }
 0x410   :  { %4721 = vrcp.f32 %v6473_v13 }
 0x413   :  { %v6478_v0 = vpop.xlane.xlu0 %2614  ;;  %v6480_v9 = vpop.xlane.xlu1 %1938 }
 0x414   :  { %4723 = vrcp.f32 %v6480_v9 }
 0x415   :  { %4725 = vrcp.f32 %v6443_v29 }
 0x416   :  { %v4714_v8 = vpop.eup %4713 }
 0x417   :  { %v6487_v32 = vpop.xlane.xlu0 %2611  ;;  %v6489_v10 = vpop.xlane.xlu1 %1947  ;;  %v1971_v5 = vmul.f32 %v4714_v8, %v1909_v52  ;;  %v1992_v52 = vsub.f32 2.0, %v1976_v21 }
 0x418   :  { %v4716_v12 = vpop.eup %4715 }
 0x419   :  { %v1987_v37 = vsub.f32 2.0, %v1971_v5  ;;  %v1977_v17 = vmul.f32 %v4716_v12, %v6425_v2  ;;  %v4718_v48 = vpop.eup %4717  ;;  %v2020_v2 = vmul.f32 %v6082_v24, %v2004_v59  ;;  %v6924_v24 = vld [vmem:[#allocation37_spill] sm:$0xff]  ;;  %v2008_v5 = vmul.f32 %v4712_v14, %v1992_v52 }
 0x41a   :  { %v4720_v28 = vpop.eup %4719  ;;  %v1978_v50 = vmul.f32 %v4718_v48, %v6415_v4  ;;  %v2022_v54 = vmul.f32 %v6924_v24, %v2006_v55  ;;  %v2023_v4 = vmul.f32 %v6113_v1, %v2007_v61 }
 0x41b   :  { %v6494_v45 = vpop.xlane.xlu0 %2620  ;;  %v1945_v43 = vpop.xlane.xlu1 %1944  ;;  %v2003_v51 = vmul.f32 %v4714_v8, %v1987_v37  ;;  %v1993_v63 = vsub.f32 2.0, %v1977_v17  ;;  %v1979_v7 = vmul.f32 %v4720_v28, %v6433_v19 }
 0x41c   :  { %4727 = vrcp.f32 %v1945_v43  ;;  %v4722_v62 = vpop.eup %4721  ;;  %v1994_v34 = vsub.f32 2.0, %v1978_v50 }
 0x41d   :  { %v2019_v27 = vmul.f32 %v6155_v36, %v2003_v51  ;;  %4729 = vrcp.f32 %v6489_v10  ;;  %v4313_v36 = vpack.c.bf16 %v4500_v31, %v4499_v33  ;;  %v2009_v19 = vmul.f32 %v4716_v12, %v1993_v63 }
 0x41e   :  { %v4724_v53 = vpop.eup %4723  ;;  %v1980_v21 = vmul.f32 %v4722_v62, %v6473_v13  ;;  %v1995_v17 = vsub.f32 2.0, %v1979_v7  ;;  %v2024_v12 = vmul.f32 %v6101_v26, %v2008_v5  ;;  %v2010_v13 = vmul.f32 %v4718_v48, %v1994_v34 }
 0x41f   :  { %v6502_v15 = vpop.xlane.xlu0 %2632  ;;  %v1951_v8 = vpop.xlane.xlu1 %1950  ;;  %3997 = vmatprep.mubr.msk.f32.mxu1 %vm460_vm13, %v2019_v27  ;;  %v1981_v3 = vmul.f32 %v4724_v53, %v6480_v9  ;;  %v2025_v9 = vmul.f32 %v6123_v58, %v2009_v19 }
 0x420   :  { %4731 = vrcp.f32 %v1951_v8  ;;  %3998 = vmatmul.mubr.msk.f32.vlgmr.msra.gmra.mrb[16].mxu1 %vm460_vm13, %v2020_v2  ;;  %v4726_v56 = vpop.eup %4725  ;;  %v1996_v33 = vsub.f32 2.0, %v1980_v21  ;;  %v2011_v27 = vmul.f32 %v4720_v28, %v1995_v17  ;;  %v2026_v26 = vmul.f32 %v6118_v23, %v2010_v13 }
 0x421   :  { %4733 = vrcp.f32 %v6449_v6  ;;  %4312 = vmatpush3.bf16.msra.mxu1 %v6436_v30  ;;  %4000 = vmatprep.mubr.msk.f32.mxu1 %vm460_vm13, %v2021_v42  ;;  %v1982_v31 = vmul.f32 %v4726_v56, %v6443_v29  ;;  %v1997_v2 = vsub.f32 2.0, %v1981_v3 }
 0x422   :  { %4314 = vmatprep.subr.bf16.mxu1 %v4313_v36  ;;  %v2012_v29 = vmul.f32 %v4722_v62, %v1996_v33  ;;  %v2027_v58 = vmul.f32 %v6130_v22, %v2011_v27 }
 0x423   :  { %v4503_v37 = vpop.permute.xlu0 %4502  ;;  %v2600_v59 = vpop.xlane.xlu1 %2599  ;;  %v1998_v48 = vsub.f32 2.0, %v1982_v31  ;;  %v2013_v28 = vmul.f32 %v4724_v53, %v1997_v2 }
 0x424   :  { %v4505_v14 = vunpack.i.h.bf16 %v4503_v37  ;;  %v4504_v51 = vunpack.i.l.bf16 %v4503_v37  ;;  %4735 = vrcp.f32 %v2600_v59  ;;  %4001 = vmatmul.mubr.msk.f32.gmra.mrb[18].mxu1 %vm460_vm13, %v2022_v54 }
 0x425   :  { %4316 = vmatpush3.bf16.msra.mxu1 %v4313_v36  ;;  %4003 = vmatprep.mubr.msk.f32.mxu1 %vm460_vm13, %v2023_v4  ;;  %4737 = vrcp.f32 %v6459_v20  ;;  %v2014_v23 = vmul.f32 %v4726_v56, %v1998_v48  ;;  %v2029_v22 = vmul.f32 %v6174_v41, %v2013_v28 }
 0x426   :  { %v4317_v30 = vpack.c.bf16 %v4505_v14, %v4504_v51  ;;  %v4728_v1 = vpop.eup %4727  ;;  %4739 = vrcp.f32 %v6471_v44 }
 0x427   :  { %v6519_v55 = vpop.xlane.xlu1 %2617  ;;  %v4730_v52 = vpop.eup %4729  ;;  %v1983_v61 = vmul.f32 %v4728_v1, %v1945_v43  ;;  %v2030_v4 = vmul.f32 %v6137_v18, %v2014_v23  ;;  %4741 = vrcp.f32 %v6466_v25 }
 0x428   :  { %4318 = vmatprep.subr.bf16.mxu1 %v4317_v30  ;;  %4004 = vmatmul.mubr.msk.f32.gmra.mrb[20].mxu1 %vm460_vm13, %v2024_v12  ;;  %v1984_v63 = vmul.f32 %v4730_v52, %v6489_v10  ;;  %v2028_v10 = vmul.f32 %v6164_v60, %v2012_v29  ;;  %4743 = vrcp.f32 %v6487_v32 }
 0x429   :  { %4320 = vmatpush3.bf16.msra.mxu1 %v4317_v30  ;;  %4006 = vmatprep.mubr.msk.f32.mxu1 %vm460_vm13, %v2025_v9  ;;  %v1999_v43 = vsub.f32 2.0, %v1983_v61  ;;  %4745 = vrcp.f32 %v6478_v0 }
 0x42a   :  { %v4732_v50 = vpop.eup %4731  ;;  %v2000_v24 = vsub.f32 2.0, %v1984_v63  ;;  %4747 = vrcp.f32 %v6519_v55 }
 0x42b   :  { %v6526_v16 = vpop.xlane.xlu1 %2626  ;;  %v4734_v42 = vpop.eup %4733  ;;  %v1985_v7 = vmul.f32 %v4732_v50, %v1951_v8  ;;  %v2015_v53 = vmul.f32 %v4728_v1, %v1999_v43  ;;  %4749 = vrcp.f32 %v6494_v45 }
 0x42c   :  { %4007 = vmatmul.mubr.msk.f32.gmra.mrb[22].mxu1 %vm460_vm13, %v2026_v26  ;;  %v1986_v62 = vmul.f32 %v4734_v42, %v6449_v6  ;;  %v2016_v6 = vmul.f32 %v4730_v52, %v2000_v24 }
 0x42d   :  { %4009 = vmatprep.mubr.msk.f32.mxu1 %vm460_vm13, %v2027_v58  ;;  %v2001_v5 = vsub.f32 2.0, %v1985_v7  ;;  %v2031_v60 = vmul.f32 %v6194_v46, %v2015_v53 }
 0x42e   :  { %v4736_v36 = vpop.eup %4735  ;;  %v2002_v34 = vsub.f32 2.0, %v1986_v62 }
 0x42f   :  { %v6534_v54 = vpop.xlane.xlu1 %2623  ;;  %v2662_v8 = vmul.f32 %v4736_v36, %v2600_v59  ;;  %v2017_v21 = vmul.f32 %v4732_v50, %v2001_v5  ;;  %v2032_v59 = vmul.f32 %v6183_v40, %v2016_v6  ;;  %v4738_v56 = vpop.eup %4737  ;;  %v6926_v5 = vld [vmem:[#allocation43_spill] sm:$0xff] }
 0x430   :  { %4010 = vmatmul.mubr.msk.f32.gmra.mrb[24].mxu1 %vm460_vm13, %v2028_v10  ;;  %v2018_v41 = vmul.f32 %v4734_v42, %v2002_v34  ;;  %v4740_v51 = vpop.eup %4739  ;;  %v2663_v30 = vmul.f32 %v4738_v56, %v6459_v20  ;;  %4751 = vrcp.f32 %v6534_v54 }
 0x431   :  { %4012 = vmatprep.mubr.msk.f32.mxu1 %vm460_vm13, %v2029_v22  ;;  %v2678_v37 = vsub.f32 2.0, %v2662_v8  ;;  %v2033_v17 = vmul.f32 %v6203_v39, %v2017_v21  ;;  %v4742_v39 = vpop.eup %4741  ;;  %v2664_v1 = vmul.f32 %v4740_v51, %v6471_v44  ;;  %4753 = vrcp.f32 %v6526_v16 }
 0x432   :  { %v2034_v46 = vmul.f32 %v6143_v47, %v2018_v41  ;;  %v4744_v47 = vpop.eup %4743  ;;  %v2679_v13 = vsub.f32 2.0, %v2663_v30 }
 0x433   :  { %v6541_v19 = vpop.xlane.xlu1 %2629  ;;  %v2694_v3 = vmul.f32 %v4736_v36, %v2678_v37  ;;  %v4746_v20 = vpop.eup %4745  ;;  %v2680_v31 = vsub.f32 2.0, %v2664_v1  ;;  %v2666_v33 = vmul.f32 %v4744_v47, %v6487_v32 }
 0x434   :  { %4013 = vmatmul.mubr.msk.f32.gmra.mrb[26].mxu1 %vm460_vm13, %v2030_v4  ;;  %4755 = vrcp.f32 %v6541_v19  ;;  %v4748_v9 = vpop.eup %4747  ;;  %v2695_v61 = vmul.f32 %v4738_v56, %v2679_v13  ;;  %v2667_v50 = vmul.f32 %v4746_v20, %v6478_v0 }
 0x435   :  { %4015 = vmatprep.mubr.msk.f32.mxu1 %vm460_vm13, %v2031_v60  ;;  %v2710_v40 = vmul.f32 %v6216_v38, %v2694_v3  ;;  %v2665_v38 = vmul.f32 %v4742_v39, %v6466_v25  ;;  %4757 = vrcp.f32 %v6502_v15  ;;  %v4750_v25 = vpop.eup %4749  ;;  %v2696_v48 = vmul.f32 %v4740_v51, %v2680_v31 }
 0x436   :  { %v2682_v29 = vsub.f32 2.0, %v2666_v33  ;;  %v2668_v63 = vmul.f32 %v4748_v9, %v6519_v55  ;;  %v2711_v32 = vmul.f32 %v6150_v35, %v2695_v61  ;;  %v2683_v28 = vsub.f32 2.0, %v2667_v50  ;;  %v6925_v35 = vld [vmem:[#allocation42_spill] sm:$0xff]  ;;  %v6931_v33 = vld [vmem:[#allocation44_spill] sm:$0xff] }
 0x437   :  { %v6549_v18 = vpop.xlane.xlu1 %2638  ;;  %v2681_v44 = vsub.f32 2.0, %v2665_v38  ;;  %v2669_v43 = vmul.f32 %v4750_v25, %v6494_v45  ;;  %v2712_v7 = vmul.f32 %v6170_v49, %v2696_v48 }
 0x438   :  { %4016 = vmatmul.mubr.msk.f32.gmra.mrb[28].mxu1 %vm460_vm13, %v2032_v59  ;;  %v2698_v36 = vmul.f32 %v4744_v47, %v2682_v29  ;;  %v2684_v23 = vsub.f32 2.0, %v2668_v63  ;;  %v2699_v24 = vmul.f32 %v4746_v20, %v2683_v28  ;;  %v6930_v47 = vld [vmem:[#allocation52_spill] sm:$0xff] }
 0x439   :  { %4018 = vmatprep.mubr.msk.f32.mxu1 %vm460_vm13, %v2033_v17  ;;  %v2697_v58 = vmul.f32 %v4742_v39, %v2681_v44  ;;  %v2685_v22 = vsub.f32 2.0, %v2669_v43  ;;  %v6934_v63 = vld [vmem:[#allocation48_spill] sm:$0xff] }
 0x43a   :  { %v4752_v42 = vpop.eup %4751  ;;  %v2714_v8 = vmul.f32 %v6926_v5, %v2698_v36  ;;  %v2700_v4 = vmul.f32 %v4748_v9, %v2684_v23  ;;  %v6935_v43 = vld [vmem:[#allocation12_spill] sm:$0xff]  ;;  %v2980_v23 = vld [vmem:[%s6688_s3 + $0x8] sm:$0xff] }
 0x43b   :  { %v6557_v14 = vpop.xlane.xlu1 %2635  ;;  %v4754_v0 = vpop.eup %4753  ;;  %v2670_v55 = vmul.f32 %v4752_v42, %v6534_v54  ;;  %v2713_v10 = vmul.f32 %v6925_v35, %v2697_v58  ;;  %v6927_v54 = vld [vmem:[#allocation45_spill] sm:$0xff]  ;;  %v2701_v21 = vmul.f32 %v4750_v25, %v2685_v22 }
 0x43c   :  { %4019 = vmatmul.mubr.msk.f32.gmra.mrb[30].mxu1 %vm460_vm13, %v2034_v46  ;;  %4759 = vrcp.f32 %v6557_v14  ;;  %v2671_v45 = vmul.f32 %v4754_v0, %v6526_v16  ;;  %v2715_v60 = vmul.f32 %v6927_v54, %v2699_v24  ;;  %v6928_v16 = vld [vmem:[#allocation49_spill] sm:$0xff] }
 0x43d   :  { %4077 = vmatprep.mubr.msk.f32.mxu1 %vm460_vm13, %v2710_v40  ;;  %4761 = vrcp.f32 %v6549_v18  ;;  %v2686_v49 = vsub.f32 2.0, %v2670_v55  ;;  %v2716_v56 = vmul.f32 %v6928_v16, %v2700_v4  ;;  %v6929_v40 = vld [vmem:[#allocation47_spill] sm:$0xff]  ;;  %v2982_v4 = vld [vmem:[%s6688_s3 + $0x18] sm:$0xff] }
 0x43e   :  { %v4756_v62 = vpop.eup %4755  ;;  %v2687_v41 = vsub.f32 2.0, %v2671_v45  ;;  %v2717_v30 = vmul.f32 %v6929_v40, %v2701_v21 }
 0x43f   :  { %v6566_v12 = vpop.xlane.xlu1 %2641  ;;  %v4758_v53 = vpop.eup %4757  ;;  %v2672_v34 = vmul.f32 %v4756_v62, %v6541_v19  ;;  %v2702_v17 = vmul.f32 %v4752_v42, %v2686_v49 }
 0x440   :  { %4763 = vrcp.f32 %v6566_v12  ;;  %v2673_v37 = vmul.f32 %v4758_v53, %v6502_v15  ;;  %v2703_v1 = vmul.f32 %v4754_v0, %v2687_v41 }
 0x441   :  { %v2688_v3 = vsub.f32 2.0, %v2672_v34  ;;  %v2718_v13 = vmul.f32 %v6930_v47, %v2702_v17 }
 0x442   :  { %v2689_v39 = vsub.f32 2.0, %v2673_v37 }
 0x443   :  { %v4508_v52 = vpop.permute.xlu1 %4507  ;;  %v2704_v38 = vmul.f32 %v4756_v62, %v2688_v3 }
 0x444   :  { %v4510_v27 = vunpack.i.h.bf16 %v4508_v52  ;;  %v4509_v2 = vunpack.i.l.bf16 %v4508_v52  ;;  %v2719_v52 = vmul.f32 %v6931_v33, %v2703_v1 }
 0x446   :  { %v4321_v26 = vpack.c.bf16 %v4510_v27, %v4509_v2  ;;  %v4760_v6 = vpop.eup %4759  ;;  %v6932_v27 = vld [vmem:[#allocation46_spill] sm:$0xff] }
 0x447   :  { %v4762_v59 = vpop.eup %4761  ;;  %v2674_v46 = vmul.f32 %v4760_v6, %v6557_v14  ;;  %v2705_v14 = vmul.f32 %v4758_v53, %v2689_v39  ;;  %v2720_v2 = vmul.f32 %v6932_v27, %v2704_v38  ;;  %v3261_v16 = vpop.permute.xlu1 %3260 }
 0x448   :  { %4322 = vmatprep.subr.bf16.mxu1 %v4321_v26  ;;  %v2675_v15 = vmul.f32 %v4762_v59, %v6549_v18  ;;  %v6933_v18 = vld [vmem:[#allocation40_spill] sm:$0xff] }
 0x449   :  { %4324 = vmatpush3.bf16.msra.mxu1 %v4321_v26  ;;  %v2690_v20 = vsub.f32 2.0, %v2674_v46  ;;  %v2721_v50 = vmul.f32 %v6933_v18, %v2705_v14  ;;  %v3508_v46 = vld [vmem:[%s6689_s4] ss:$0 sm:$0xff] }
 0x44a   :  { %v4764_v51 = vpop.eup %4763  ;;  %v2691_v9 = vsub.f32 2.0, %v2675_v15 }
 0x44b   :  { %v2676_v31 = vmul.f32 %v4764_v51, %v6566_v12  ;;  %v2706_v61 = vmul.f32 %v4760_v6, %v2690_v20 }
 0x44c   :  { %4078 = vmatmul.mubr.msk.f32.vlgmr.msra.gmra.mrb[16].mxu1 %vm460_vm13, %v2711_v32  ;;  %v2707_v26 = vmul.f32 %v4762_v59, %v2691_v9 }
 0x44d   :  { %4080 = vmatprep.mubr.msk.f32.mxu1 %vm460_vm13, %v2712_v7  ;;  %v2692_v44 = vsub.f32 2.0, %v2676_v31  ;;  %v2722_v25 = vmul.f32 %v6258_v57, %v2706_v61  ;;  %v2985_v57 = vld [vmem:[%s6688_s3 + $0x30] sm:$0xff]  ;;  %v2986_v7 = vld [vmem:[%s6688_s3 + $0x38] sm:$0xff] }
 0x44e   :  { %v2723_v42 = vmul.f32 %v6934_v63, %v2707_v26  ;;  %v4329_v36 = vpack.c.bf16 %v2986_v7, %v2985_v57 }
 0x44f   :  { %v2708_v48 = vmul.f32 %v4764_v51, %v2692_v44 }
 0x450   :  { %4081 = vmatmul.mubr.msk.f32.gmra.mrb[18].mxu1 %vm460_vm13, %v2713_v10  ;;  %4330 = vmatprep.subr.bf16.mxu0 %v4329_v36 }
 0x451   :  { %4083 = vmatprep.mubr.msk.f32.mxu1 %vm460_vm13, %v2714_v8  ;;  %v2724_v58 = vmul.f32 %v6270_v11, %v2708_v48  ;;  %4332 = vmatpush3.bf16.msra.mxu0 %v4329_v36  ;;  %v2979_v11 = vld [vmem:[%s6688_s3] sm:$0xff]  ;;  %v2981_v8 = vld [vmem:[%s6688_s3 + $0x10] sm:$0xff] }
 0x452   :  { %v4333_v55 = vpack.c.bf16 %v2980_v23, %v2979_v11  ;;  %v4337_v6 = vpack.c.bf16 %v2982_v4, %v2981_v8 }
 0x454   :  { %v2645_v19 = vpop.xlane.xlu0 %2644  ;;  %4084 = vmatmul.mubr.msk.f32.gmra.mrb[20].mxu1 %vm460_vm13, %v2715_v60  ;;  %4334 = vmatprep.subr.bf16.mxu0 %v4333_v55 }
 0x455   :  { %4765 = vrcp.f32 %v2645_v19  ;;  %4086 = vmatprep.mubr.msk.f32.mxu1 %vm460_vm13, %v2716_v56  ;;  %v3263_v56 = vpop.permute.xlu1 %3262 }
 0x458   :  { %4087 = vmatmul.mubr.msk.f32.gmra.mrb[22].mxu1 %vm460_vm13, %v2717_v30 }
 0x459   :  { %4089 = vmatprep.mubr.msk.f32.mxu1 %vm460_vm13, %v2718_v13  ;;  %v3265_v17 = vpop.permute.xlu1 %3264 }
 0x45c   :  { %4090 = vmatmul.mubr.msk.f32.gmra.mrb[24].mxu1 %vm460_vm13, %v2719_v52 }
 0x45d   :  { %4092 = vmatprep.mubr.msk.f32.mxu1 %vm460_vm13, %v2720_v2  ;;  %v3267_v3 = vpop.permute.xlu1 %3266  ;;  %v3271_v2 = vpop.permute.xlu0 %3270 }
 0x45f   :  { %v4766_v12 = vpop.eup %4765 }
 0x460   :  { %v2677_v29 = vmul.f32 %v4766_v12, %v2645_v19  ;;  %4093 = vmatmul.mubr.msk.f32.gmra.mrb[26].mxu1 %vm460_vm13, %v2721_v50 }
 0x461   :  { %4095 = vmatprep.mubr.msk.f32.mxu1 %vm460_vm13, %v2722_v25  ;;  %v3269_v30 = vpop.permute.xlu1 %3268 }
 0x462   :  { %v2693_v32 = vsub.f32 2.0, %v2677_v29 }
 0x464   :  { %v2709_v28 = vmul.f32 %v4766_v12, %v2693_v32  ;;  %4096 = vmatmul.mubr.msk.f32.gmra.mrb[28].mxu1 %vm460_vm13, %v2723_v42 }
 0x465   :  { %4098 = vmatprep.mubr.msk.f32.mxu1 %vm460_vm13, %v2724_v58  ;;  %v3273_v14 = vpop.permute.xlu1 %3272 }
 0x466   :  { %v2725_v0 = vmul.f32 %v6935_v43, %v2709_v28 }
 0x468   :  { %4099 = vmatmul.mubr.msk.f32.gmra.mrb[30].mxu1 %vm460_vm13, %v2725_v0 }
 0x469   :  { %v3275_v25 = vpop.permute.xlu1 %3274 }
 0x51f   :  { %v4079_v62 = vpop.f32.mrb[16].mxu1 }
 0x520   :  { %v2884_v35 = vpop.f32.mrb[17].mxu1 }
 0x523   :  { %v4082_v10 = vpop.f32.mrb[18].mxu1 }
 0x524   :  { %v2894_v24 = vpop.f32.mrb[19].mxu1 }
 0x527   :  { %v4085_v22 = vpop.f32.mrb[20].mxu1 }
 0x528   :  { %v2904_v45 = vpop.f32.mrb[21].mxu1 }
 0x52b   :  { %v4088_v53 = vpop.f32.mrb[22].mxu1 }
 0x52c   :  { %v2914_v5 = vpop.f32.mrb[23].mxu1 }
 0x52f   :  { %v4091_v49 = vpop.f32.mrb[24].mxu1 }
 0x530   :  { %v2924_v34 = vpop.f32.mrb[25].mxu1 }
 0x531   :  { %4109 = vmatprep.mubr.msk.f32.mxu0 %vm242_vm11, %v2924_v34 }
 0x532   :  { %4110 = vmatmul.mubr.msk.f32.vlgmr.msra.gmra.mrb[56].mxu0 %vm242_vm11, %v4091_v49 }
 0x533   :  { %v4094_v54 = vpop.f32.mrb[26].mxu1  ;;  %4336 = vmatpush3.bf16.msra.mxu0 %v4333_v55 }
 0x534   :  { %v2934_v60 = vpop.f32.mrb[27].mxu1  ;;  %4338 = vmatprep.subr.bf16.mxu0 %v4337_v6 }
 0x535   :  { %4112 = vmatprep.mubr.msk.f32.mxu0 %vm242_vm11, %v2934_v60 }
 0x536   :  { %4113 = vmatmul.mubr.msk.f32.gmra.mrb[58].mxu0 %vm242_vm11, %v4094_v54 }
 0x537   :  { %v4097_v21 = vpop.f32.mrb[28].mxu1  ;;  %4340 = vmatpush3.bf16.msra.mxu0 %v4337_v6 }
 0x538   :  { %v2944_v37 = vpop.f32.mrb[29].mxu1 }
 0x539   :  { %4115 = vmatprep.mubr.msk.f32.mxu0 %vm242_vm11, %v2944_v37 }
 0x53a   :  { %4116 = vmatmul.mubr.msk.f32.gmra.mrb[60].mxu0 %vm242_vm11, %v4097_v21 }
 0x53b   :  { %v4100_v41 = vpop.f32.mrb[30].mxu1 }
 0x53c   :  { %v2954_v59 = vpop.f32.mrb[31].mxu1 }
 0x53d   :  { %4118 = vmatprep.mubr.msk.f32.mxu0 %vm242_vm11, %v2954_v59 }
 0x53e   :  { %4119 = vmatmul.mubr.msk.f32.gmra.mrb[62].mxu0 %vm242_vm11, %v4100_v41 }
 0x53f   :  { %4129 = vmatprep.mubr.msk.f32.mxu0 %vm242_vm11, %v2884_v35 }
 0x542   :  { %4130 = vmatmul.mubr.msk.f32.vlgmr.msra.gmra.mrb[56].mxu0 %vm242_vm11, %v4079_v62 }
 0x543   :  { %4132 = vmatprep.mubr.msk.f32.mxu0 %vm242_vm11, %v2894_v24 }
 0x546   :  { %4133 = vmatmul.mubr.msk.f32.gmra.mrb[58].mxu0 %vm242_vm11, %v4082_v10 }
 0x547   :  { %4135 = vmatprep.mubr.msk.f32.mxu0 %vm242_vm11, %v2904_v45 }
 0x54a   :  { %4136 = vmatmul.mubr.msk.f32.gmra.mrb[60].mxu0 %vm242_vm11, %v4085_v22 }
 0x54b   :  { %4138 = vmatprep.mubr.msk.f32.mxu0 %vm242_vm11, %v2914_v5 }
 0x54e   :  { %4139 = vmatmul.mubr.msk.f32.gmra.mrb[62].mxu0 %vm242_vm11, %v4088_v53 }
 0x615   :  { %v4131_v51 = vpop.f32.mrb[56].mxu0 }
 0x616   :  { %v3253_v19 = vadd.f32 %v4131_v51, %v3508_v46  ;;  %v3206_v40 = vpop.f32.mrb[57].mxu0 }
 0x617   :  { %v3252_v39 = vadd.f32 %v3508_v46, %v3206_v40 }
 0x618   :  { %v3285_v1 = vadd.f32 %v3263_v56, %v3253_v19 }
 0x619   :  { %v3284_v15 = vadd.f32 %v3261_v16, %v3252_v39  ;;  %v4134_v47 = vpop.f32.mrb[58].mxu0 }
 0x61a   :  { %3293 = vst.msk [vmem:[%s6690_s5 + $0x8] sm:$0xff] %vm242_vm11, %v3285_v1  ;;  %v3255_v13 = vadd.f32 %v4134_v47, %v3508_v46  ;;  %v3216_v38 = vpop.f32.mrb[59].mxu0 }
 0x61b   :  { %3292 = vst.msk [vmem:[%s6690_s5] sm:$0xff] %vm242_vm11, %v3284_v15  ;;  %v3254_v20 = vadd.f32 %v3508_v46, %v3216_v38 }
 0x61c   :  { %v3287_v31 = vadd.f32 %v3267_v3, %v3255_v13 }
 0x61d   :  { %v3286_v33 = vadd.f32 %v3265_v17, %v3254_v20  ;;  %v4137_v52 = vpop.f32.mrb[60].mxu0 }
 0x61e   :  { %3295 = vst.msk [vmem:[%s6690_s5 + $0x18] sm:$0xff] %vm242_vm11, %v3287_v31  ;;  %v3257_v9 = vadd.f32 %v4137_v52, %v3508_v46  ;;  %v3226_v27 = vpop.f32.mrb[61].mxu0 }
 0x61f   :  { %3294 = vst.msk [vmem:[%s6690_s5 + $0x10] sm:$0xff] %vm242_vm11, %v3286_v33  ;;  %v3256_v61 = vadd.f32 %v3508_v46, %v3226_v27 }
 0x620   :  { %v3289_v44 = vadd.f32 %v3271_v2, %v3257_v9 }
 0x621   :  { %v3288_v18 = vadd.f32 %v3269_v30, %v3256_v61  ;;  %v4140_v50 = vpop.f32.mrb[62].mxu0 }
 0x622   :  { %3297 = vst.msk [vmem:[%s6690_s5 + $0x28] sm:$0xff] %vm242_vm11, %v3289_v44  ;;  %v3259_v26 = vadd.f32 %v4140_v50, %v3508_v46  ;;  %v3236_v12 = vpop.f32.mrb[63].mxu0 }
 0x623   :  { %3296 = vst.msk [vmem:[%s6690_s5 + $0x20] sm:$0xff] %vm242_vm11, %v3288_v18  ;;  %v3258_v48 = vadd.f32 %v3508_v46, %v3236_v12 }
 0x624   :  { %v3291_v29 = vadd.f32 %v3275_v25, %v3259_v26 }
 0x625   :  { %v3290_v63 = vadd.f32 %v3273_v14, %v3258_v48 }
 0x626   :  { %3299 = vst.msk [vmem:[%s6690_s5 + $0x38] sm:$0xff] %vm242_vm11, %v3291_v29 }
 0x627   :  { %3298 = vst.msk [vmem:[%s6690_s5 + $0x30] sm:$0xff] %vm242_vm11, %v3290_v63 }

</bundles_post_ra>
